<compile_context>
chip_gen: v7x
topology: tpu7x:2x2x1
jax: 0.10.0
libtpu: 0.0.40
codegen_flags: <defaults>
</compile_context>

<pallas_src>
import jax
import jax.numpy as jnp
from jax import lax
from jax.experimental import pallas as pl
from jax.experimental.pallas import tpu as pltpu

# ---------------- model / graph-shape constants ----------------
HIDDEN_DIM = 32          # hidden_dim / mem_dim (D)
VOCAB_SIZE = 50
VOCAB_PAD = 64           # embedding rows padded to a sublane-friendly size
N_CLASSES = 8
N_SRC = 32               # source nodes per block/graph
N_DST = 16               # destination nodes per block/graph (B of the reducer)
IN_DEGREE = 4            # in-edges per dst node (last edge == self-loop edge)
N_CHILD = IN_DEGREE - 1  # Lc (self-loop dropped, h_c[:-1] in the reducer)
LN_EPS = 1e-5            # PyTorch nn.LayerNorm default eps
OUT_LANES = 128          # packed lane-dense output width

# ---------------- batching / layout constants ----------------
BLOCKS_PER_STEP = 8                       # graphs stacked per grid step -> M>=128
SRC_ROWS = BLOCKS_PER_STEP * N_SRC        # 256 stacked source rows per step
DST_ROWS = BLOCKS_PER_STEP * N_DST        # 128 stacked destination rows per step
IDX_ROWS = SRC_ROWS + N_CHILD * DST_ROWS  # 640 int32 rows per step (tok + edges)
LOG2_NDST = 4
assert N_DST == 1 << LOG2_NDST

# weight-slab row layout (single [W_ROWS, 128] f32 operand)
ROW_EW = 0                           # rows  0:64   EW = emb_pad @ [Wi|Wo|Wu|Wf]
ROW_WFC = VOCAB_PAD                  # rows 64:96   fc_classify weight (W.T, lane-pad)
ROW_BGATES = ROW_WFC + HIDDEN_DIM    # row 96       [b_i | b_o | b_u | b_f]
ROW_LNG = ROW_BGATES + 1             # row 97       LayerNorm gamma (lanes 0:32)
ROW_LNB = ROW_LNG + 1                # row 98       LayerNorm beta
ROW_BFC = ROW_LNB + 1                # row 99       fc_classify bias (lanes 0:8)
W_ROWS = 104                         # padded to a multiple of 8


# ----------------------------------------------------------------------------
# Pallas kernel: embedding + mailbox gather (one-hot MXU matmuls), TreeLSTM
# reducer, fused LayerNorm(h)/LayerNorm(c), fc_classify — all fused, batched.
# ----------------------------------------------------------------------------
def _gte_kernel(idx_ref, w_ref, out_ref):
    D = HIDDEN_DIM
    C = N_CLASSES

    # ---- unpack the single weight slab (static slices, no extra DMAs) ------
    ew = w_ref[ROW_EW:ROW_EW + VOCAB_PAD, :]                    # [64, 128]
    w_fc = w_ref[ROW_WFC:ROW_WFC + D, :]                        # [32, 128]
    tail = w_ref[ROW_BGATES:ROW_BGATES + 8, :]                  # [8, 128] aligned tile
    b_gates = tail[0:1, :]                                      # [1, 128]
    ln_g = tail[ROW_LNG - ROW_BGATES:ROW_LNG - ROW_BGATES + 1, 0:D]   # [1, 32]
    ln_b = tail[ROW_LNB - ROW_BGATES:ROW_LNB - ROW_BGATES + 1, 0:D]   # [1, 32]
    b_fc = tail[ROW_BFC - ROW_BGATES:ROW_BFC - ROW_BGATES + 1, 0:C]   # [1, 8]

    # ---- graph glue fused in-kernel: gathers as one-hot matmuls on the MXU --
    # Per-source-node gate pre-activations: onehot(token_id) @ (emb @ W_gates).
    tok = idx_ref[0:SRC_ROWS, :]                                # [256, 1] int32
    voc_iota = lax.broadcasted_iota(jnp.int32, (SRC_ROWS, VOCAB_PAD), 1)
    sel_tok = (voc_iota == tok).astype(jnp.float32)             # [256, 64]
    gates_src = jnp.dot(sel_tok, ew,
                        preferred_element_type=jnp.float32)     # [256, 128]

    # Child-sum folded into the gather: sel_sum[d, s] = #children of stacked
    # dst row d referencing stacked src row s.  Edges are graph-local; the
    # graph offset within the stack is added with an in-kernel iota (shift).
    # Self-loop edge (last in-edge) was dropped wrapper-side == h_c[:-1].
    dst_iota = lax.broadcasted_iota(jnp.int32, (DST_ROWS, 1), 0)
    graph_off = (dst_iota >> LOG2_NDST) * N_SRC                 # g_local * N_SRC
    src_iota = lax.broadcasted_iota(jnp.int32, (DST_ROWS, SRC_ROWS), 1)
    sel_sum = jnp.zeros((DST_ROWS, SRC_ROWS), jnp.float32)
    for k in range(N_CHILD):
        e_k = idx_ref[SRC_ROWS + k * DST_ROWS:SRC_ROWS + (k + 1) * DST_ROWS, :]
        sel_sum = sel_sum + (src_iota == (e_k + graph_off)).astype(jnp.float32)

    # ---- TreeLSTM reducer (i/o/u gates).  The f-gate / fc path is identically
    # zero on this first-layer block (node_feat c-half is the zero pad), so it
    # is dropped — mathematically exact for this model.
    pre = jnp.dot(sel_sum, gates_src,
                  preferred_element_type=jnp.float32) + b_gates  # [128, 128]
    i_gate = jax.nn.sigmoid(pre[:, 0 * D:1 * D])
    o_gate = jax.nn.sigmoid(pre[:, 1 * D:2 * D])
    u_gate = jnp.tanh(pre[:, 2 * D:3 * D])
    c_out = i_gate * u_gate
    h_out = o_gate * jnp.tanh(c_out)

    # ---- one fused LayerNorm over stacked [h; c] (PyTorch norms both) -------
    hc = jnp.concatenate([h_out, c_out], axis=0)                # [256, 32]
    mu = jnp.mean(hc, axis=-1, keepdims=True)
    var = jnp.mean((hc - mu) ** 2, axis=-1, keepdims=True)
    hc_ln = (hc - mu) * lax.rsqrt(var + LN_EPS) * ln_g + ln_b
    h_ln = hc_ln[0:DST_ROWS, :]
    c_ln = hc_ln[DST_ROWS:2 * DST_ROWS, :]

    # ---- out_feature = fc_classify(h_ln) ------------------------------------
    logits = jnp.dot(h_ln, w_fc,
                     preferred_element_type=jnp.float32)[:, 0:C] + b_fc

    # ---- single lane-dense [DST_ROWS, 128] output slab ----------------------
    pad = jnp.zeros((DST_ROWS, OUT_LANES - 2 * D - C), jnp.float32)
    out_ref[...] = jnp.concatenate([h_ln, c_ln, logits, pad], axis=1)


def gte_forward_pallas(idx_packed, w_slab):
    """idx_packed: [num_steps*IDX_ROWS, 1] int32 (tok + child-major edges per
    stacked step); w_slab: [W_ROWS, 128] f32 fused weight slab."""
    num_steps = idx_packed.shape[0] // IDX_ROWS
    num_graphs = num_steps * BLOCKS_PER_STEP

    flops = num_steps * 2 * (SRC_ROWS * VOCAB_PAD * 128
                             + DST_ROWS * SRC_ROWS * 128
                             + DST_ROWS * HIDDEN_DIM * 128)
    transc = num_steps * (4 * DST_ROWS * HIDDEN_DIM + 2 * DST_ROWS)
    bytes_accessed = (idx_packed.size * 4 + w_slab.size * 4
                      + num_steps * DST_ROWS * OUT_LANES * 4)

    out = pl.pallas_call(
        _gte_kernel,
        out_shape=jax.ShapeDtypeStruct((num_steps * DST_ROWS, OUT_LANES),
                                       jnp.float32),
        grid=(num_steps,),
        in_specs=[pl.BlockSpec((IDX_ROWS, 1), lambda s: (s, 0)),
                  pl.BlockSpec((W_ROWS, OUT_LANES), lambda s: (0, 0))],
        out_specs=pl.BlockSpec((DST_ROWS, OUT_LANES), lambda s: (s, 0)),
        compiler_params=pltpu.CompilerParams(
            dimension_semantics=("parallel",)),
        cost_estimate=pl.CostEstimate(flops=flops, transcendentals=transc,
                                      bytes_accessed=bytes_accessed),
    )(idx_packed, w_slab)

    h_ln = out[:, 0:HIDDEN_DIM].reshape(num_graphs, N_DST, HIDDEN_DIM)
    c_ln = out[:, HIDDEN_DIM:2 * HIDDEN_DIM].reshape(num_graphs, N_DST, HIDDEN_DIM)
    logits = out[:, 2 * HIDDEN_DIM:2 * HIDDEN_DIM + N_CLASSES].reshape(
        num_graphs, N_DST, N_CLASSES)
    return logits, h_ln, c_ln


# ----------------------------------------------------------------------------
# Parameters (PyTorch-style shapes & init) and one-time fused-slab prep.
# ----------------------------------------------------------------------------
def init_params(key):
    ks = jax.random.split(key, 6)

    def linear_init(k, fan_in, fan_out):
        kw, kb = jax.random.split(k)
        bound = 1.0 / float(fan_in) ** 0.5
        w = jax.random.uniform(kw, (fan_out, fan_in), jnp.float32, -bound, bound)
        b = jax.random.uniform(kb, (fan_out,), jnp.float32, -bound, bound)
        return w, b

    p = {}
    p['emb'] = jax.random.normal(ks[0], (VOCAB_SIZE, HIDDEN_DIM), jnp.float32)
    p['w_ih'], p['b_ih'] = linear_init(ks[1], HIDDEN_DIM, HIDDEN_DIM)
    p['w_fh'], p['b_fh'] = linear_init(ks[2], HIDDEN_DIM, HIDDEN_DIM)
    p['w_uh'], p['b_uh'] = linear_init(ks[3], HIDDEN_DIM, HIDDEN_DIM)
    p['w_oh'], p['b_oh'] = linear_init(ks[4], HIDDEN_DIM, HIDDEN_DIM)
    p['ln_g'] = jnp.ones((HIDDEN_DIM,), jnp.float32)
    p['ln_b'] = jnp.zeros((HIDDEN_DIM,), jnp.float32)
    p['w_fc'], p['b_fc'] = linear_init(ks[5], HIDDEN_DIM, N_CLASSES)
    return p


def prepare_fused_params(p):
    """One-time fold/transposition of ALL weights into a single [W_ROWS,128]
    lane-dense slab (kept OUT of the per-call path)."""
    w_gates = jnp.concatenate(
        [p['w_ih'].T, p['w_oh'].T, p['w_uh'].T, p['w_fh'].T], axis=1)  # [D, 4D]
    emb_pad = jnp.pad(p['emb'],
                      ((0, VOCAB_PAD - VOCAB_SIZE), (0, 0)))           # [Vp, D]
    ew = jnp.dot(emb_pad, w_gates, precision=lax.Precision.HIGHEST)    # [Vp, 4D]
    b_gates = jnp.concatenate(
        [p['b_ih'], p['b_oh'], p['b_uh'], p['b_fh']])[None, :]         # [1, 128]
    w_fc_pad = jnp.pad(p['w_fc'].T,
                       ((0, 0), (0, OUT_LANES - N_CLASSES)))           # [D, 128]

    def row(v):
        return jnp.pad(v[None, :].astype(jnp.float32),
                       ((0, 0), (0, OUT_LANES - v.shape[0])))

    slab = jnp.concatenate([
        ew,                                                    # rows 0:64
        w_fc_pad,                                              # rows 64:96
        b_gates,                                               # row 96
        row(p['ln_g']),                                        # row 97
        row(p['ln_b']),                                        # row 98
        row(p['b_fc']),                                        # row 99
        jnp.zeros((W_ROWS - (ROW_BFC + 1), OUT_LANES), jnp.float32),
    ], axis=0)
    return slab


# ----------------------------------------------------------------------------
# Example batch: each graph is a single DGL block modeled as a dense
# fixed-in-degree gather; last in-edge per dst node is the self-loop edge.
# ----------------------------------------------------------------------------
def build_batch_inputs(key, num_graphs):
    assert num_graphs % BLOCKS_PER_STEP == 0
    k_tok, k_edge = jax.random.split(key)
    token_ids = jax.random.randint(k_tok, (num_graphs, N_SRC), 0, VOCAB_SIZE,
                                   dtype=jnp.int32)
    edges = jax.random.randint(k_edge, (num_graphs, N_DST, IN_DEGREE), 0, N_SRC,
                               dtype=jnp.int32)
    num_steps = num_graphs // BLOCKS_PER_STEP
    # int slab per step: [tok(g,s) at row g*32+s] ++ [edge(g,b,k) at row
    # 256 + k*128 + g*16 + b]  (graph-local src indices; self-loop dropped).
    tok_part = token_ids.reshape(num_steps, BLOCKS_PER_STEP * N_SRC)
    edg = edges[:, :, :N_CHILD].reshape(num_steps, BLOCKS_PER_STEP, N_DST, N_CHILD)
    edg_part = jnp.transpose(edg, (0, 3, 1, 2)).reshape(num_steps,
                                                        N_CHILD * DST_ROWS)
    idx_packed = jnp.concatenate([tok_part, edg_part], axis=1).reshape(
        num_steps * IDX_ROWS, 1).astype(jnp.int32)
    return token_ids, edges, idx_packed


# ----------------------------------------------------------------------------
# Pure-JAX per-graph reference (mirrors the PyTorch math, full f-gate path).
# ----------------------------------------------------------------------------
def reference_forward(token_ids, edges, p):
    HI = lax.Precision.HIGHEST
    feat_src = p['emb'][token_ids]                                     # [N_SRC, D]
    node_feat = jnp.concatenate([feat_src, jnp.zeros_like(feat_src)], axis=1)
    h_c = node_feat[edges]                                             # [B, L, 2D]
    h_c = jnp.transpose(h_c, (1, 0, 2))[:-1]                           # drop self-loop
    child_h = h_c[:, :, :HIDDEN_DIM]
    child_c = h_c[:, :, HIDDEN_DIM:]
    child_h_sum = jnp.sum(child_h, axis=0)

    lin = lambda x, w, b: jnp.dot(x, w.T, precision=HI) + b
    i = jax.nn.sigmoid(lin(child_h_sum, p['w_ih'], p['b_ih']))
    o = jax.nn.sigmoid(lin(child_h_sum, p['w_oh'], p['b_oh']))
    u = jnp.tanh(lin(child_h_sum, p['w_uh'], p['b_uh']))
    f = jax.nn.sigmoid(jnp.einsum('lbd,ed->lbe', child_h, p['w_fh'],
                                  precision=HI) + p['b_fh'])
    c = i * u + jnp.sum(f * child_c, axis=0)
    h = o * jnp.tanh(c)

    def ln(x):
        mu = jnp.mean(x, -1, keepdims=True)
        var = jnp.mean((x - mu) ** 2, -1, keepdims=True)
        return (x - mu) / jnp.sqrt(var + LN_EPS) * p['ln_g'] + p['ln_b']

    h_ln, c_ln = ln(h), ln(c)
    logits = jnp.dot(h_ln, p['w_fc'].T, precision=HI) + p['b_fc']
    return logits, h_ln, c_ln


if __name__ == "__main__":
    key = jax.random.PRNGKey(0)
    k_params, k_data = jax.random.split(key)
    params = init_params(k_params)
    w_slab = prepare_fused_params(params)

    num_graphs = 2 * BLOCKS_PER_STEP          # 16 graphs -> grid = (2,)
    token_ids, edges, idx_packed = build_batch_inputs(k_data, num_graphs)

    fwd = jax.jit(gte_forward_pallas)
    logits, h_ln, c_ln = fwd(idx_packed, w_slab)
    jax.block_until_ready(logits)

    ref_logits, ref_h, ref_c = jax.vmap(reference_forward, in_axes=(0, 0, None))(
        token_ids, edges, params)

    assert logits.shape == (num_graphs, N_DST, N_CLASSES)
    # Tolerance covers MXU f32 pass-decomposition differences between the
    # in-kernel dots / prefolded EW and the HIGHEST-precision XLA reference.
    assert jnp.allclose(h_ln, ref_h, atol=2e-2, rtol=2e-2), "h_out mismatch"
    assert jnp.allclose(c_ln, ref_c, atol=2e-2, rtol=2e-2), "c_out mismatch"
    assert jnp.allclose(logits, ref_logits, atol=2e-2, rtol=2e-2), "logits mismatch"
    print("KERNEL_OK")
</pallas_src>

<mosaic_0001>
module attributes {stable_mosaic.version = 11 : i64} {
  func.func @_gte_kernel(%arg0: i32, %arg1: memref<640x1xi32, #tpu.memory_space<vmem>>, %arg2: memref<104x128xf32, #tpu.memory_space<vmem>>, %arg3: memref<128x128xf32, #tpu.memory_space<vmem>>) attributes {dimension_semantics = [#tpu.dimension_semantics<parallel>], iteration_bounds = array<i64: 2>, scalar_prefetch = 0 : i64, scratch_operands = 0 : i64, tpu.core_type = #tpu.core_type<tc>, window_params = [{transform_indices = @transform_0, window_bounds = array<i64: 640, 1>}, {pipeline_mode = #tpu.pipeline_mode<synchronous>, transform_indices = @transform_1, window_bounds = array<i64: 104, 128>}, {transform_indices = @transform_2, window_bounds = array<i64: 128, 128>}]} {
    %c0 = arith.constant 0 : index
    %c0_0 = arith.constant 0 : index
    %0 = vector.load %arg2[%c0, %c0_0] : memref<104x128xf32, #tpu.memory_space<vmem>>, vector<64x128xf32>
    %c64 = arith.constant 64 : index
    %c0_1 = arith.constant 0 : index
    %1 = vector.load %arg2[%c64, %c0_1] : memref<104x128xf32, #tpu.memory_space<vmem>>, vector<32x128xf32>
    %c96 = arith.constant 96 : index
    %c0_2 = arith.constant 0 : index
    %2 = vector.load %arg2[%c96, %c0_2] : memref<104x128xf32, #tpu.memory_space<vmem>>, vector<8x128xf32>
    %3 = vector.extract_strided_slice %2 {offsets = [0, 0], sizes = [1, 128], strides = [1, 1]} : vector<8x128xf32> to vector<1x128xf32>
    %4 = vector.extract_strided_slice %2 {offsets = [1, 0], sizes = [1, 32], strides = [1, 1]} : vector<8x128xf32> to vector<1x32xf32>
    %5 = vector.extract_strided_slice %2 {offsets = [2, 0], sizes = [1, 32], strides = [1, 1]} : vector<8x128xf32> to vector<1x32xf32>
    %6 = vector.extract_strided_slice %2 {offsets = [3, 0], sizes = [1, 8], strides = [1, 1]} : vector<8x128xf32> to vector<1x8xf32>
    %c0_3 = arith.constant 0 : index
    %c0_4 = arith.constant 0 : index
    %7 = vector.load %arg1[%c0_3, %c0_4] : memref<640x1xi32, #tpu.memory_space<vmem>>, vector<256x1xi32>
    %8 = tpu.iota {dimensions = array<i32: 1>} : vector<256x64xi32>
    %9 = vector.broadcast %7 : vector<256x1xi32> to vector<256x64xi32>
    %10 = arith.cmpi eq, %8, %9 : vector<256x64xi32>
    %11 = arith.extui %10 : vector<256x64xi1> to vector<256x64xi32>
    %12 = arith.sitofp %11 : vector<256x64xi32> to vector<256x64xf32>
    %cst = arith.constant dense<0.000000e+00> : vector<256x128xf32>
    %13 = tpu.matmul %12, %0, %cst {dimension_numbers = #tpu.dot_dimension_numbers<[1], [0], [0], [1], [0, 0, 1, 1], [], []>} : vector<256x64xf32>, vector<64x128xf32>, vector<256x128xf32> -> vector<256x128xf32>
    %14 = tpu.iota {dimensions = array<i32: 0>} : vector<128x1xi32>
    %c4_i32 = arith.constant 4 : i32
    %15 = vector.broadcast %c4_i32 : i32 to vector<128x1xi32>
    %16 = arith.shrsi %14, %15 : vector<128x1xi32>
    %c32_i32 = arith.constant 32 : i32
    %17 = vector.broadcast %c32_i32 : i32 to vector<128x1xi32>
    %18 = arith.muli %16, %17 : vector<128x1xi32>
    %19 = tpu.iota {dimensions = array<i32: 1>} : vector<128x256xi32>
    %cst_5 = arith.constant 0.000000e+00 : f32
    %20 = vector.broadcast %cst_5 : f32 to vector<128x256xf32>
    %c256 = arith.constant 256 : index
    %c0_6 = arith.constant 0 : index
    %21 = vector.load %arg1[%c256, %c0_6] : memref<640x1xi32, #tpu.memory_space<vmem>>, vector<128x1xi32>
    %22 = arith.addi %21, %18 : vector<128x1xi32>
    %23 = vector.broadcast %22 : vector<128x1xi32> to vector<128x256xi32>
    %24 = arith.cmpi eq, %19, %23 : vector<128x256xi32>
    %25 = arith.extui %24 : vector<128x256xi1> to vector<128x256xi32>
    %26 = arith.sitofp %25 : vector<128x256xi32> to vector<128x256xf32>
    %27 = arith.addf %20, %26 : vector<128x256xf32>
    %c384 = arith.constant 384 : index
    %c0_7 = arith.constant 0 : index
    %28 = vector.load %arg1[%c384, %c0_7] : memref<640x1xi32, #tpu.memory_space<vmem>>, vector<128x1xi32>
    %29 = arith.addi %28, %18 : vector<128x1xi32>
    %30 = vector.broadcast %29 : vector<128x1xi32> to vector<128x256xi32>
    %31 = arith.cmpi eq, %19, %30 : vector<128x256xi32>
    %32 = arith.extui %31 : vector<128x256xi1> to vector<128x256xi32>
    %33 = arith.sitofp %32 : vector<128x256xi32> to vector<128x256xf32>
    %34 = arith.addf %27, %33 : vector<128x256xf32>
    %c512 = arith.constant 512 : index
    %c0_8 = arith.constant 0 : index
    %35 = vector.load %arg1[%c512, %c0_8] : memref<640x1xi32, #tpu.memory_space<vmem>>, vector<128x1xi32>
    %36 = arith.addi %35, %18 : vector<128x1xi32>
    %37 = vector.broadcast %36 : vector<128x1xi32> to vector<128x256xi32>
    %38 = arith.cmpi eq, %19, %37 : vector<128x256xi32>
    %39 = arith.extui %38 : vector<128x256xi1> to vector<128x256xi32>
    %40 = arith.sitofp %39 : vector<128x256xi32> to vector<128x256xf32>
    %41 = arith.addf %34, %40 : vector<128x256xf32>
    %cst_9 = arith.constant dense<0.000000e+00> : vector<128x128xf32>
    %42 = tpu.matmul %41, %13, %cst_9 {dimension_numbers = #tpu.dot_dimension_numbers<[1], [0], [0], [1], [0, 0, 1, 1], [], []>} : vector<128x256xf32>, vector<256x128xf32>, vector<128x128xf32> -> vector<128x128xf32>
    %43 = vector.broadcast %3 : vector<1x128xf32> to vector<128x128xf32>
    %44 = arith.addf %42, %43 : vector<128x128xf32>
    %45 = vector.extract_strided_slice %44 {offsets = [0, 0], sizes = [128, 32], strides = [1, 1]} : vector<128x128xf32> to vector<128x32xf32>
    %46 = arith.negf %45 : vector<128x32xf32>
    %47 = math.exp %46 : vector<128x32xf32>
    %cst_10 = arith.constant 1.000000e+00 : f32
    %48 = vector.broadcast %cst_10 : f32 to vector<128x32xf32>
    %49 = arith.addf %48, %47 : vector<128x32xf32>
    %50 = arith.divf %48, %49 : vector<128x32xf32>
    %51 = vector.extract_strided_slice %44 {offsets = [0, 32], sizes = [128, 32], strides = [1, 1]} : vector<128x128xf32> to vector<128x32xf32>
    %52 = arith.negf %51 : vector<128x32xf32>
    %53 = math.exp %52 : vector<128x32xf32>
    %cst_11 = arith.constant 1.000000e+00 : f32
    %54 = vector.broadcast %cst_11 : f32 to vector<128x32xf32>
    %55 = arith.addf %54, %53 : vector<128x32xf32>
    %56 = arith.divf %54, %55 : vector<128x32xf32>
    %57 = vector.extract_strided_slice %44 {offsets = [0, 64], sizes = [128, 32], strides = [1, 1]} : vector<128x128xf32> to vector<128x32xf32>
    %58 = math.tanh %57 : vector<128x32xf32>
    %59 = arith.mulf %50, %58 : vector<128x32xf32>
    %60 = math.tanh %59 : vector<128x32xf32>
    %61 = arith.mulf %56, %60 : vector<128x32xf32>
    %62 = tpu.concatenate %61, %59 in 0 : vector<128x32xf32>, vector<128x32xf32> -> vector<256x32xf32>
    %cst_12 = arith.constant dense<0.000000e+00> : vector<256xf32>
    %63 = vector.multi_reduction <add>, %62, %cst_12 [1] : vector<256x32xf32> to vector<256xf32>
    %64 = vector.shape_cast %63 : vector<256xf32> to vector<256x1xf32>
    %cst_13 = arith.constant 3.200000e+01 : f32
    %65 = vector.broadcast %cst_13 : f32 to vector<256x1xf32>
    %66 = arith.divf %64, %65 : vector<256x1xf32>
    %67 = vector.broadcast %66 : vector<256x1xf32> to vector<256x32xf32>
    %68 = arith.subf %62, %67 : vector<256x32xf32>
    %69 = arith.mulf %68, %68 : vector<256x32xf32>
    %cst_14 = arith.constant dense<0.000000e+00> : vector<256xf32>
    %70 = vector.multi_reduction <add>, %69, %cst_14 [1] : vector<256x32xf32> to vector<256xf32>
    %71 = vector.shape_cast %70 : vector<256xf32> to vector<256x1xf32>
    %cst_15 = arith.constant 3.200000e+01 : f32
    %72 = vector.broadcast %cst_15 : f32 to vector<256x1xf32>
    %73 = arith.divf %71, %72 : vector<256x1xf32>
    %74 = vector.broadcast %66 : vector<256x1xf32> to vector<256x32xf32>
    %75 = arith.subf %62, %74 : vector<256x32xf32>
    %cst_16 = arith.constant 9.99999974E-6 : f32
    %76 = vector.broadcast %cst_16 : f32 to vector<256x1xf32>
    %77 = arith.addf %73, %76 : vector<256x1xf32>
    %78 = math.rsqrt %77 : vector<256x1xf32>
    %79 = vector.broadcast %78 : vector<256x1xf32> to vector<256x32xf32>
    %80 = arith.mulf %75, %79 : vector<256x32xf32>
    %81 = vector.broadcast %4 : vector<1x32xf32> to vector<256x32xf32>
    %82 = arith.mulf %80, %81 : vector<256x32xf32>
    %83 = vector.broadcast %5 : vector<1x32xf32> to vector<256x32xf32>
    %84 = arith.addf %82, %83 : vector<256x32xf32>
    %85 = vector.extract_strided_slice %84 {offsets = [0, 0], sizes = [128, 32], strides = [1, 1]} : vector<256x32xf32> to vector<128x32xf32>
    %86 = vector.extract_strided_slice %84 {offsets = [128, 0], sizes = [128, 32], strides = [1, 1]} : vector<256x32xf32> to vector<128x32xf32>
    %cst_17 = arith.constant dense<0.000000e+00> : vector<128x128xf32>
    %87 = tpu.matmul %85, %1, %cst_17 {dimension_numbers = #tpu.dot_dimension_numbers<[1], [0], [0], [1], [0, 0, 1, 1], [], []>} : vector<128x32xf32>, vector<32x128xf32>, vector<128x128xf32> -> vector<128x128xf32>
    %88 = vector.extract_strided_slice %87 {offsets = [0, 0], sizes = [128, 8], strides = [1, 1]} : vector<128x128xf32> to vector<128x8xf32>
    %89 = vector.broadcast %6 : vector<1x8xf32> to vector<128x8xf32>
    %90 = arith.addf %88, %89 : vector<128x8xf32>
    %cst_18 = arith.constant 0.000000e+00 : f32
    %91 = vector.broadcast %cst_18 : f32 to vector<128x56xf32>
    %92 = tpu.concatenate %85, %86, %90, %91 in 1 : vector<128x32xf32>, vector<128x32xf32>, vector<128x8xf32>, vector<128x56xf32> -> vector<128x128xf32>
    %c0_19 = arith.constant 0 : index
    %c0_20 = arith.constant 0 : index
    %93 = vector.load %arg3[%c0_19, %c0_20] : memref<128x128xf32, #tpu.memory_space<vmem>>, vector<128x128xf32>
    tpu.vector_store %arg3[%c0_19, %c0_20], %92 {strides = array<i32>} : memref<128x128xf32, #tpu.memory_space<vmem>>, vector<128x128xf32>,
    return
  }
  func.func @transform_0(%arg0: i32) -> (i32, i32) {
    %c0_i32 = arith.constant 0 : i32
    %c0_i32_0 = arith.constant 0 : i32
    return %arg0, %c0_i32 : i32, i32
  }
  func.func @transform_1(%arg0: i32) -> (i32, i32) {
    %c0_i32 = arith.constant 0 : i32
    %c0_i32_0 = arith.constant 0 : i32
    %c0_i32_1 = arith.constant 0 : i32
    return %c0_i32, %c0_i32_0 : i32, i32
  }
  func.func @transform_2(%arg0: i32) -> (i32, i32) {
    %c0_i32 = arith.constant 0 : i32
    %c0_i32_0 = arith.constant 0 : i32
    return %arg0, %c0_i32 : i32, i32
  }
}

</mosaic_0001>

<bundles_post_ra>
// kernel: gte_forward_pallas.1
= control target key start
LH: loop header
LB: loop body
LE: loop exit
PB: predicated region body
PF: predicated region fallthrough
CT: control target
= control target key end

     0   :  { %s3801_s9 = smov 0   ;;  %s5461_s0 = inlined_call_operand.vmem [shape: s32[1280,1], index: 0, kind: input, shape index: {}]   ;;  %s5462_s1 = inlined_call_operand.vmem [shape: f32[104,128], index: 1, kind: input, shape index: {}]   ;;  %s5463_s2 = inlined_call_operand.vmem [shape: f32[256,128], index: 2, kind: output, shape index: {}]  }
   0x1 LB: > { %s3067_s10 = sadd.s32 4294967295, %s3779_s9   ;;  %p3071_p0 = scmp.ge.s32.totalorder %s3779_s9, 1  ;;  %s3779_s9 = sphi %s3801_s9, %s12_s9  }
   0x2   : > { %p113_p1 = scmp.lt.s32.totalorder %s3779_s9, 3 }
   0x4   : > { %p114_p2 = pnand %p3071_p0, %p113_p1 }
   0x5   : > { %s135_s11 = smul.u32 (!%p114_p2), 80, %s3067_s10  ;;  %v147_v0 = vld [vmem:[%s5462_s1] sm:$0xff] (!%p114_p2)  ;;  %v148_v1 = vld [vmem:[%s5462_s1 + $0x8] sm:$0xff] (!%p114_p2)  ;;  %v149_v2 = vld [vmem:[%s5462_s1 + $0x10] sm:$0xff] (!%p114_p2)  ;;  %v3781_v3 = vmov (!%p114_p2), 0   ;;  %v192_v37 = vlaneseq (!%p114_p2)  ;;  %vm386_vm0 = vcmask (!%p114_p2), 523264  }
   0x6   : > { %117 = sbr.rel (%p114_p2) target bundleno = 2112 (0x840), region = 28  ;;  %3579 = vset.pattern.permute.xlu1 (!%p114_p2), %v3781_v3  ;;  %3578 = vset.pattern.permute.xlu0 (!%p114_p2), %v3781_v3  ;;  %v3505_v4 = vpack.c.bf16 (!%p114_p2), %v148_v1, %v147_v0  ;;  %v150_v5 = vld [vmem:[%s5462_s1 + $0x18] sm:$0xff] (!%p114_p2)  ;;  %v151_v7 = vld [vmem:[%s5462_s1 + $0x20] sm:$0xff] (!%p114_p2)  ;;  %v152_v8 = vld [vmem:[%s5462_s1 + $0x28] sm:$0xff] (!%p114_p2)  ;;  %s3783_s6 = smov (!%p114_p2), 64  }
   0x7   : > { %p136_p3 = scmp.lt.s32.totalorder (!%p114_p2), %s135_s11, 159  ;;  %v3509_v6 = vpack.c.bf16 (!%p114_p2), %v150_v5, %v149_v2  ;;  %v3513_v11 = vpack.c.bf16 (!%p114_p2), %v152_v8, %v151_v7  ;;  %v153_v24 = vld [vmem:[%s5462_s1 + $0x30] sm:$0xff] (!%p114_p2)  ;;  %v154_v25 = vld [vmem:[%s5462_s1 + $0x38] sm:$0xff] (!%p114_p2)  ;;  %v3867_v40 = vshrl.u32 (!%p114_p2), %v192_v37, 7  ;;  %s3784_s7 = smov (!%p114_p2), 32  }
   0x8   : > { %3506 = vmatprep.subr.bf16.mxu0 (!%p114_p2), %v3505_v4  ;;  %v3517_v26 = vpack.c.bf16 (!%p114_p2), %v154_v25, %v153_v24  ;;  %s3785_s8 = smov (!%p114_p2), 96   ;;  %s3073_s21 = sshll.u32 (!%p114_p2), %s3067_s10, 4 }
   0x9   : > { %3508 = vmatpush3.bf16.msra.mxu0 (!%p114_p2), %v3505_v4  ;;  %v725_v43 = vshra.s32 (!%p114_p2), %v3867_v40, 4  ;;  %v710_v44 = vadd.s32 (!%p114_p2), 8, %v3867_v40  ;;  %v711_v56 = vadd.s32 (!%p114_p2), 16, %v3867_v40  ;;  %v712_v62 = vadd.s32 (!%p114_p2), 24, %v3867_v40  ;;  %p142_p4 = scmp.lt.s32.totalorder (!%p114_p2), %s3073_s21, 31 }
   0xa   : > { %3510 = vmatprep.subr.bf16.mxu0 (!%p114_p2), %v3509_v6 }
   0xb   : > { %v741_v48 = vmul.u32 (!%p114_p2), 32, %v725_v43  ;;  %v726_v49 = vshra.s32 (!%p114_p2), %v710_v44, 4  ;;  %v727_v61 = vshra.s32 (!%p114_p2), %v711_v56, 4  ;;  %v728_v4 = vshra.s32 (!%p114_p2), %v712_v62, 4 }
   0xd   : > { %s5465_s11 = smov (!%p136_p3, %s135_s11), 159  ;;  %3512 = vmatpush3.bf16.msra.mxu0 %v3509_v6  ;;  %v742_v55 = vmul.u32 32, %v726_v49  ;;  %v743_v3 = vmul.u32 32, %v727_v61  ;;  %s5467_s21 = smov (!%p142_p4, %s3073_s21), 31 }
   0xe   : > { %s3072_s24 = sshll.u32 %s5465_s11, 3  ;;  %3514 = vmatprep.subr.bf16.mxu0 %v3513_v11  ;;  %s3074_s10 = sshll.u32 %s5467_s21, 3 }
   0xf   : > { %s3832_s27 = scalar_lea.vmem %s5461_s0, %s3072_s24  ;;  %s5340_s24 = scalar_lea.vmem %s5463_s2, %s3074_s10 }
  0x10   : > { %v162_v9 = vld [vmem:[%s3832_s27 + $0x10] sm:$0xff]  ;;  %v160_v10 = vld [vmem:[%s3832_s27] sm:$0xff]  ;;  %v163_v12 = vld [vmem:[%s3832_s27 + $0x18] sm:$0xff] }
  0x11   : > { %201 = vperm.xlu1 %3579, %v162_v9   ;;  %195 = vperm.xlu0 %3578, %v160_v10   ;;  %v161_v13 = vld [vmem:[%s3832_s27 + $0x8] sm:$0xff]  ;;  %v164_v15 = vld [vmem:[%s3832_s27 + $0x20] sm:$0xff]  ;;  %v167_v16 = vld [vmem:[%s3832_s27 + $0x38] sm:$0xff]  ;;  %v744_v9 = vmul.u32 32, %v728_v4  ;;  %v713_v10 = vadd.s32 32, %v3867_v40 }
  0x12   : > { %3516 = vmatpush3.bf16.msra.mxu0 %v3513_v11  ;;  %v165_v14 = vld [vmem:[%s3832_s27 + $0x28] sm:$0xff]  ;;  %v166_v17 = vld [vmem:[%s3832_s27 + $0x30] sm:$0xff]  ;;  %v168_v19 = vld [vmem:[%s3832_s27 + $0x40] sm:$0xff] }
  0x13   : > { %v169_v18 = vld [vmem:[%s3832_s27 + $0x48] sm:$0xff]  ;;  %v171_v20 = vld [vmem:[%s3832_s27 + $0x58] sm:$0xff]  ;;  %v170_v21 = vld [vmem:[%s3832_s27 + $0x50] sm:$0xff]  ;;  %3518 = vmatprep.subr.bf16.mxu0 %v3517_v26 }
  0x14   : > { %v173_v22 = vld [vmem:[%s3832_s27 + $0x68] sm:$0xff]  ;;  %v172_v23 = vld [vmem:[%s3832_s27 + $0x60] sm:$0xff]  ;;  %v175_v27 = vld [vmem:[%s3832_s27 + $0x78] sm:$0xff] }
  0x15   : > { %204 = vperm.xlu1 %3579, %v163_v12   ;;  %198 = vperm.xlu0 %3578, %v161_v13   ;;  %v174_v28 = vld [vmem:[%s3832_s27 + $0x70] sm:$0xff]  ;;  %v177_v29 = vld [vmem:[%s3832_s27 + $0x88] sm:$0xff]  ;;  %v176_v30 = vld [vmem:[%s3832_s27 + $0x80] sm:$0xff] }
  0x16   : > { %3520 = vmatpush3.bf16.msra.mxu0 %v3517_v26  ;;  %v179_v31 = vld [vmem:[%s3832_s27 + $0x98] sm:$0xff]  ;;  %v178_v32 = vld [vmem:[%s3832_s27 + $0x90] sm:$0xff]  ;;  %v181_v33 = vld [vmem:[%s3832_s27 + $0xa8] sm:$0xff] }
  0x17   : > { %v180_v34 = vld [vmem:[%s3832_s27 + $0xa0] sm:$0xff]  ;;  %v183_v35 = vld [vmem:[%s3832_s27 + $0xb8] sm:$0xff]  ;;  %v182_v36 = vld [vmem:[%s3832_s27 + $0xb0] sm:$0xff] }
  0x18   : > { %v185_v38 = vld [vmem:[%s3832_s27 + $0xc8] sm:$0xff]  ;;  %v184_v39 = vld [vmem:[%s3832_s27 + $0xc0] sm:$0xff]  ;;  %v187_v41 = vld [vmem:[%s3832_s27 + $0xd8] sm:$0xff] }
  0x19   : > { %210 = vperm.xlu1 %3579, %v165_v14   ;;  %207 = vperm.xlu0 %3578, %v164_v15   ;;  %v186_v42 = vld [vmem:[%s3832_s27 + $0xd0] sm:$0xff]  ;;  %v189_v45 = vld [vmem:[%s3832_s27 + $0xe8] sm:$0xff]  ;;  %v188_v46 = vld [vmem:[%s3832_s27 + $0xe0] sm:$0xff]  ;;  %v729_v15 = vshra.s32 %v713_v10, 4 }
  0x1a   : > { %v191_v47 = vld [vmem:[%s3832_s27 + $0xf8] sm:$0xff]  ;;  %v190_v50 = vld [vmem:[%s3832_s27 + $0xf0] sm:$0xff]  ;;  %v966_v51 = vld [vmem:[%s3832_s27 + $0x180] sm:$0xff] }
  0x1b   : > { %v758_v52 = vld [vmem:[%s3832_s27 + $0x100] sm:$0xff]  ;;  %v982_v53 = vadd.s32 %v966_v51, %v741_v48  ;;  %v759_v57 = vld [vmem:[%s3832_s27 + $0x108] sm:$0xff]  ;;  %v968_v5 = vld [vmem:[%s3832_s27 + $0x190] sm:$0xff] }
  0x1c   : > { %v774_v54 = vadd.s32 %v758_v52, %v741_v48  ;;  %v1174_v58 = vld [vmem:[%s3832_s27 + $0x200] sm:$0xff]  ;;  %v775_v59 = vadd.s32 %v759_v57, %v742_v55  ;;  %v1175_v63 = vld [vmem:[%s3832_s27 + $0x208] sm:$0xff]  ;;  %v760_v6 = vld [vmem:[%s3832_s27 + $0x110] sm:$0xff]  ;;  %v984_v7 = vadd.s32 %v968_v5, %v743_v3 }
  0x1d   : > { %216 = vperm.xlu1 %3579, %v167_v16   ;;  %213 = vperm.xlu0 %3578, %v166_v17   ;;  %v1190_v60 = vadd.s32 %v1174_v58, %v741_v48  ;;  %v967_v0 = vld [vmem:[%s3832_s27 + $0x188] sm:$0xff]  ;;  %v1191_v1 = vadd.s32 %v1175_v63, %v742_v55  ;;  %v776_v8 = vadd.s32 %v760_v6, %v743_v3  ;;  %v761_v11 = vld [vmem:[%s3832_s27 + $0x118] sm:$0xff]  ;;  %v1176_v12 = vld [vmem:[%s3832_s27 + $0x210] sm:$0xff]  ;;  %v714_v16 = vadd.s32 40, %v3867_v40 }
  0x1e   : > { %v983_v2 = vadd.s32 %v967_v0, %v742_v55  ;;  %v777_v13 = vadd.s32 %v761_v11, %v744_v9  ;;  %v1192_v14 = vadd.s32 %v1176_v12, %v743_v3  ;;  %v1177_v17 = vld [vmem:[%s3832_s27 + $0x218] sm:$0xff]  ;;  %v762_v24 = vld [vmem:[%s3832_s27 + $0x120] sm:$0xff]  ;;  %v972_v43 = vld [vmem:[%s3832_s27 + $0x1b0] sm:$0xff]  ;;  %v717_v48 = vadd.s32 64, %v3867_v40 }
  0x1f   : > { %v764_v44 = vld [vmem:[%s3832_s27 + $0x130] sm:$0xff]  ;;  %v765_v49 = vld [vmem:[%s3832_s27 + $0x138] sm:$0xff]  ;;  %v974_v61 = vld [vmem:[%s3832_s27 + $0x1c0] sm:$0xff] }
  0x20   : > { %v1181_v55 = vld [vmem:[%s3832_s27 + $0x238] sm:$0xff]  ;;  %v766_v62 = vld [vmem:[%s3832_s27 + $0x140] sm:$0xff]  ;;  %v767_v3 = vld [vmem:[%s3832_s27 + $0x148] sm:$0xff] }
  0x21   : > { %222 = vperm.xlu1 %3579, %v169_v18   ;;  %219 = vperm.xlu0 %3578, %v168_v19   ;;  %v969_v18 = vld [vmem:[%s3832_s27 + $0x198] sm:$0xff]  ;;  %v1193_v19 = vadd.s32 %v1177_v17, %v744_v9  ;;  %v1182_v4 = vld [vmem:[%s3832_s27 + $0x240] sm:$0xff]  ;;  %v975_v10 = vld [vmem:[%s3832_s27 + $0x1c8] sm:$0xff] }
  0x22   : > { %v973_v56 = vld [vmem:[%s3832_s27 + $0x1b8] sm:$0xff] }
  0x25   : > { %228 = vperm.xlu1 %3579, %v171_v20   ;;  %225 = vperm.xlu0 %3578, %v170_v21   ;;  %v985_v20 = vadd.s32 %v969_v18, %v744_v9  ;;  %v745_v21 = vmul.u32 32, %v729_v15  ;;  %v1183_v9 = vld [vmem:[%s3832_s27 + $0x248] sm:$0xff]  ;;  %v976_v15 = vld [vmem:[%s3832_s27 + $0x1d0] sm:$0xff] }
  0x27   : > { %v778_v26 = vadd.s32 %v762_v24, %v745_v21  ;;  %v3924_v24 = vand.u32 127, %v192_v37 }
  0x29   : > { %234 = vperm.xlu1 %3579, %v173_v22   ;;  %231 = vperm.xlu0 %3578, %v172_v23   ;;  %v730_v22 = vshra.s32 %v714_v16, 4  ;;  %v970_v23 = vld [vmem:[%s3832_s27 + $0x1a0] sm:$0xff]  ;;  %v768_v16 = vld [vmem:[%s3832_s27 + $0x150] sm:$0xff] }
  0x2a   : > { %v986_v25 = vadd.s32 %v970_v23, %v745_v21  ;;  %v722_v23 = vadd.s32 104, %v3867_v40 }
  0x2d   : > { %240 = vperm.xlu1 %3579, %v175_v27   ;;  %237 = vperm.xlu0 %3578, %v174_v28   ;;  %v746_v27 = vmul.u32 32, %v730_v22  ;;  %v715_v28 = vadd.s32 48, %v3867_v40  ;;  %v1184_v22 = vld [vmem:[%s3832_s27 + $0x250] sm:$0xff] }
  0x31   : > { %246 = vperm.xlu1 %3579, %v177_v29   ;;  %243 = vperm.xlu0 %3578, %v176_v30   ;;  %v763_v29 = vld [vmem:[%s3832_s27 + $0x128] sm:$0xff]  ;;  %v1178_v30 = vld [vmem:[%s3832_s27 + $0x220] sm:$0xff] }
  0x35   : > { %252 = vperm.xlu1 %3579, %v179_v31   ;;  %249 = vperm.xlu0 %3578, %v178_v32   ;;  %v779_v31 = vadd.s32 %v763_v29, %v746_v27  ;;  %v1194_v32 = vadd.s32 %v1178_v30, %v745_v21  ;;  %v769_v21 = vld [vmem:[%s3832_s27 + $0x158] sm:$0xff] }
  0x36   : > { %v977_v29 = vld [vmem:[%s3832_s27 + $0x1d8] sm:$0xff] }
  0x39   : > { %258 = vperm.xlu1 %3579, %v181_v33   ;;  %255 = vperm.xlu0 %3578, %v180_v34   ;;  %v731_v33 = vshra.s32 %v715_v28, 4  ;;  %v716_v34 = vadd.s32 56, %v3867_v40  ;;  %v1185_v28 = vld [vmem:[%s3832_s27 + $0x258] sm:$0xff] }
  0x3d   : > { %264 = vperm.xlu1 %3579, %v183_v35   ;;  %261 = vperm.xlu0 %3578, %v182_v36   ;;  %v1179_v35 = vld [vmem:[%s3832_s27 + $0x228] sm:$0xff] }
  0x3e   : > { %v971_v36 = vld [vmem:[%s3832_s27 + $0x1a8] sm:$0xff] }
  0x41   : > { %270 = vperm.xlu1 %3579, %v185_v38   ;;  %267 = vperm.xlu0 %3578, %v184_v39   ;;  %v1195_v38 = vadd.s32 %v1179_v35, %v746_v27  ;;  %v987_v39 = vadd.s32 %v971_v36, %v746_v27  ;;  %v3782_v35 = vmov 0.0  }
  0x45   : > { %276 = vperm.xlu1 %3579, %v187_v41   ;;  %273 = vperm.xlu0 %3578, %v186_v42   ;;  %v747_v41 = vmul.u32 32, %v731_v33  ;;  %v732_v42 = vshra.s32 %v716_v34, 4 }
  0x49   : > { %282 = vperm.xlu1 %3579, %v189_v45   ;;  %279 = vperm.xlu0 %3578, %v188_v46   ;;  %v988_v45 = vadd.s32 %v972_v43, %v747_v41  ;;  %v780_v46 = vadd.s32 %v764_v44, %v747_v41  ;;  %v723_v44 = vadd.s32 112, %v3867_v40 }
  0x4d   : > { %288 = vperm.xlu1 %3579, %v191_v47   ;;  %285 = vperm.xlu0 %3578, %v190_v50   ;;  %v748_v47 = vmul.u32 32, %v732_v42  ;;  %v1180_v50 = vld [vmem:[%s3832_s27 + $0x230] sm:$0xff] }
  0x4e   : > { %v1196_v52 = vadd.s32 %v1180_v50, %v747_v41  ;;  %v1186_v50 = vld [vmem:[%s3832_s27 + $0x260] sm:$0xff] }
  0x4f   : > { %v781_v51 = vadd.s32 %v765_v49, %v748_v47  ;;  %v1197_v57 = vadd.s32 %v1181_v55, %v748_v47  ;;  %v989_v58 = vadd.s32 %v973_v56, %v748_v47  ;;  %v771_v49 = vld [vmem:[%s3832_s27 + $0x168] sm:$0xff]  ;;  %v724_v56 = vadd.s32 120, %v3867_v40 }
  0x51   : > { %999 = vperm.xlu1 %3579, %v982_v53   ;;  %791 = vperm.xlu0 %3578, %v774_v54   ;;  %v733_v53 = vshra.s32 %v717_v48, 4  ;;  %v718_v54 = vadd.s32 72, %v3867_v40 }
  0x55   : > { %794 = vperm.xlu1 %3579, %v775_v59   ;;  %1207 = vperm.xlu0 %3578, %v1190_v60   ;;  %v749_v59 = vmul.u32 32, %v733_v53  ;;  %v734_v60 = vshra.s32 %v718_v54, 4  ;;  %v739_v53 = vshra.s32 %v723_v44, 4 }
  0x57   : > { %v990_v63 = vadd.s32 %v974_v61, %v749_v59  ;;  %v782_v0 = vadd.s32 %v766_v62, %v749_v59  ;;  %v1198_v6 = vadd.s32 %v1182_v4, %v749_v59  ;;  %v1187_v59 = vld [vmem:[%s3832_s27 + $0x268] sm:$0xff] }
  0x59   : > { %1210 = vperm.xlu1 %3579, %v1191_v1   ;;  %1002 = vperm.xlu0 %3578, %v983_v2   ;;  %v750_v1 = vmul.u32 32, %v734_v60  ;;  %v719_v2 = vadd.s32 80, %v3867_v40  ;;  %v979_v60 = vld [vmem:[%s3832_s27 + $0x1e8] sm:$0xff] }
  0x5b   : > { %v783_v5 = vadd.s32 %v767_v3, %v750_v1  ;;  %v1199_v11 = vadd.s32 %v1183_v9, %v750_v1  ;;  %v991_v12 = vadd.s32 %v975_v10, %v750_v1 }
  0x5d   : > { %1005 = vperm.xlu1 %3579, %v984_v7   ;;  %797 = vperm.xlu0 %3578, %v776_v8   ;;  %v735_v7 = vshra.s32 %v719_v2, 4  ;;  %v720_v8 = vadd.s32 88, %v3867_v40  ;;  %v740_v2 = vshra.s32 %v724_v56, 4 }
  0x61   : > { %800 = vperm.xlu1 %3579, %v777_v13   ;;  %1213 = vperm.xlu0 %3578, %v1192_v14   ;;  %v751_v13 = vmul.u32 32, %v735_v7  ;;  %v736_v14 = vshra.s32 %v720_v8, 4 }
  0x63   : > { %v992_v17 = vadd.s32 %v976_v15, %v751_v13  ;;  %v784_v18 = vadd.s32 %v768_v16, %v751_v13  ;;  %v1188_v15 = vld [vmem:[%s3832_s27 + $0x270] sm:$0xff] }
  0x65   : > { %1216 = vperm.xlu1 %3579, %v1193_v19   ;;  %1008 = vperm.xlu0 %3578, %v985_v20   ;;  %v752_v19 = vmul.u32 32, %v736_v14  ;;  %v721_v20 = vadd.s32 96, %v3867_v40  ;;  %v773_v14 = vld [vmem:[%s3832_s27 + $0x178] sm:$0xff] }
  0x67   : > { %v737_v27 = vshra.s32 %v721_v20, 4  ;;  %v1201_v33 = vadd.s32 %v1185_v28, %v752_v19  ;;  %v993_v37 = vadd.s32 %v977_v29, %v752_v19 }
  0x69   : > { %1011 = vperm.xlu1 %3579, %v986_v25   ;;  %803 = vperm.xlu0 %3578, %v778_v26   ;;  %v785_v25 = vadd.s32 %v769_v21, %v752_v19  ;;  %v1200_v26 = vadd.s32 %v1184_v22, %v751_v13  ;;  %v753_v34 = vmul.u32 32, %v737_v27  ;;  %v1189_v22 = vld [vmem:[%s3832_s27 + $0x278] sm:$0xff] }
  0x6b   : > { %v1202_v55 = vadd.s32 %v1186_v50, %v753_v34 }
  0x6d   : > { %806 = vperm.xlu1 %3579, %v779_v31   ;;  %1219 = vperm.xlu0 %3578, %v1194_v32   ;;  %v738_v32 = vshra.s32 %v722_v23, 4  ;;  %v981_v23 = vld [vmem:[%s3832_s27 + $0x1f8] sm:$0xff] }
  0x6f   : > { %v754_v43 = vmul.u32 32, %v738_v32 }
  0x71   : > { %1222 = vperm.xlu1 %3579, %v1195_v38   ;;  %1014 = vperm.xlu0 %3578, %v987_v39   ;;  %v978_v38 = vld [vmem:[%s3832_s27 + $0x1e0] sm:$0xff]  ;;  %v787_v54 = vadd.s32 %v771_v49, %v754_v43  ;;  %v995_v1 = vadd.s32 %v979_v60, %v754_v43 }
  0x72   : > { %v770_v39 = vld [vmem:[%s3832_s27 + $0x160] sm:$0xff] }
  0x73   : > { %v786_v47 = vadd.s32 %v770_v39, %v753_v34 }
  0x75   : > { %1017 = vperm.xlu1 %3579, %v988_v45   ;;  %809 = vperm.xlu0 %3578, %v780_v46   ;;  %v994_v46 = vadd.s32 %v978_v38, %v753_v34 }
  0x79   : > { %812 = vperm.xlu1 %3579, %v781_v51   ;;  %1225 = vperm.xlu0 %3578, %v1196_v52  }
  0x7d   : > { %1228 = vperm.xlu1 %3579, %v1197_v57   ;;  %1020 = vperm.xlu0 %3578, %v989_v58  }
  0x81   : > { %1023 = vperm.xlu1 %3579, %v990_v63   ;;  %815 = vperm.xlu0 %3578, %v782_v0   ;;  %v755_v63 = vmul.u32 32, %v739_v53  ;;  %v1203_v0 = vadd.s32 %v1187_v59, %v754_v43 }
  0x83   : > { %v1204_v19 = vadd.s32 %v1188_v15, %v755_v63 }
  0x85   : > { %818 = vperm.xlu1 %3579, %v783_v5   ;;  %1231 = vperm.xlu0 %3578, %v1198_v6   ;;  %v980_v5 = vld [vmem:[%s3832_s27 + $0x1f0] sm:$0xff] }
  0x86   : > { %v772_v6 = vld [vmem:[%s3832_s27 + $0x170] sm:$0xff]  ;;  %v996_v9 = vadd.s32 %v980_v5, %v755_v63 }
  0x87   : > { %v788_v10 = vadd.s32 %v772_v6, %v755_v63 }
  0x89   : > { %1234 = vperm.xlu1 %3579, %v1199_v11   ;;  %1026 = vperm.xlu0 %3578, %v991_v12   ;;  %v756_v11 = vmul.u32 32, %v740_v2 }
  0x8b   : > { %v1205_v27 = vadd.s32 %v1189_v22, %v756_v11  ;;  %v997_v28 = vadd.s32 %v981_v23, %v756_v11 }
  0x8d   : > { %1029 = vperm.xlu1 %3579, %v992_v17   ;;  %821 = vperm.xlu0 %3578, %v784_v18   ;;  %v789_v18 = vadd.s32 %v773_v14, %v756_v11 }
  0x90   : > { %v202_v30 = vpop.permute.xlu1 %201  ;;  %v196_v31 = vpop.permute.xlu0 %195 }
  0x91   : > { %824 = vperm.xlu1 %3579, %v785_v25   ;;  %1237 = vperm.xlu0 %3578, %v1200_v26   ;;  %vm290_vm1 = vcmp.eq.s32.totalorder %v3924_v24, %v196_v31  ;;  %vm292_vm2 = vcmp.eq.s32.totalorder %v3924_v24, %v202_v30 }
  0x92   : > { %v3075_v36 = vsel %vm290_vm1, 1.0, %v3782_v35  ;;  %v3077_v45 = vsel %vm292_vm2, 1.0, %v3782_v35 }
  0x93   : > { %3425 = vmatprep.mubr.msk.f32.mxu0 %vm386_vm0, %v3075_v36 }
  0x94   : > { %v205_v41 = vpop.permute.xlu1 %204  ;;  %v199_v42 = vpop.permute.xlu0 %198 }
  0x95   : > { %vm291_vm3 = vcmp.eq.s32.totalorder %v3924_v24, %v199_v42  ;;  %1240 = vperm.xlu1 %3579, %v1201_v33   ;;  %1032 = vperm.xlu0 %3578, %v993_v37   ;;  %vm293_vm4 = vcmp.eq.s32.totalorder %v3924_v24, %v205_v41 }
  0x96   : > { %v3076_v48 = vsel %vm291_vm3, 1.0, %v3782_v35  ;;  %v3078_v57 = vsel %vm293_vm4, 1.0, %v3782_v35 }
  0x97   : > { %3426 = vmatmul.mubr.msk.f32.vlgmr.msra.gmra.mrb[0].mxu0 %vm386_vm0, %v3076_v48 }
  0x98   : > { %v211_v51 = vpop.permute.xlu1 %210  ;;  %3428 = vmatprep.mubr.msk.f32.mxu0 %vm386_vm0, %v3077_v45  ;;  %v208_v52 = vpop.permute.xlu0 %207 }
  0x99   : > { %vm294_vm5 = vcmp.eq.s32.totalorder %v3924_v24, %v208_v52  ;;  %1035 = vperm.xlu1 %3579, %v994_v46   ;;  %827 = vperm.xlu0 %3578, %v786_v47   ;;  %vm295_vm6 = vcmp.eq.s32.totalorder %v3924_v24, %v211_v51 }
  0x9a   : > { %v3079_v58 = vsel %vm294_vm5, 1.0, %v3782_v35  ;;  %v3080_v3 = vsel %vm295_vm6, 1.0, %v3782_v35 }
  0x9b   : > { %3429 = vmatmul.mubr.msk.f32.gmra.mrb[2].mxu0 %vm386_vm0, %v3078_v57 }
  0x9c   : > { %v217_v61 = vpop.permute.xlu1 %216  ;;  %3431 = vmatprep.mubr.msk.f32.mxu0 %vm386_vm0, %v3079_v58  ;;  %v214_v62 = vpop.permute.xlu0 %213 }
  0x9d   : > { %vm296_vm7 = vcmp.eq.s32.totalorder %v3924_v24, %v214_v62  ;;  %830 = vperm.xlu1 %3579, %v787_v54   ;;  %1243 = vperm.xlu0 %3578, %v1202_v55   ;;  %vm297_vm8 = vcmp.eq.s32.totalorder %v3924_v24, %v217_v61 }
  0x9e   : > { %v3081_v4 = vsel %vm296_vm7, 1.0, %v3782_v35  ;;  %v3082_v12 = vsel %vm297_vm8, 1.0, %v3782_v35 }
  0x9f   : > { %3432 = vmatmul.mubr.msk.f32.gmra.mrb[4].mxu0 %vm386_vm0, %v3080_v3  ;;  %v4032_v3 = vadd.s32 128, %v3924_v24 }
  0xa0   : > { %v223_v7 = vpop.permute.xlu1 %222  ;;  %3434 = vmatprep.mubr.msk.f32.mxu0 %vm386_vm0, %v3081_v4  ;;  %v220_v8 = vpop.permute.xlu0 %219 }
  0xa1   : > { %vm298_vm9 = vcmp.eq.s32.totalorder %v3924_v24, %v220_v8  ;;  %1246 = vperm.xlu1 %3579, %v1203_v0   ;;  %1038 = vperm.xlu0 %3578, %v995_v1   ;;  %vm299_vm10 = vcmp.eq.s32.totalorder %v3924_v24, %v223_v7 }
  0xa2   : > { %v3083_v13 = vsel %vm298_vm9, 1.0, %v3782_v35  ;;  %v3084_v20 = vsel %vm299_vm10, 1.0, %v3782_v35 }
  0xa3   : > { %3435 = vmatmul.mubr.msk.f32.gmra.mrb[6].mxu0 %vm386_vm0, %v3082_v12 }
  0xa4   : > { %v229_v16 = vpop.permute.xlu1 %228  ;;  %3437 = vmatprep.mubr.msk.f32.mxu0 %vm386_vm0, %v3083_v13  ;;  %v226_v17 = vpop.permute.xlu0 %225 }
  0xa5   : > { %vm300_vm11 = vcmp.eq.s32.totalorder %v3924_v24, %v226_v17  ;;  %1041 = vperm.xlu1 %3579, %v996_v9   ;;  %833 = vperm.xlu0 %3578, %v788_v10   ;;  %vm301_vm12 = vcmp.eq.s32.totalorder %v3924_v24, %v229_v16 }
  0xa6   : > { %v3085_v21 = vsel %vm300_vm11, 1.0, %v3782_v35  ;;  %v3086_v29 = vsel %vm301_vm12, 1.0, %v3782_v35 }
  0xa7   : > { %3438 = vmatmul.mubr.msk.f32.gmra.mrb[8].mxu0 %vm386_vm0, %v3084_v20 }
  0xa8   : > { %v235_v25 = vpop.permute.xlu1 %234  ;;  %3440 = vmatprep.mubr.msk.f32.mxu0 %vm386_vm0, %v3085_v21  ;;  %v232_v26 = vpop.permute.xlu0 %231 }
  0xa9   : > { %vm302_vm13 = vcmp.eq.s32.totalorder %v3924_v24, %v232_v26  ;;  %836 = vperm.xlu1 %3579, %v789_v18   ;;  %1249 = vperm.xlu0 %3578, %v1204_v19   ;;  %vm303_vm14 = vcmp.eq.s32.totalorder %v3924_v24, %v235_v25 }
  0xaa   : > { %v3087_v30 = vsel %vm302_vm13, 1.0, %v3782_v35  ;;  %v3088_v33 = vsel %vm303_vm14, 1.0, %v3782_v35 }
  0xab   : > { %3441 = vmatmul.mubr.msk.f32.gmra.mrb[10].mxu0 %vm386_vm0, %v3086_v29 }
  0xac   : > { %v241_v31 = vpop.permute.xlu1 %240  ;;  %3443 = vmatprep.mubr.msk.f32.mxu0 %vm386_vm0, %v3087_v30  ;;  %v238_v32 = vpop.permute.xlu0 %237 }
  0xad   : > { %vm304_vm15 = vcmp.eq.s32.totalorder %v3924_v24, %v238_v32  ;;  %1252 = vperm.xlu1 %3579, %v1205_v27   ;;  %1044 = vperm.xlu0 %3578, %v997_v28   ;;  %vm305_vm1 = vcmp.eq.s32.totalorder %v3924_v24, %v241_v31 }
  0xae   : > { %v3089_v37 = vsel %vm304_vm15, 1.0, %v3782_v35  ;;  %v3090_v38 = vsel %vm305_vm1, 1.0, %v3782_v35 }
  0xaf   : > { %3444 = vmatmul.mubr.msk.f32.gmra.mrb[12].mxu0 %vm386_vm0, %v3088_v33 }
  0xb0   : > { %v247_v34 = vpop.permute.xlu1 %246  ;;  %3446 = vmatprep.mubr.msk.f32.mxu0 %vm386_vm0, %v3089_v37  ;;  %v244_v36 = vpop.permute.xlu0 %243 }
  0xb1   : > { %vm306_vm2 = vcmp.eq.s32.totalorder %v3924_v24, %v244_v36  ;;  %vm307_vm3 = vcmp.eq.s32.totalorder %v3924_v24, %v247_v34 }
  0xb2   : > { %v3091_v39 = vsel %vm306_vm2, 1.0, %v3782_v35  ;;  %v3092_v43 = vsel %vm307_vm3, 1.0, %v3782_v35 }
  0xb3   : > { %3447 = vmatmul.mubr.msk.f32.gmra.mrb[14].mxu0 %vm386_vm0, %v3090_v38 }
  0xb4   : > { %v253_v41 = vpop.permute.xlu1 %252  ;;  %3449 = vmatprep.mubr.msk.f32.mxu0 %vm386_vm0, %v3091_v39  ;;  %v250_v42 = vpop.permute.xlu0 %249 }
  0xb5   : > { %vm308_vm4 = vcmp.eq.s32.totalorder %v3924_v24, %v250_v42  ;;  %vm309_vm5 = vcmp.eq.s32.totalorder %v3924_v24, %v253_v41 }
  0xb6   : > { %v3093_v44 = vsel %vm308_vm4, 1.0, %v3782_v35  ;;  %v3094_v47 = vsel %vm309_vm5, 1.0, %v3782_v35 }
  0xb7   : > { %3450 = vmatmul.mubr.msk.f32.gmra.mrb[16].mxu0 %vm386_vm0, %v3092_v43 }
  0xb8   : > { %v259_v45 = vpop.permute.xlu1 %258  ;;  %3452 = vmatprep.mubr.msk.f32.mxu0 %vm386_vm0, %v3093_v44  ;;  %v256_v46 = vpop.permute.xlu0 %255 }
  0xb9   : > { %vm310_vm6 = vcmp.eq.s32.totalorder %v3924_v24, %v256_v46  ;;  %vm311_vm7 = vcmp.eq.s32.totalorder %v3924_v24, %v259_v45 }
  0xba   : > { %v3095_v48 = vsel %vm310_vm6, 1.0, %v3782_v35  ;;  %v3096_v51 = vsel %vm311_vm7, 1.0, %v3782_v35 }
  0xbb   : > { %3453 = vmatmul.mubr.msk.f32.gmra.mrb[18].mxu0 %vm386_vm0, %v3094_v47 }
  0xbc   : > { %v265_v49 = vpop.permute.xlu1 %264  ;;  %3455 = vmatprep.mubr.msk.f32.mxu0 %vm386_vm0, %v3095_v48  ;;  %v262_v50 = vpop.permute.xlu0 %261 }
  0xbd   : > { %vm312_vm8 = vcmp.eq.s32.totalorder %v3924_v24, %v262_v50  ;;  %vm313_vm9 = vcmp.eq.s32.totalorder %v3924_v24, %v265_v49 }
  0xbe   : > { %v3097_v52 = vsel %vm312_vm8, 1.0, %v3782_v35  ;;  %v3098_v55 = vsel %vm313_vm9, 1.0, %v3782_v35 }
  0xbf   : > { %3456 = vmatmul.mubr.msk.f32.gmra.mrb[20].mxu0 %vm386_vm0, %v3096_v51 }
  0xc0   : > { %v271_v53 = vpop.permute.xlu1 %270  ;;  %3458 = vmatprep.mubr.msk.f32.mxu0 %vm386_vm0, %v3097_v52  ;;  %v268_v54 = vpop.permute.xlu0 %267 }
  0xc1   : > { %vm314_vm10 = vcmp.eq.s32.totalorder %v3924_v24, %v268_v54  ;;  %vm315_vm11 = vcmp.eq.s32.totalorder %v3924_v24, %v271_v53 }
  0xc2   : > { %v3099_v56 = vsel %vm314_vm10, 1.0, %v3782_v35  ;;  %v3100_v59 = vsel %vm315_vm11, 1.0, %v3782_v35 }
  0xc3   : > { %3459 = vmatmul.mubr.msk.f32.gmra.mrb[22].mxu0 %vm386_vm0, %v3098_v55 }
  0xc4   : > { %v277_v57 = vpop.permute.xlu1 %276  ;;  %3461 = vmatprep.mubr.msk.f32.mxu0 %vm386_vm0, %v3099_v56  ;;  %v274_v58 = vpop.permute.xlu0 %273 }
  0xc5   : > { %vm316_vm12 = vcmp.eq.s32.totalorder %v3924_v24, %v274_v58  ;;  %vm317_vm13 = vcmp.eq.s32.totalorder %v3924_v24, %v277_v57 }
  0xc6   : > { %v3101_v60 = vsel %vm316_vm12, 1.0, %v3782_v35  ;;  %v3102_v63 = vsel %vm317_vm13, 1.0, %v3782_v35 }
  0xc7   : > { %3462 = vmatmul.mubr.msk.f32.gmra.mrb[24].mxu0 %vm386_vm0, %v3100_v59 }
  0xc8   : > { %v283_v61 = vpop.permute.xlu1 %282  ;;  %3464 = vmatprep.mubr.msk.f32.mxu0 %vm386_vm0, %v3101_v60  ;;  %v280_v62 = vpop.permute.xlu0 %279 }
  0xc9   : > { %vm318_vm14 = vcmp.eq.s32.totalorder %v3924_v24, %v280_v62  ;;  %vm319_vm15 = vcmp.eq.s32.totalorder %v3924_v24, %v283_v61 }
  0xca   : > { %v3103_v0 = vsel %vm318_vm14, 1.0, %v3782_v35  ;;  %v3104_v4 = vsel %vm319_vm15, 1.0, %v3782_v35 }
  0xcb   : > { %3465 = vmatmul.mubr.msk.f32.gmra.mrb[26].mxu0 %vm386_vm0, %v3102_v63 }
  0xcc   : > { %v289_v1 = vpop.permute.xlu1 %288  ;;  %3467 = vmatprep.mubr.msk.f32.mxu0 %vm386_vm0, %v3103_v0  ;;  %v286_v2 = vpop.permute.xlu0 %285 }
  0xcd   : > { %vm320_vm1 = vcmp.eq.s32.totalorder %v3924_v24, %v286_v2  ;;  %vm321_vm2 = vcmp.eq.s32.totalorder %v3924_v24, %v289_v1 }
  0xce   : > { %v3105_v5 = vsel %vm320_vm1, 1.0, %v3782_v35  ;;  %v3106_v8 = vsel %vm321_vm2, 1.0, %v3782_v35 }
  0xcf   : > { %3468 = vmatmul.mubr.msk.f32.gmra.mrb[28].mxu0 %vm386_vm0, %v3104_v4 }
  0xd0   : > { %v4038_v6 = vpop.permute.xlu1 %999  ;;  %3470 = vmatprep.mubr.msk.f32.mxu0 %vm386_vm0, %v3105_v5  ;;  %v4041_v7 = vpop.permute.xlu0 %791 }
  0xd1   : > { %vm1047_vm3 = vcmp.eq.s32.totalorder %v4032_v3, %v4038_v6  ;;  %vm839_vm4 = vcmp.eq.s32.totalorder %v4032_v3, %v4041_v7  ;;  %vm1046_vm6 = vcmp.eq.s32.totalorder %v3924_v24, %v4038_v6  ;;  %vm838_vm7 = vcmp.eq.s32.totalorder %v3924_v24, %v4041_v7 }
  0xd2   : > { %v3140_v9 = vsel %vm839_vm4, 1.0, %v3782_v35  ;;  %v3172_v10 = vsel %vm1047_vm3, 1.0, %v3782_v35 }
  0xd3   : > { %3471 = vmatmul.mubr.msk.f32.gmra.mrb[30].mxu0 %vm386_vm0, %v3106_v8  ;;  %v1143_v12 = vadd.f32 %v3172_v10, %v3140_v9 }
  0xd4   : > { %v4051_v11 = vpop.permute.xlu0 %1207  ;;  %v4056_v15 = vpop.permute.xlu1 %794 }
  0xd5   : > { %vm1255_vm5 = vcmp.eq.s32.totalorder %v4032_v3, %v4051_v11  ;;  %vm841_vm10 = vcmp.eq.s32.totalorder %v4032_v3, %v4056_v15  ;;  %vm840_vm11 = vcmp.eq.s32.totalorder %v3924_v24, %v4056_v15  ;;  %vm1254_vm12 = vcmp.eq.s32.totalorder %v3924_v24, %v4051_v11 }
  0xd6   : > { %v3204_v13 = vsel %vm1255_vm5, 1.0, %v3782_v35 }
  0xd7   : > { %v1351_v14 = vadd.f32 %v3204_v13, %v1143_v12 }
  0xd8   : > { %v4058_v16 = vpop.permute.xlu0 %1002  ;;  %v4060_v17 = vpop.permute.xlu1 %1210 }
  0xd9   : > { %1450 = vmatprep.mubr.f32.mxu1 %v1351_v14  ;;  %vm1049_vm8 = vcmp.eq.s32.totalorder %v4032_v3, %v4058_v16  ;;  %vm1048_vm9 = vcmp.eq.s32.totalorder %v3924_v24, %v4058_v16  ;;  %vm1257_vm2 = vcmp.eq.s32.totalorder %v4032_v3, %v4060_v17  ;;  %vm1256_vm3 = vcmp.eq.s32.totalorder %v3924_v24, %v4060_v17 }
  0xda   : > { %v3174_v7 = vsel %vm1049_vm8, 1.0, %v3782_v35  ;;  %v3206_v17 = vsel %vm1257_vm2, 1.0, %v3782_v35 }
  0xdc   : > { %v4062_v18 = vpop.permute.xlu0 %797  ;;  %v4064_v19 = vpop.permute.xlu1 %1005 }
  0xdd   : > { %vm1050_vm13 = vcmp.eq.s32.totalorder %v3924_v24, %v4064_v19  ;;  %vm1051_vm14 = vcmp.eq.s32.totalorder %v4032_v3, %v4064_v19  ;;  %vm842_vm15 = vcmp.eq.s32.totalorder %v3924_v24, %v4062_v18  ;;  %vm843_vm1 = vcmp.eq.s32.totalorder %v4032_v3, %v4062_v18 }
  0xde   : > { %v3176_v15 = vsel %vm1051_vm14, 1.0, %v3782_v35  ;;  %v3143_v11 = vsel %vm842_vm15, 1.0, %v3782_v35 }
  0xe0   : > { %v4066_v20 = vpop.permute.xlu0 %1213  ;;  %v4068_v22 = vpop.permute.xlu1 %800 }
  0xe1   : > { %vm1259_vm4 = vcmp.eq.s32.totalorder %v4032_v3, %v4066_v20  ;;  %vm844_vm8 = vcmp.eq.s32.totalorder %v3924_v24, %v4068_v22 }
  0xe4   : > { %v4070_v25 = vpop.permute.xlu0 %1008  ;;  %v4072_v30 = vpop.permute.xlu1 %1216 }
  0xe5   : > { %vm1053_vm5 = vcmp.eq.s32.totalorder %v4032_v3, %v4070_v25 }
  0xe8   : > { %v4074_v31 = vpop.permute.xlu0 %803  ;;  %v4076_v36 = vpop.permute.xlu1 %1011 }
  0xe9   : > { %vm1054_vm14 = vcmp.eq.s32.totalorder %v3924_v24, %v4076_v36  ;;  %vm846_vm15 = vcmp.eq.s32.totalorder %v3924_v24, %v4074_v31 }
  0xec   : > { %v4078_v39 = vpop.permute.xlu0 %1219  ;;  %v4080_v45 = vpop.permute.xlu1 %806 }
  0xf0   : > { %v4082_v46 = vpop.permute.xlu0 %1014  ;;  %v4086_v51 = vpop.permute.xlu1 %1222 }
  0xf1   : > { %vm1057_vm2 = vcmp.eq.s32.totalorder %v4032_v3, %v4082_v46 }
  0xf4   : > { %v4090_v53 = vpop.permute.xlu0 %809  ;;  %v4100_v58 = vpop.permute.xlu1 %1017 }
  0xf8   : > { %v4102_v59 = vpop.permute.xlu0 %1225  ;;  %v4104_v0 = vpop.permute.xlu1 %812 }
  0xfc   : > { %v4106_v2 = vpop.permute.xlu0 %1020  ;;  %v4108_v10 = vpop.permute.xlu1 %1228 }
 0x100   : > { %v4110_v12 = vpop.permute.xlu0 %815 }
 0x16a   : > { %v3427_v21 = vpop.f32.mrb[0].mxu0 }
 0x16b   : > { %v549_v23 = vpop.f32.mrb[1].mxu0 }
 0x16c   : > { %v3523_v26 = vpack.c.bf16 %v3427_v21, %v549_v23 }
 0x16e   : > { %v3430_v27 = vpop.f32.mrb[2].mxu0 }
 0x16f   : > { %v559_v28 = vpop.f32.mrb[3].mxu0 }
 0x170   : > { %v3527_v29 = vpack.c.bf16 %v3430_v27, %v559_v28  ;;  %v4114_v28 = vpop.permute.xlu0 %1231 }
 0x172   : > { %v3433_v32 = vpop.f32.mrb[4].mxu0 }
 0x173   : > { %v569_v33 = vpop.f32.mrb[5].mxu0 }
 0x174   : > { %v3531_v37 = vpack.c.bf16 %v3433_v32, %v569_v33 }
 0x176   : > { %v3436_v34 = vpop.f32.mrb[6].mxu0 }
 0x177   : > { %v579_v38 = vpop.f32.mrb[7].mxu0 }
 0x178   : > { %v3535_v41 = vpack.c.bf16 %v3436_v34, %v579_v38  ;;  %v4122_v38 = vpop.permute.xlu0 %1026 }
 0x17a   : > { %v3439_v42 = vpop.f32.mrb[8].mxu0 }
 0x17b   : > { %v589_v43 = vpop.f32.mrb[9].mxu0 }
 0x17c   : > { %v3539_v44 = vpack.c.bf16 %v3439_v42, %v589_v43  ;;  %v3171_v43 = vsel %vm1046_vm6, 1.0, %v3782_v35  ;;  %vm1258_vm6 = vcmp.eq.s32.totalorder %v3924_v24, %v4066_v20 }
 0x17e   : > { %v3442_v47 = vpop.f32.mrb[10].mxu0 }
 0x17f   : > { %v599_v48 = vpop.f32.mrb[11].mxu0 }
 0x180   : > { %v3543_v49 = vpack.c.bf16 %v3442_v47, %v599_v48 }
 0x182   : > { %v4084_v50 = vpop.f32.mrb[12].mxu0 }
 0x183   : > { %v4088_v52 = vpop.f32.mrb[13].mxu0 }
 0x184   : > { %v3547_v54 = vpack.c.bf16 %v4084_v50, %v4088_v52  ;;  %v3203_v50 = vsel %vm1254_vm12, 1.0, %v3782_v35  ;;  %vm847_vm12 = vcmp.eq.s32.totalorder %v4032_v3, %v4074_v31 }
 0x186   : > { %v4094_v55 = vpop.f32.mrb[14].mxu0 }
 0x187   : > { %v4096_v56 = vpop.f32.mrb[15].mxu0 }
 0x188   : > { %v3551_v57 = vpack.c.bf16 %v4094_v55, %v4096_v56 }
 0x18a   : > { %v3451_v60 = vpop.f32.mrb[16].mxu0 }
 0x18b   : > { %v629_v61 = vpop.f32.mrb[17].mxu0 }
 0x18c   : > { %v3521_v62 = vpack.c.bf16 %v3451_v60, %v629_v61  ;;  %v3142_v60 = vsel %vm841_vm10, 1.0, %v3782_v35  ;;  %vm1260_vm10 = vcmp.eq.s32.totalorder %v3924_v24, %v4072_v30 }
 0x18d   : > { %v1145_v52 = vadd.f32 %v3174_v7, %v3142_v60 }
 0x18e   : > { %v3454_v63 = vpop.f32.mrb[18].mxu0  ;;  %3522 = vmatprep.subr.bf16.mxu1 %v3521_v62  ;;  %v4152_v62 = vpop.permute.xlu0 %821 }
 0x18f   : > { %v639_v1 = vpop.f32.mrb[19].mxu0  ;;  %3524 = vmatpush3.bf16.msra.mxu1 %v3523_v26  ;;  %v4112_v26 = vpop.permute.xlu1 %1023 }
 0x190   : > { %v3525_v4 = vpack.c.bf16 %v3454_v63, %v639_v1  ;;  %v3141_v1 = vsel %vm840_vm11, 1.0, %v3782_v35  ;;  %vm1055_vm11 = vcmp.eq.s32.totalorder %v4032_v3, %v4076_v36  ;;  %v3179_v36 = vsel %vm1054_vm14, 1.0, %v3782_v35 }
 0x191   : > { %vm1061_vm14 = vcmp.eq.s32.totalorder %v4032_v3, %v4106_v2 }
 0x192   : > { %v3457_v5 = vpop.f32.mrb[20].mxu0  ;;  %3526 = vmatprep.subr.bf16.mxu1 %v3525_v4  ;;  %v3144_v4 = vsel %vm843_vm1, 1.0, %v3782_v35  ;;  %vm1263_vm1 = vcmp.eq.s32.totalorder %v4032_v3, %v4078_v39 }
 0x193   : > { %v649_v8 = vpop.f32.mrb[21].mxu0  ;;  %3528 = vmatpush3.bf16.msra.mxu1 %v3527_v29  ;;  %v1147_v56 = vadd.f32 %v3176_v15, %v3144_v4 }
 0x194   : > { %v3529_v9 = vpack.c.bf16 %v3457_v5, %v649_v8  ;;  %v3205_v5 = vsel %vm1256_vm3, 1.0, %v3782_v35  ;;  %v1353_v8 = vadd.f32 %v3206_v17, %v1145_v52  ;;  %vm848_vm3 = vcmp.eq.s32.totalorder %v3924_v24, %v4080_v45 }
 0x196   : > { %v3460_v13 = vpop.f32.mrb[22].mxu0  ;;  %3530 = vmatprep.subr.bf16.mxu1 %v3529_v9  ;;  %v3178_v9 = vsel %vm1053_vm5, 1.0, %v3782_v35  ;;  %vm849_vm5 = vcmp.eq.s32.totalorder %v4032_v3, %v4080_v45 }
 0x197   : > { %v659_v14 = vpop.f32.mrb[23].mxu0  ;;  %3532 = vmatpush3.bf16.msra.mxu1 %v3531_v37  ;;  %v4120_v37 = vpop.permute.xlu1 %818 }
 0x198   : > { %v3533_v21 = vpack.c.bf16 %v3460_v13, %v659_v14  ;;  %v4197_v13 = vpop.permute.xlu0 %1237 }
 0x19a   : > { %v3463_v23 = vpop.f32.mrb[24].mxu0  ;;  %3534 = vmatprep.subr.bf16.mxu1 %v3533_v21  ;;  %v3145_v21 = vsel %vm844_vm8, 1.0, %v3782_v35  ;;  %vm850_vm8 = vcmp.eq.s32.totalorder %v3924_v24, %v4090_v53 }
 0x19b   : > { %v669_v27 = vpop.f32.mrb[25].mxu0  ;;  %3536 = vmatpush3.bf16.msra.mxu1 %v3535_v41  ;;  %v4150_v61 = vpop.permute.xlu1 %1234 }
 0x19c   : > { %v3537_v32 = vpack.c.bf16 %v3463_v23, %v669_v27 }
 0x19e   : > { %v3466_v29 = vpop.f32.mrb[26].mxu0  ;;  %3538 = vmatprep.subr.bf16.mxu1 %v3537_v32 }
 0x19f   : > { %v679_v33 = vpop.f32.mrb[27].mxu0  ;;  %3540 = vmatpush3.bf16.msra.mxu1 %v3539_v44  ;;  %v3139_v44 = vsel %vm838_vm7, 1.0, %v3782_v35  ;;  %vm1052_vm7 = vcmp.eq.s32.totalorder %v3924_v24, %v4070_v25  ;;  %v4195_v20 = vpop.permute.xlu1 %1029  ;;  %v3207_v25 = vsel %vm1258_vm6, 1.0, %v3782_v35  ;;  %vm1262_vm6 = vcmp.eq.s32.totalorder %v3924_v24, %v4078_v39 }
 0x1a0   : > { %v3541_v34 = vpack.c.bf16 %v3466_v29, %v679_v33  ;;  %v1142_v48 = vadd.f32 %v3171_v43, %v3139_v44  ;;  %v3177_v14 = vsel %vm1052_vm7, 1.0, %v3782_v35  ;;  %v3209_v29 = vsel %vm1260_vm10, 1.0, %v3782_v35  ;;  %v4230_v43 = vpop.permute.xlu0 %1032 }
 0x1a1   : > { %v1148_v33 = vadd.f32 %v3177_v14, %v3145_v21  ;;  %v3147_v44 = vsel %vm846_vm15, 1.0, %v3782_v35  ;;  %vm1058_vm7 = vcmp.eq.s32.totalorder %v3924_v24, %v4100_v58  ;;  %v3150_v39 = vsel %vm849_vm5, 1.0, %v3782_v35 }
 0x1a2   : > { %v3469_v42 = vpop.f32.mrb[28].mxu0  ;;  %3542 = vmatprep.subr.bf16.mxu1 %v3541_v34  ;;  %v1350_v19 = vadd.f32 %v3203_v50, %v1142_v48  ;;  %v3182_v48 = vsel %vm1057_vm2, 1.0, %v3782_v35  ;;  %v3211_v45 = vsel %vm1262_vm6, 1.0, %v3782_v35  ;;  %vm851_vm10 = vcmp.eq.s32.totalorder %v4032_v3, %v4090_v53 }
 0x1a3   : > { %v689_v41 = vpop.f32.mrb[29].mxu0  ;;  %3544 = vmatpush3.bf16.msra.mxu1 %v3543_v49  ;;  %v3173_v49 = vsel %vm1048_vm9, 1.0, %v3782_v35  ;;  %vm845_vm9 = vcmp.eq.s32.totalorder %v4032_v3, %v4068_v22  ;;  %v4228_v31 = vpop.permute.xlu1 %824  ;;  %v1153_v60 = vadd.f32 %v3182_v48, %v3150_v39  ;;  %v3183_v52 = vsel %vm1058_vm7, 1.0, %v3782_v35 }
 0x1a4   : > { %v3545_v6 = vpack.c.bf16 %v3469_v42, %v689_v41  ;;  %v1144_v18 = vadd.f32 %v3173_v49, %v3141_v1  ;;  %v3146_v23 = vsel %vm845_vm9, 1.0, %v3782_v35  ;;  %v3180_v42 = vsel %vm1055_vm11, 1.0, %v3782_v35 }
 0x1a5   : > { %v1149_v27 = vadd.f32 %v3178_v9, %v3146_v23  ;;  %v3148_v41 = vsel %vm847_vm12, 1.0, %v3782_v35  ;;  %v3149_v49 = vsel %vm848_vm3, 1.0, %v3782_v35  ;;  %vm1059_vm9 = vcmp.eq.s32.totalorder %v4032_v3, %v4100_v58  ;;  %v4259_v58 = vpop.permute.xlu0 %827 }
 0x1a6   : > { %v3472_v47 = vpop.f32.mrb[30].mxu0  ;;  %3546 = vmatprep.subr.bf16.mxu1 %v3545_v6  ;;  %v1352_v22 = vadd.f32 %v3205_v5, %v1144_v18  ;;  %v1151_v7 = vadd.f32 %v3180_v42, %v3148_v41  ;;  %vm1264_vm11 = vcmp.eq.s32.totalorder %v3924_v24, %v4086_v51  ;;  %vm1265_vm12 = vcmp.eq.s32.totalorder %v4032_v3, %v4086_v51 }
 0x1a7   : > { %v699_v16 = vpop.f32.mrb[31].mxu0  ;;  %3548 = vmatpush3.bf16.msra.mxu1 %v3547_v54  ;;  %v3175_v54 = vsel %vm1050_vm13, 1.0, %v3782_v35  ;;  %vm1261_vm13 = vcmp.eq.s32.totalorder %v4032_v3, %v4072_v30  ;;  %v1150_v1 = vadd.f32 %v3179_v36, %v3147_v44  ;;  %v3151_v18 = vsel %vm850_vm8, 1.0, %v3782_v35 }
 0x1a8   : > { %v3549_v63 = vpack.c.bf16 %v3472_v47, %v699_v16  ;;  %v1146_v55 = vadd.f32 %v3175_v54, %v3143_v11  ;;  %v3210_v30 = vsel %vm1261_vm13, 1.0, %v3782_v35  ;;  %v3212_v47 = vsel %vm1263_vm1, 1.0, %v3782_v35  ;;  %v4257_v54 = vpop.permute.xlu1 %1240 }
 0x1a9   : > { %v1357_v6 = vadd.f32 %v3210_v30, %v1149_v27  ;;  %v3184_v53 = vsel %vm1059_vm9, 1.0, %v3782_v35  ;;  %v3152_v15 = vsel %vm851_vm10, 1.0, %v3782_v35  ;;  %vm1267_vm13 = vcmp.eq.s32.totalorder %v4032_v3, %v4102_v59  ;;  %v4298_v9 = vpop.permute.xlu0 %1243 }
 0x1aa   : > { %3550 = vmatprep.subr.bf16.mxu1 %v3549_v63  ;;  %v1354_v34 = vadd.f32 %v3207_v25, %v1146_v55  ;;  %v1359_v63 = vadd.f32 %v3212_v47, %v1151_v7  ;;  %v3213_v11 = vsel %vm1264_vm11, 1.0, %v3782_v35  ;;  %v3214_v4 = vsel %vm1265_vm12, 1.0, %v3782_v35 }
 0x1ab   : > { %3552 = vmatpush3.bf16.msra.mxu1 %v3551_v57  ;;  %v3208_v57 = vsel %vm1259_vm4, 1.0, %v3782_v35  ;;  %vm1056_vm4 = vcmp.eq.s32.totalorder %v3924_v24, %v4082_v46  ;;  %v1356_v46 = vadd.f32 %v3209_v29, %v1148_v33  ;;  %vm1060_vm15 = vcmp.eq.s32.totalorder %v3924_v24, %v4106_v2 }
 0x1ac   : > { %v1355_v32 = vadd.f32 %v3208_v57, %v1147_v56  ;;  %v3181_v16 = vsel %vm1056_vm4, 1.0, %v3782_v35  ;;  %v1358_v17 = vadd.f32 %v3211_v45, %v1150_v1  ;;  %vm852_vm1 = vcmp.eq.s32.totalorder %v3924_v24, %v4104_v0 }
 0x1ad   : > { %v1152_v50 = vadd.f32 %v3181_v16, %v3149_v49  ;;  %vm853_vm2 = vcmp.eq.s32.totalorder %v4032_v3, %v4104_v0  ;;  %v1361_v5 = vadd.f32 %v3214_v4, %v1153_v60  ;;  %vm1266_vm3 = vcmp.eq.s32.totalorder %v3924_v24, %v4102_v59  ;;  %v4296_v59 = vpop.permute.xlu1 %1035  ;;  %v4333_v44 = vpop.permute.xlu0 %1038 }
 0x1ae   : > { %1451 = vmatmul.mubr.f32.vlgmr.msra.gmra.mrb[0].mxu1 %v1350_v19  ;;  %v1154_v19 = vadd.f32 %v3183_v52, %v3151_v18  ;;  %v3216_v55 = vsel %vm1267_vm13, 1.0, %v3782_v35  ;;  %v3186_v51 = vsel %vm1061_vm14, 1.0, %v3782_v35  ;;  %v3185_v2 = vsel %vm1060_vm15, 1.0, %v3782_v35 }
 0x1af   : > { %1455 = vmatprep.mubr.f32.mxu1 %v1353_v8  ;;  %v1155_v8 = vadd.f32 %v3184_v53, %v3152_v15  ;;  %vm1062_vm4 = vcmp.eq.s32.totalorder %v3924_v24, %v4112_v26  ;;  %vm854_vm5 = vcmp.eq.s32.totalorder %v3924_v24, %v4110_v12  ;;  %v1360_v0 = vadd.f32 %v3213_v11, %v1152_v50 }
 0x1b0   : > { %v3153_v56 = vsel %vm852_vm1, 1.0, %v3782_v35  ;;  %v3154_v57 = vsel %vm853_vm2, 1.0, %v3782_v35  ;;  %vm1063_vm6 = vcmp.eq.s32.totalorder %v4032_v3, %v4112_v26  ;;  %vm855_vm7 = vcmp.eq.s32.totalorder %v4032_v3, %v4110_v12 }
 0x1b1   : > { %v3215_v25 = vsel %vm1266_vm3, 1.0, %v3782_v35  ;;  %vm1269_vm8 = vcmp.eq.s32.totalorder %v4032_v3, %v4108_v10  ;;  %v1157_v14 = vadd.f32 %v3186_v51, %v3154_v57  ;;  %vm1268_vm9 = vcmp.eq.s32.totalorder %v3924_v24, %v4108_v10  ;;  %v4331_v36 = vpop.permute.xlu1 %830  ;;  %v4364_v60 = vpop.permute.xlu0 %833 }
 0x1b2   : > { %1456 = vmatmul.mubr.f32.gmra.mrb[2].mxu1 %v1352_v22  ;;  %v1363_v22 = vadd.f32 %v3216_v55, %v1155_v8  ;;  %v1156_v21 = vadd.f32 %v3185_v2, %v3153_v56  ;;  %v3187_v23 = vsel %vm1062_vm4, 1.0, %v3782_v35  ;;  %v3155_v27 = vsel %vm854_vm5, 1.0, %v3782_v35 }
 0x1b3   : > { %1460 = vmatprep.mubr.f32.mxu1 %v1355_v32  ;;  %v3188_v32 = vsel %vm1063_vm6, 1.0, %v3782_v35  ;;  %v3156_v29 = vsel %vm855_vm7, 1.0, %v3782_v35  ;;  %vm1271_vm10 = vcmp.eq.s32.totalorder %v4032_v3, %v4114_v28  ;;  %vm1065_vm11 = vcmp.eq.s32.totalorder %v4032_v3, %v4122_v38 }
 0x1b4   : > { %v3218_v10 = vsel %vm1269_vm8, 1.0, %v3782_v35  ;;  %vm856_vm12 = vcmp.eq.s32.totalorder %v3924_v24, %v4120_v37  ;;  %vm1064_vm13 = vcmp.eq.s32.totalorder %v3924_v24, %v4122_v38  ;;  %v1362_v12 = vadd.f32 %v3215_v25, %v1154_v19 }
 0x1b5   : > { %v3217_v26 = vsel %vm1268_vm9, 1.0, %v3782_v35  ;;  %v1158_v33 = vadd.f32 %v3187_v23, %v3155_v27  ;;  %vm857_vm14 = vcmp.eq.s32.totalorder %v4032_v3, %v4120_v37  ;;  %v1159_v42 = vadd.f32 %v3188_v32, %v3156_v29  ;;  %v4362_v45 = vpop.permute.xlu1 %1246  ;;  %v4395_v8 = vpop.permute.xlu0 %1249 }
 0x1b6   : > { %1461 = vmatmul.mubr.f32.gmra.mrb[4].mxu1 %v1354_v34  ;;  %v1365_v34 = vadd.f32 %v3218_v10, %v1157_v14  ;;  %vm1270_vm15 = vcmp.eq.s32.totalorder %v3924_v24, %v4114_v28  ;;  %v3220_v41 = vsel %vm1271_vm10, 1.0, %v3782_v35  ;;  %v3190_v30 = vsel %vm1065_vm11, 1.0, %v3782_v35 }
 0x1b7   : > { %1465 = vmatprep.mubr.f32.mxu1 %v1357_v6  ;;  %v3157_v38 = vsel %vm856_vm12, 1.0, %v3782_v35  ;;  %v3189_v6 = vsel %vm1064_vm13, 1.0, %v3782_v35  ;;  %vm1066_vm1 = vcmp.eq.s32.totalorder %v3924_v24, %v4195_v20  ;;  %v1364_v37 = vadd.f32 %v3217_v26, %v1156_v21 }
 0x1b8   : > { %v3158_v28 = vsel %vm857_vm14, 1.0, %v3782_v35  ;;  %vm1067_vm2 = vcmp.eq.s32.totalorder %v4032_v3, %v4195_v20  ;;  %vm858_vm3 = vcmp.eq.s32.totalorder %v3924_v24, %v4152_v62  ;;  %vm859_vm4 = vcmp.eq.s32.totalorder %v4032_v3, %v4152_v62 }
 0x1b9   : > { %v3219_v7 = vsel %vm1270_vm15, 1.0, %v3782_v35  ;;  %vm1273_vm5 = vcmp.eq.s32.totalorder %v4032_v3, %v4150_v61  ;;  %v1161_v47 = vadd.f32 %v3190_v30, %v3158_v28  ;;  %v1367_v48 = vadd.f32 %v3220_v41, %v1159_v42  ;;  %v1045_v32 = vpop.permute.xlu0 %1044 }
 0x1ba   : > { %1466 = vmatmul.mubr.f32.gmra.mrb[6].mxu1 %v1356_v46  ;;  %vm1272_vm6 = vcmp.eq.s32.totalorder %v3924_v24, %v4150_v61  ;;  %v1160_v46 = vadd.f32 %v3189_v6, %v3157_v38  ;;  %v3191_v49 = vsel %vm1066_vm1, 1.0, %v3782_v35  ;;  %vm1275_vm7 = vcmp.eq.s32.totalorder %v4032_v3, %v4197_v13 }
 0x1bb   : > { %1470 = vmatprep.mubr.f32.mxu1 %v1359_v63  ;;  %v3192_v20 = vsel %vm1067_vm2, 1.0, %v3782_v35  ;;  %v3159_v62 = vsel %vm858_vm3, 1.0, %v3782_v35  ;;  %v3160_v16 = vsel %vm859_vm4, 1.0, %v3782_v35  ;;  %vm1069_vm8 = vcmp.eq.s32.totalorder %v4032_v3, %v4230_v43 }
 0x1bc   : > { %v3222_v39 = vsel %vm1273_vm5, 1.0, %v3782_v35  ;;  %vm1274_vm9 = vcmp.eq.s32.totalorder %v3924_v24, %v4197_v13  ;;  %v1366_v63 = vadd.f32 %v3219_v7, %v1158_v33  ;;  %vm861_vm10 = vcmp.eq.s32.totalorder %v4032_v3, %v4228_v31 }
 0x1bd   : > { %v3224_v1 = vsel %vm1275_vm7, 1.0, %v3782_v35  ;;  %vm1068_vm11 = vcmp.eq.s32.totalorder %v3924_v24, %v4230_v43  ;;  %v1369_v50 = vadd.f32 %v3222_v39, %v1161_v47  ;;  %v3221_v52 = vsel %vm1272_vm6, 1.0, %v3782_v35 }
 0x1be   : > { %1471 = vmatmul.mubr.f32.gmra.mrb[8].mxu1 %v1358_v17  ;;  %v1162_v13 = vadd.f32 %v3191_v49, %v3159_v62  ;;  %v1163_v18 = vadd.f32 %v3192_v20, %v3160_v16  ;;  %v3194_v53 = vsel %vm1069_vm8, 1.0, %v3782_v35  ;;  %vm860_vm12 = vcmp.eq.s32.totalorder %v3924_v24, %v4228_v31 }
 0x1bf   : > { %1475 = vmatprep.mubr.f32.mxu1 %v1361_v5  ;;  %v3223_v15 = vsel %vm1274_vm9, 1.0, %v3782_v35  ;;  %vm1277_vm13 = vcmp.eq.s32.totalorder %v4032_v3, %v4257_v54  ;;  %v1368_v43 = vadd.f32 %v3221_v52, %v1160_v46  ;;  %v3162_v11 = vsel %vm861_vm10, 1.0, %v3782_v35  ;;  %v1042_v5 = vpop.permute.xlu1 %1041 }
 0x1c0   : > { %v3193_v61 = vsel %vm1068_vm11, 1.0, %v3782_v35  ;;  %vm1070_vm14 = vcmp.eq.s32.totalorder %v3924_v24, %v4296_v59  ;;  %v1371_v4 = vadd.f32 %v3224_v1, %v1163_v18  ;;  %v1165_v17 = vadd.f32 %v3194_v53, %v3162_v11  ;;  %v4464_v18 = vld [vmem:[%s5462_s1 + $0x60] sm:$0xff] }
 0x1c1   : > { %vm1071_vm15 = vcmp.eq.s32.totalorder %v4032_v3, %v4296_v59  ;;  %vm862_vm1 = vcmp.eq.s32.totalorder %v3924_v24, %v4259_v58  ;;  %vm863_vm2 = vcmp.eq.s32.totalorder %v4032_v3, %v4259_v58  ;;  %v3161_v31 = vsel %vm860_vm12, 1.0, %v3782_v35 }
 0x1c2   : > { %1476 = vmatmul.mubr.f32.gmra.mrb[10].mxu1 %v1360_v0  ;;  %vm1276_vm3 = vcmp.eq.s32.totalorder %v3924_v24, %v4257_v54  ;;  %v3226_v19 = vsel %vm1277_vm13, 1.0, %v3782_v35  ;;  %v1370_v55 = vadd.f32 %v3223_v15, %v1162_v13  ;;  %v1164_v51 = vadd.f32 %v3193_v61, %v3161_v31 }
 0x1c3   : > { %1480 = vmatprep.mubr.f32.mxu1 %v1363_v22  ;;  %v3195_v2 = vsel %vm1070_vm14, 1.0, %v3782_v35  ;;  %vm1279_vm4 = vcmp.eq.s32.totalorder %v4032_v3, %v4298_v9  ;;  %vm1073_vm5 = vcmp.eq.s32.totalorder %v4032_v3, %v4333_v44  ;;  %v3196_v58 = vsel %vm1071_vm15, 1.0, %v3782_v35  ;;  %v837_v27 = vpop.permute.xlu1 %836 }
 0x1c4   : > { %v3163_v0 = vsel %vm862_vm1, 1.0, %v3782_v35  ;;  %v3164_v56 = vsel %vm863_vm2, 1.0, %v3782_v35  ;;  %vm1278_vm6 = vcmp.eq.s32.totalorder %v3924_v24, %v4298_v9  ;;  %vm865_vm7 = vcmp.eq.s32.totalorder %v4032_v3, %v4331_v36 }
 0x1c5   : > { %vm1072_vm8 = vcmp.eq.s32.totalorder %v3924_v24, %v4333_v44  ;;  %v1373_v57 = vadd.f32 %v3226_v19, %v1165_v17  ;;  %v3225_v59 = vsel %vm1276_vm3, 1.0, %v3782_v35  ;;  %v3228_v25 = vsel %vm1279_vm4, 1.0, %v3782_v35 }
 0x1c6   : > { %1481 = vmatmul.mubr.f32.gmra.mrb[12].mxu1 %v1362_v12  ;;  %v3198_v14 = vsel %vm1073_vm5, 1.0, %v3782_v35  ;;  %v1166_v22 = vadd.f32 %v3195_v2, %v3163_v0  ;;  %v1167_v21 = vadd.f32 %v3196_v58, %v3164_v56  ;;  %vm864_vm9 = vcmp.eq.s32.totalorder %v3924_v24, %v4331_v36 }
 0x1c7   : > { %1485 = vmatprep.mubr.f32.mxu1 %v1365_v34  ;;  %v3227_v9 = vsel %vm1278_vm6, 1.0, %v3782_v35  ;;  %v3166_v23 = vsel %vm865_vm7, 1.0, %v3782_v35  ;;  %vm1281_vm10 = vcmp.eq.s32.totalorder %v4032_v3, %v4362_v45  ;;  %v3197_v54 = vsel %vm1072_vm8, 1.0, %v3782_v35  ;;  %v1253_v38 = vpop.permute.xlu1 %1252 }
 0x1c8   : > { %v1372_v29 = vadd.f32 %v3225_v59, %v1164_v51  ;;  %v1169_v10 = vadd.f32 %v3198_v14, %v3166_v23  ;;  %vm1075_vm11 = vcmp.eq.s32.totalorder %v4032_v3, %v1042_v5  ;;  %vm867_vm12 = vcmp.eq.s32.totalorder %v4032_v3, %v4364_v60 }
 0x1c9   : > { %v1375_v12 = vadd.f32 %v3228_v25, %v1167_v21  ;;  %v3165_v26 = vsel %vm864_vm9, 1.0, %v3782_v35  ;;  %vm1280_vm13 = vcmp.eq.s32.totalorder %v3924_v24, %v4362_v45  ;;  %v1374_v33 = vadd.f32 %v3227_v9, %v1166_v22 }
 0x1ca   : > { %1486 = vmatmul.mubr.f32.gmra.mrb[14].mxu1 %v1364_v37  ;;  %v3230_v34 = vsel %vm1281_vm10, 1.0, %v3782_v35  ;;  %v1168_v42 = vadd.f32 %v3197_v54, %v3165_v26  ;;  %vm1283_vm14 = vcmp.eq.s32.totalorder %v4032_v3, %v4395_v8  ;;  %vm1077_vm15 = vcmp.eq.s32.totalorder %v4032_v3, %v1045_v32 }
 0x1cb   : > { %1490 = vmatprep.mubr.f32.mxu1 %v1367_v48  ;;  %vm1074_vm1 = vcmp.eq.s32.totalorder %v3924_v24, %v1042_v5  ;;  %v3200_v41 = vsel %vm1075_vm11, 1.0, %v3782_v35  ;;  %vm866_vm2 = vcmp.eq.s32.totalorder %v3924_v24, %v4364_v60  ;;  %v3168_v30 = vsel %vm867_vm12, 1.0, %v3782_v35 }
 0x1cc   : > { %vm869_vm3 = vcmp.eq.s32.totalorder %v4032_v3, %v837_v27  ;;  %vm1282_vm4 = vcmp.eq.s32.totalorder %v3924_v24, %v4395_v8  ;;  %v1377_v36 = vadd.f32 %v3230_v34, %v1169_v10  ;;  %v3232_v44 = vsel %vm1283_vm14, 1.0, %v3782_v35 }
 0x1cd   : > { %vm1076_vm5 = vcmp.eq.s32.totalorder %v3924_v24, %v1045_v32  ;;  %v3202_v6 = vsel %vm1077_vm15, 1.0, %v3782_v35  ;;  %v3229_v37 = vsel %vm1280_vm13, 1.0, %v3782_v35  ;;  %v3199_v28 = vsel %vm1074_vm1, 1.0, %v3782_v35 }
 0x1ce   : > { %1491 = vmatmul.mubr.f32.gmra.mrb[16].mxu1 %v1366_v63  ;;  %v3167_v7 = vsel %vm866_vm2, 1.0, %v3782_v35  ;;  %v1171_v47 = vadd.f32 %v3200_v41, %v3168_v30  ;;  %vm868_vm6 = vcmp.eq.s32.totalorder %v3924_v24, %v837_v27  ;;  %v3170_v48 = vsel %vm869_vm3, 1.0, %v3782_v35 }
 0x1cf   : > { %1495 = vmatprep.mubr.f32.mxu1 %v1369_v50  ;;  %v3231_v46 = vsel %vm1282_vm4, 1.0, %v3782_v35  ;;  %v1376_v49 = vadd.f32 %v3229_v37, %v1168_v42  ;;  %vm1285_vm7 = vcmp.eq.s32.totalorder %v4032_v3, %v1253_v38  ;;  %v3201_v20 = vsel %vm1076_vm5, 1.0, %v3782_v35 }
 0x1d0   : > { %v1173_v62 = vadd.f32 %v3202_v6, %v3170_v48  ;;  %v1379_v16 = vadd.f32 %v3232_v44, %v1171_v47  ;;  %v1170_v39 = vadd.f32 %v3199_v28, %v3167_v7  ;;  %v3169_v45 = vsel %vm868_vm6, 1.0, %v3782_v35 }
 0x1d1   : > { %vm1284_vm8 = vcmp.eq.s32.totalorder %v3924_v24, %v1253_v38  ;;  %v3234_v60 = vsel %vm1285_vm7, 1.0, %v3782_v35  ;;  %v1172_v63 = vadd.f32 %v3201_v20, %v3169_v45  ;;  %v1384_v13 = vsub.s32 0, %v3867_v40 }
 0x1d2   : > { %1496 = vmatmul.mubr.f32.gmra.mrb[18].mxu1 %v1368_v43  ;;  %v1378_v1 = vadd.f32 %v3231_v46, %v1170_v39  ;;  %v1381_v50 = vadd.f32 %v3234_v60, %v1173_v62  ;;  %v3233_v52 = vsel %vm1284_vm8, 1.0, %v3782_v35  ;;  %vm1995_vm9 = vcmask 261120  }
 0x1d3   : > { %1500 = vmatprep.mubr.f32.mxu1 %v1371_v4  ;;  %v1380_v3 = vadd.f32 %v3233_v52, %v1172_v63  ;;  %v4467_v24 = vrot.slane %v4464_v18, %v1384_v13  ;;  %vm2978_vm10 = vcmask 588800  }
 0x1d6   : > { %1501 = vmatmul.mubr.f32.gmra.mrb[20].mxu1 %v1370_v55 }
 0x1d7   : > { %1505 = vmatprep.mubr.f32.mxu1 %v1373_v57 }
 0x1da   : > { %1506 = vmatmul.mubr.f32.gmra.mrb[22].mxu1 %v1372_v29 }
 0x1db   : > { %1510 = vmatprep.mubr.f32.mxu1 %v1375_v12 }
 0x1de   : > { %1511 = vmatmul.mubr.f32.gmra.mrb[24].mxu1 %v1374_v33 }
 0x1df   : > { %1515 = vmatprep.mubr.f32.mxu1 %v1377_v36 }
 0x1e2   : > { %1516 = vmatmul.mubr.f32.gmra.mrb[26].mxu1 %v1376_v49 }
 0x1e3   : > { %1520 = vmatprep.mubr.f32.mxu1 %v1379_v16 }
 0x1e6   : > { %1521 = vmatmul.mubr.f32.gmra.mrb[28].mxu1 %v1378_v1 }
 0x1e7   : > { %1525 = vmatprep.mubr.f32.mxu1 %v1381_v50 }
 0x1ea   : > { %1526 = vmatmul.mubr.f32.gmra.mrb[30].mxu1 %v1380_v3 }
 0x281   : > { %v3341_v53 = vpop.f32.mrb[0].mxu1 }
 0x282   : > { %v3342_v15 = vpop.f32.mrb[1].mxu1 }
 0x283   : > { %v3343_v43 = vadd.f32 %v3342_v15, %v3341_v53 }
 0x285   : > { %v4470_v11 = vadd.f32 %v3343_v43, %v4467_v24  ;;  %v3344_v35 = vpop.f32.mrb[2].mxu1 }
 0x286   : > { %v3345_v61 = vpop.f32.mrb[3].mxu1 }
 0x287   : > { %3580 = vtanh.f32 %v4470_v11  ;;  %v3346_v4 = vadd.f32 %v3345_v61, %v3344_v35 }
 0x289   : > { %v4474_v17 = vadd.f32 %v3346_v4, %v4467_v24  ;;  %v3347_v31 = vpop.f32.mrb[4].mxu1 }
 0x28a   : > { %v3348_v19 = vpop.f32.mrb[5].mxu1 }
 0x28b   : > { %3582 = vtanh.f32 %v4474_v17  ;;  %v3349_v5 = vadd.f32 %v3348_v19, %v3347_v31 }
 0x28d   : > { %v4478_v8 = vadd.f32 %v3349_v5, %v4467_v24  ;;  %v3350_v55 = vpop.f32.mrb[6].mxu1 }
 0x28e   : > { %v3351_v51 = vpop.f32.mrb[7].mxu1 }
 0x28f   : > { %3584 = vtanh.f32 %v4478_v8  ;;  %v3352_v2 = vadd.f32 %v3351_v51, %v3350_v55 }
 0x291   : > { %v3581_v58 = vpop.eup %3580  ;;  %v4482_v0 = vadd.f32 %v3352_v2, %v4467_v24  ;;  %v3353_v56 = vpop.f32.mrb[8].mxu1 }
 0x292   : > { %1659 = vrot.lane.b32.xlu0 %v3581_v58, %s3783_s6  ;;  %v3354_v57 = vpop.f32.mrb[9].mxu1 }
 0x293   : > { %3586 = vtanh.f32 %v4482_v0  ;;  %v3355_v59 = vadd.f32 %v3354_v57, %v3353_v56 }
 0x295   : > { %v3583_v25 = vpop.eup %3582  ;;  %v4487_v14 = vadd.f32 %v3355_v59, %v4467_v24  ;;  %v3356_v22 = vpop.f32.mrb[10].mxu1 }
 0x296   : > { %1661 = vrot.lane.b32.xlu1 %v3583_v25, %s3783_s6  ;;  %v3357_v21 = vpop.f32.mrb[11].mxu1 }
 0x297   : > { %3588 = vtanh.f32 %v4487_v14  ;;  %v3358_v9 = vadd.f32 %v3357_v21, %v3356_v22 }
 0x299   : > { %v3585_v23 = vpop.eup %3584  ;;  %v4492_v54 = vadd.f32 %v3358_v9, %v4467_v24  ;;  %v3359_v27 = vpop.f32.mrb[12].mxu1  ;;  %v3235_v9 = vmul.f32 -1.442695, %v4470_v11 }
 0x29a   : > { %1663 = vrot.lane.b32.xlu0 %v3585_v23, %s3783_s6  ;;  %v3360_v32 = vpop.f32.mrb[13].mxu1  ;;  %v3236_v23 = vmul.f32 -1.442695, %v4474_v17 }
 0x29b   : > { %3590 = vtanh.f32 %v4492_v54  ;;  %v3361_v29 = vadd.f32 %v3360_v32, %v3359_v27  ;;  %v3238_v27 = vmul.f32 -1.442695, %v4482_v0 }
 0x29d   : > { %v3587_v10 = vpop.eup %3586  ;;  %v4497_v12 = vadd.f32 %v3361_v29, %v4467_v24  ;;  %v3362_v26 = vpop.f32.mrb[14].mxu1  ;;  %v3239_v29 = vmul.f32 -1.442695, %v4487_v14 }
 0x29e   : > { %1665 = vrot.lane.b32.xlu1 %v3587_v10, %s3783_s6  ;;  %v3363_v33 = vpop.f32.mrb[15].mxu1 }
 0x29f   : > { %3592 = vtanh.f32 %v4497_v12  ;;  %v3364_v34 = vadd.f32 %v3363_v33, %v3362_v26  ;;  %v3240_v33 = vmul.f32 -1.442695, %v4492_v54  ;;  %v3241_v17 = vmul.f32 -1.442695, %v4497_v12 }
 0x2a1   : > { %v3589_v42 = vpop.eup %3588  ;;  %v4502_v41 = vadd.f32 %v3364_v34, %v4467_v24  ;;  %v3365_v30 = vpop.f32.mrb[16].mxu1 }
 0x2a2   : > { %1667 = vrot.lane.b32.xlu0 %v3589_v42, %s3783_s6  ;;  %v3366_v36 = vpop.f32.mrb[17].mxu1 }
 0x2a3   : > { %3594 = vtanh.f32 %v4502_v41  ;;  %v3367_v44 = vadd.f32 %v3366_v36, %v3365_v30  ;;  %v3242_v0 = vmul.f32 -1.442695, %v4502_v41 }
 0x2a5   : > { %v3591_v38 = vpop.eup %3590  ;;  %v4507_v6 = vadd.f32 %v3367_v44, %v4467_v24  ;;  %v3368_v37 = vpop.f32.mrb[18].mxu1 }
 0x2a6   : > { %1669 = vrot.lane.b32.xlu1 %v3591_v38, %s3783_s6  ;;  %v3369_v28 = vpop.f32.mrb[19].mxu1 }
 0x2a7   : > { %3596 = vtanh.f32 %v4507_v6  ;;  %v3370_v7 = vadd.f32 %v3369_v28, %v3368_v37  ;;  %v3243_v54 = vmul.f32 -1.442695, %v4507_v6 }
 0x2a9   : > { %v3593_v47 = vpop.eup %3592  ;;  %v4512_v48 = vadd.f32 %v3370_v7, %v4467_v24  ;;  %v3371_v46 = vpop.f32.mrb[20].mxu1 }
 0x2aa   : > { %1671 = vrot.lane.b32.xlu0 %v3593_v47, %s3783_s6  ;;  %v3372_v49 = vpop.f32.mrb[21].mxu1 }
 0x2ab   : > { %3598 = vtanh.f32 %v4512_v48  ;;  %v3373_v20 = vadd.f32 %v3372_v49, %v3371_v46  ;;  %v3244_v7 = vmul.f32 -1.442695, %v4512_v48 }
 0x2ad   : > { %v3595_v62 = vpop.eup %3594  ;;  %v4517_v16 = vadd.f32 %v3373_v20, %v4467_v24  ;;  %v3374_v39 = vpop.f32.mrb[22].mxu1 }
 0x2ae   : > { %1673 = vrot.lane.b32.xlu1 %v3595_v62, %s3783_s6  ;;  %v3375_v45 = vpop.f32.mrb[23].mxu1 }
 0x2af   : > { %3600 = vtanh.f32 %v4517_v16  ;;  %v3376_v60 = vadd.f32 %v3375_v45, %v3374_v39  ;;  %v3245_v62 = vmul.f32 -1.442695, %v4517_v16 }
 0x2b1   : > { %v3597_v63 = vpop.eup %3596  ;;  %v4522_v1 = vadd.f32 %v3376_v60, %v4467_v24  ;;  %v3377_v50 = vpop.f32.mrb[24].mxu1 }
 0x2b2   : > { %1675 = vrot.lane.b32.xlu0 %v3597_v63, %s3783_s6  ;;  %v3378_v52 = vpop.f32.mrb[25].mxu1 }
 0x2b3   : > { %3602 = vtanh.f32 %v4522_v1  ;;  %v3379_v3 = vadd.f32 %v3378_v52, %v3377_v50  ;;  %v3246_v52 = vmul.f32 -1.442695, %v4522_v1 }
 0x2b5   : > { %v3599_v13 = vpop.eup %3598  ;;  %v4527_v53 = vadd.f32 %v3379_v3, %v4467_v24  ;;  %v3380_v15 = vpop.f32.mrb[26].mxu1 }
 0x2b6   : > { %1677 = vrot.lane.b32.xlu0 %v3599_v13, %s3783_s6  ;;  %v3381_v43 = vpop.f32.mrb[27].mxu1 }
 0x2b7   : > { %3604 = vtanh.f32 %v4527_v53  ;;  %v3382_v35 = vadd.f32 %v3381_v43, %v3380_v15 }
 0x2b9   : > { %v3601_v61 = vpop.eup %3600  ;;  %v4532_v4 = vadd.f32 %v3382_v35, %v4467_v24  ;;  %v3383_v31 = vpop.f32.mrb[28].mxu1 }
 0x2ba   : > { %1679 = vrot.lane.b32.xlu0 %v3601_v61, %s3783_s6  ;;  %v3384_v19 = vpop.f32.mrb[29].mxu1  ;;  %v3247_v61 = vmul.f32 -1.442695, %v4527_v53 }
 0x2bb   : > { %3606 = vtanh.f32 %v4532_v4  ;;  %v3385_v5 = vadd.f32 %v3384_v19, %v3383_v31 }
 0x2bd   : > { %v3603_v55 = vpop.eup %3602  ;;  %v4537_v51 = vadd.f32 %v3385_v5, %v4467_v24  ;;  %v3386_v2 = vpop.f32.mrb[30].mxu1 }
 0x2be   : > { %1681 = vrot.lane.b32.xlu0 %v3603_v55, %s3783_s6  ;;  %v3387_v58 = vpop.f32.mrb[31].mxu1 }
 0x2bf   : > { %3608 = vtanh.f32 %v4537_v51  ;;  %v3388_v56 = vadd.f32 %v3387_v58, %v3386_v2  ;;  %v3248_v58 = vmul.f32 -1.442695, %v4532_v4 }
 0x2c1   : > { %v3605_v57 = vpop.eup %3604  ;;  %v4542_v59 = vadd.f32 %v3388_v56, %v4467_v24  ;;  %v3237_v24 = vmul.f32 -1.442695, %v4478_v8 }
 0x2c2   : > { %1683 = vrot.lane.b32.xlu1 %v3605_v57, %s3783_s6 }
 0x2c3   : > { %3610 = vtanh.f32 %v4542_v59 }
 0x2c4   : > { %3612 = vpow2.f32 %v3235_v9  ;;  %v3249_v9 = vmul.f32 -1.442695, %v4537_v51 }
 0x2c5   : > { %v3607_v25 = vpop.eup %3606  ;;  %3614 = vpow2.f32 %v3236_v23 }
 0x2c6   : > { %1685 = vrot.lane.b32.xlu1 %v3607_v25, %s3783_s6  ;;  %3616 = vpow2.f32 %v3237_v24 }
 0x2c7   : > { %3618 = vpow2.f32 %v3238_v27 }
 0x2c8   : > { %3620 = vpow2.f32 %v3239_v29 }
 0x2c9   : > { %v3609_v22 = vpop.eup %3608 }
 0x2ca   : > { %1687 = vrot.lane.b32.xlu1 %v3609_v22, %s3783_s6 }
 0x2cd   : > { %v3611_v21 = vpop.eup %3610 }
 0x2ce   : > { %1689 = vrot.lane.b32.xlu1 %v3611_v21, %s3783_s6  ;;  %v3613_v32 = vpop.eup %3612 }
 0x2cf   : > { %v1579_v10 = vadd.f32 1.0, %v3613_v32  ;;  %v3615_v26 = vpop.eup %3614 }
 0x2d0   : > { %v1580_v11 = vadd.f32 1.0, %v3615_v26  ;;  %v3617_v34 = vpop.eup %3616 }
 0x2d1   : > { %3622 = vrcp.f32 %v1579_v10  ;;  %v1581_v8 = vadd.f32 1.0, %v3617_v34  ;;  %v3619_v42 = vpop.eup %3618  ;;  %v3250_v10 = vmul.f32 -1.442695, %v4542_v59 }
 0x2d2   : > { %3624 = vpow2.f32 %v3240_v33  ;;  %v1582_v30 = vadd.f32 1.0, %v3619_v42  ;;  %v3621_v14 = vpop.eup %3620 }
 0x2d3   : > { %3626 = vrcp.f32 %v1580_v11  ;;  %v1583_v12 = vadd.f32 1.0, %v3621_v14 }
 0x2d4   : > { %3628 = vpow2.f32 %v3241_v17 }
 0x2d5   : > { %3630 = vrcp.f32 %v1581_v8 }
 0x2d6   : > { %3632 = vpow2.f32 %v3242_v0 }
 0x2d7   : > { %3634 = vrcp.f32 %v1582_v30 }
 0x2db   : > { %v4557_v36 = vpop.eup %3622 }
 0x2dc   : > { %v3625_v37 = vpop.eup %3624 }
 0x2dd   : > { %v4564_v28 = vpop.eup %3626  ;;  %v1584_v46 = vadd.f32 1.0, %v3625_v37 }
 0x2de   : > { %v3629_v6 = vpop.eup %3628 }
 0x2df   : > { %v4571_v49 = vpop.eup %3630  ;;  %v1585_v45 = vadd.f32 1.0, %v3629_v6 }
 0x2e0   : > { %v3633_v48 = vpop.eup %3632 }
 0x2e1   : > { %v4578_v60 = vpop.eup %3634  ;;  %v1586_v16 = vadd.f32 1.0, %v3633_v48 }
 0x304   : > { %v1660_v44 = vpop.permute.xlu0 %1659 }
 0x305   : > { %v4561_v38 = vmul.f32 %v4557_v36, %v1660_v44 }
 0x307   : > { %3636 = vtanh.f32 %v4561_v38 }
 0x308   : > { %v1662_v41 = vpop.permute.xlu1 %1661  ;;  %3638 = vpow2.f32 %v3243_v54 }
 0x309   : > { %v4568_v47 = vmul.f32 %v4564_v28, %v1662_v41  ;;  %3640 = vrcp.f32 %v1583_v12 }
 0x30b   : > { %3642 = vtanh.f32 %v4568_v47 }
 0x30c   : > { %v1664_v20 = vpop.permute.xlu0 %1663  ;;  %3644 = vpow2.f32 %v3244_v7 }
 0x30d   : > { %v4575_v39 = vmul.f32 %v4571_v49, %v1664_v20  ;;  %3646 = vrcp.f32 %v1584_v46 }
 0x30f   : > { %3648 = vtanh.f32 %v4575_v39 }
 0x310   : > { %v1666_v63 = vpop.permute.xlu1 %1665  ;;  %3650 = vpow2.f32 %v3245_v62 }
 0x311   : > { %v3637_v50 = vpop.eup %3636  ;;  %v4582_v3 = vmul.f32 %v4578_v60, %v1666_v63  ;;  %3652 = vrcp.f32 %v1585_v45 }
 0x312   : > { %1755 = vrot.lane.b32.xlu0 %v3637_v50, %s3784_s7  ;;  %v3639_v13 = vpop.eup %3638 }
 0x313   : > { %3654 = vtanh.f32 %v4582_v3  ;;  %v4586_v15 = vpop.eup %3640  ;;  %v1587_v31 = vadd.f32 1.0, %v3639_v13 }
 0x314   : > { %v1668_v43 = vpop.permute.xlu0 %1667  ;;  %3656 = vpow2.f32 %v3246_v52 }
 0x315   : > { %v3643_v35 = vpop.eup %3642  ;;  %v4590_v1 = vmul.f32 %v4586_v15, %v1668_v43  ;;  %3658 = vrcp.f32 %v1586_v16 }
 0x316   : > { %1757 = vrot.lane.b32.xlu1 %v3643_v35, %s3784_s7  ;;  %v3645_v19 = vpop.eup %3644 }
 0x317   : > { %3660 = vtanh.f32 %v4590_v1  ;;  %v4594_v5 = vpop.eup %3646  ;;  %v1588_v53 = vadd.f32 1.0, %v3645_v19 }
 0x318   : > { %v1670_v55 = vpop.permute.xlu1 %1669  ;;  %3662 = vpow2.f32 %v3247_v61 }
 0x319   : > { %v3649_v2 = vpop.eup %3648  ;;  %v4598_v56 = vmul.f32 %v4594_v5, %v1670_v55  ;;  %3664 = vrcp.f32 %v1587_v31 }
 0x31a   : > { %1759 = vrot.lane.b32.xlu0 %v3649_v2, %s3784_s7  ;;  %v3651_v57 = vpop.eup %3650 }
 0x31b   : > { %3666 = vtanh.f32 %v4598_v56  ;;  %v4602_v25 = vpop.eup %3652  ;;  %v1589_v4 = vadd.f32 1.0, %v3651_v57 }
 0x31c   : > { %v1672_v22 = vpop.permute.xlu0 %1671  ;;  %3668 = vpow2.f32 %v3248_v58 }
 0x31d   : > { %v3655_v21 = vpop.eup %3654  ;;  %v4606_v23 = vmul.f32 %v4602_v25, %v1672_v22  ;;  %3670 = vrcp.f32 %v1588_v53 }
 0x31e   : > { %1761 = vrot.lane.b32.xlu1 %v3655_v21, %s3784_s7  ;;  %v3657_v24 = vpop.eup %3656 }
 0x31f   : > { %3672 = vtanh.f32 %v4606_v23  ;;  %v4610_v27 = vpop.eup %3658  ;;  %v1590_v51 = vadd.f32 1.0, %v3657_v24 }
 0x320   : > { %v1674_v32 = vpop.permute.xlu1 %1673  ;;  %3674 = vpow2.f32 %v3249_v9 }
 0x321   : > { %v3661_v29 = vpop.eup %3660  ;;  %v4614_v26 = vmul.f32 %v4610_v27, %v1674_v32  ;;  %3676 = vrcp.f32 %v1589_v4 }
 0x322   : > { %1763 = vrot.lane.b32.xlu0 %v3661_v29, %s3784_s7  ;;  %v3663_v33 = vpop.eup %3662 }
 0x323   : > { %3678 = vtanh.f32 %v4614_v26  ;;  %v4618_v11 = vpop.eup %3664  ;;  %v1591_v59 = vadd.f32 1.0, %v3663_v33 }
 0x324   : > { %v1676_v34 = vpop.permute.xlu0 %1675  ;;  %3680 = vpow2.f32 %v3250_v10 }
 0x325   : > { %v3667_v17 = vpop.eup %3666  ;;  %v4621_v8 = vmul.f32 %v4618_v11, %v1676_v34  ;;  %3682 = vrcp.f32 %v1590_v51 }
 0x326   : > { %1765 = vrot.lane.b32.xlu1 %v3667_v17, %s3784_s7  ;;  %v3669_v42 = vpop.eup %3668 }
 0x327   : > { %3684 = vtanh.f32 %v4621_v8  ;;  %v4625_v0 = vpop.eup %3670  ;;  %v1592_v54 = vadd.f32 1.0, %v3669_v42 }
 0x328   : > { %v1678_v30 = vpop.permute.xlu0 %1677  ;;  %3686 = vrcp.f32 %v1591_v59 }
 0x329   : > { %v3673_v14 = vpop.eup %3672  ;;  %v4628_v44 = vmul.f32 %v4625_v0, %v1678_v30 }
 0x32a   : > { %1767 = vrot.lane.b32.xlu0 %v3673_v14, %s3784_s7  ;;  %v3675_v12 = vpop.eup %3674 }
 0x32b   : > { %3688 = vtanh.f32 %v4628_v44  ;;  %v4632_v37 = vpop.eup %3676  ;;  %v1593_v6 = vadd.f32 1.0, %v3675_v12 }
 0x32c   : > { %v1680_v41 = vpop.permute.xlu0 %1679  ;;  %3690 = vrcp.f32 %v1592_v54 }
 0x32d   : > { %v3679_v7 = vpop.eup %3678  ;;  %v4635_v46 = vmul.f32 %v4632_v37, %v1680_v41 }
 0x32e   : > { %1769 = vrot.lane.b32.xlu1 %v3679_v7, %s3784_s7  ;;  %v3681_v20 = vpop.eup %3680 }
 0x32f   : > { %3692 = vtanh.f32 %v4635_v46  ;;  %v4639_v62 = vpop.eup %3682  ;;  %v1594_v50 = vadd.f32 1.0, %v3681_v20 }
 0x330   : > { %v1682_v45 = vpop.permute.xlu0 %1681  ;;  %3694 = vrcp.f32 %v1593_v6 }
 0x331   : > { %v3685_v48 = vpop.eup %3684  ;;  %v4642_v63 = vmul.f32 %v4639_v62, %v1682_v45 }
 0x332   : > { %1771 = vrot.lane.b32.xlu0 %v3685_v48, %s3784_s7  ;;  %v4646_v52 = vpop.eup %3686 }
 0x333   : > { %3696 = vtanh.f32 %v4642_v63 }
 0x334   : > { %v1684_v16 = vpop.permute.xlu1 %1683  ;;  %3698 = vrcp.f32 %v1594_v50 }
 0x335   : > { %v3689_v13 = vpop.eup %3688  ;;  %v4649_v43 = vmul.f32 %v4646_v52, %v1684_v16 }
 0x336   : > { %1773 = vrot.lane.b32.xlu0 %v3689_v13, %s3784_s7  ;;  %v4653_v35 = vpop.eup %3690 }
 0x337   : > { %3700 = vtanh.f32 %v4649_v43 }
 0x338   : > { %v1686_v61 = vpop.permute.xlu1 %1685 }
 0x339   : > { %v3693_v31 = vpop.eup %3692  ;;  %v4656_v19 = vmul.f32 %v4653_v35, %v1686_v61 }
 0x33a   : > { %1775 = vrot.lane.b32.xlu0 %v3693_v31, %s3784_s7  ;;  %v3695_v55 = vpop.eup %3694 }
 0x33b   : > { %3702 = vtanh.f32 %v4656_v19 }
 0x33c   : > { %v1688_v2 = vpop.permute.xlu1 %1687 }
 0x33d   : > { %v3697_v58 = vpop.eup %3696  ;;  %v4660_v53 = vmul.f32 %v3695_v55, %v1688_v2 }
 0x33e   : > { %1777 = vrot.lane.b32.xlu0 %v3697_v58, %s3784_s7  ;;  %v3699_v57 = vpop.eup %3698 }
 0x33f   : > { %3704 = vtanh.f32 %v4660_v53 }
 0x340   : > { %v1690_v22 = vpop.permute.xlu1 %1689 }
 0x341   : > { %v3701_v21 = vpop.eup %3700  ;;  %v4664_v9 = vmul.f32 %v3699_v57, %v1690_v22 }
 0x342   : > { %1779 = vrot.lane.b32.xlu1 %v3701_v21, %s3784_s7 }
 0x343   : > { %3706 = vtanh.f32 %v4664_v9 }
 0x345   : > { %v3703_v4 = vpop.eup %3702 }
 0x346   : > { %1781 = vrot.lane.b32.xlu1 %v3703_v4, %s3784_s7 }
 0x349   : > { %v3705_v24 = vpop.eup %3704 }
 0x34a   : > { %1783 = vrot.lane.b32.xlu1 %v3705_v24, %s3784_s7 }
 0x34d   : > { %v3707_v32 = vpop.eup %3706 }
 0x34e   : > { %1785 = vrot.lane.b32.xlu1 %v3707_v32, %s3784_s7 }
 0x384   : > { %v1756_v29 = vpop.permute.xlu0 %1755 }
 0x385   : > { %v4672_v10 = vmul.f32 %v4557_v36, %v1756_v29 }
 0x387   : > { %1899 = vrot.lane.b32.xlu0 %v4672_v10, %s3785_s8 }
 0x388   : > { %v1758_v51 = vpop.permute.xlu1 %1757 }
 0x389   : > { %v4677_v33 = vmul.f32 %v4564_v28, %v1758_v51 }
 0x38b   : > { %1901 = vrot.lane.b32.xlu1 %v4677_v33, %s3785_s8 }
 0x38c   : > { %v1760_v34 = vpop.permute.xlu0 %1759 }
 0x38d   : > { %v4682_v17 = vmul.f32 %v4571_v49, %v1760_v34 }
 0x38f   : > { %1903 = vrot.lane.b32.xlu0 %v4682_v17, %s3785_s8 }
 0x390   : > { %v1762_v36 = vpop.permute.xlu1 %1761 }
 0x391   : > { %v4687_v59 = vmul.f32 %v4578_v60, %v1762_v36 }
 0x393   : > { %1905 = vrot.lane.b32.xlu1 %v4687_v59, %s3785_s8 }
 0x394   : > { %v1764_v42 = vpop.permute.xlu0 %1763 }
 0x395   : > { %v4692_v28 = vmul.f32 %v4586_v15, %v1764_v42 }
 0x397   : > { %1907 = vrot.lane.b32.xlu0 %v4692_v28, %s3785_s8 }
 0x398   : > { %v1766_v30 = vpop.permute.xlu1 %1765 }
 0x399   : > { %v4697_v49 = vmul.f32 %v4594_v5, %v1766_v30 }
 0x39b   : > { %1909 = vrot.lane.b32.xlu1 %v4697_v49, %s3785_s8 }
 0x39c   : > { %v1768_v14 = vpop.permute.xlu0 %1767 }
 0x39d   : > { %v4702_v60 = vmul.f32 %v4602_v25, %v1768_v14 }
 0x39f   : > { %1911 = vrot.lane.b32.xlu0 %v4702_v60, %s3785_s8 }
 0x3a0   : > { %v1770_v54 = vpop.permute.xlu1 %1769 }
 0x3a1   : > { %v4707_v15 = vmul.f32 %v4610_v27, %v1770_v54 }
 0x3a3   : > { %1913 = vrot.lane.b32.xlu1 %v4707_v15, %s3785_s8 }
 0x3a4   : > { %v1772_v12 = vpop.permute.xlu0 %1771 }
 0x3a5   : > { %v4712_v5 = vmul.f32 %v4618_v11, %v1772_v12 }
 0x3a7   : > { %1915 = vrot.lane.b32.xlu0 %v4712_v5, %s3785_s8 }
 0x3a8   : > { %v1774_v41 = vpop.permute.xlu0 %1773 }
 0x3a9   : > { %v4717_v25 = vmul.f32 %v4625_v0, %v1774_v41 }
 0x3ab   : > { %1917 = vrot.lane.b32.xlu0 %v4717_v25, %s3785_s8 }
 0x3ac   : > { %v1776_v7 = vpop.permute.xlu0 %1775 }
 0x3ad   : > { %v4722_v27 = vmul.f32 %v4632_v37, %v1776_v7 }
 0x3af   : > { %1919 = vrot.lane.b32.xlu0 %v4722_v27, %s3785_s8 }
 0x3b0   : > { %v1778_v6 = vpop.permute.xlu0 %1777 }
 0x3b1   : > { %v4727_v11 = vmul.f32 %v4639_v62, %v1778_v6 }
 0x3b3   : > { %1921 = vrot.lane.b32.xlu0 %v4727_v11, %s3785_s8 }
 0x3b4   : > { %v1780_v20 = vpop.permute.xlu1 %1779 }
 0x3b5   : > { %v4732_v0 = vmul.f32 %v4646_v52, %v1780_v20 }
 0x3b7   : > { %1923 = vrot.lane.b32.xlu1 %v4732_v0, %s3785_s8 }
 0x3b8   : > { %v1782_v45 = vpop.permute.xlu1 %1781 }
 0x3b9   : > { %v4737_v37 = vmul.f32 %v4653_v35, %v1782_v45 }
 0x3bb   : > { %1925 = vrot.lane.b32.xlu1 %v4737_v37, %s3785_s8 }
 0x3bc   : > { %v1784_v48 = vpop.permute.xlu1 %1783 }
 0x3bd   : > { %v4741_v62 = vmul.f32 %v3695_v55, %v1784_v48 }
 0x3bf   : > { %1927 = vrot.lane.b32.xlu1 %v4741_v62, %s3785_s8 }
 0x3c0   : > { %v1786_v50 = vpop.permute.xlu1 %1785 }
 0x3c1   : > { %v4745_v16 = vmul.f32 %v3699_v57, %v1786_v50 }
 0x3c3   : > { %1929 = vrot.lane.b32.xlu1 %v4745_v16, %s3785_s8 }
 0x3f9   : > { %v1900_v52 = vpop.permute.xlu0 %1899 }
 0x3fa   : > { %v1996_v13 = vsel %vm1995_vm9, %v1900_v52, 0.0 }
 0x3fb   : > { %1997 = vadd.xlane.f32.xlu0 %v1996_v13 }
 0x3fd   : > { %v1902_v35 = vpop.permute.xlu1 %1901 }
 0x3fe   : > { %v1999_v61 = vsel %vm1995_vm9, %v1902_v35, 0.0 }
 0x3ff   : > { %2000 = vadd.xlane.f32.xlu1 %v1999_v61 }
 0x401   : > { %v1904_v31 = vpop.permute.xlu0 %1903 }
 0x402   : > { %v2002_v55 = vsel %vm1995_vm9, %v1904_v31, 0.0 }
 0x403   : > { %2003 = vadd.xlane.f32.xlu0 %v2002_v55 }
 0x405   : > { %v1906_v2 = vpop.permute.xlu1 %1905 }
 0x406   : > { %v2005_v58 = vsel %vm1995_vm9, %v1906_v2, 0.0 }
 0x407   : > { %2006 = vadd.xlane.f32.xlu0 %v2005_v58 }
 0x409   : > { %v1908_v57 = vpop.permute.xlu0 %1907 }
 0x40a   : > { %v2008_v22 = vsel %vm1995_vm9, %v1908_v57, 0.0 }
 0x40b   : > { %2009 = vadd.xlane.f32.xlu1 %v2008_v22 }
 0x40d   : > { %v1910_v21 = vpop.permute.xlu1 %1909 }
 0x40e   : > { %v2011_v4 = vsel %vm1995_vm9, %v1910_v21, 0.0 }
 0x40f   : > { %2012 = vadd.xlane.f32.xlu0 %v2011_v4 }
 0x411   : > { %v1912_v24 = vpop.permute.xlu0 %1911 }
 0x412   : > { %v2014_v32 = vsel %vm1995_vm9, %v1912_v24, 0.0 }
 0x413   : > { %2015 = vadd.xlane.f32.xlu1 %v2014_v32 }
 0x415   : > { %v1914_v29 = vpop.permute.xlu1 %1913 }
 0x416   : > { %v2017_v51 = vsel %vm1995_vm9, %v1914_v29, 0.0 }
 0x417   : > { %2018 = vadd.xlane.f32.xlu0 %v2017_v51 }
 0x419   : > { %v1916_v34 = vpop.permute.xlu0 %1915 }
 0x41a   : > { %v2020_v36 = vsel %vm1995_vm9, %v1916_v34, 0.0 }
 0x41b   : > { %2021 = vadd.xlane.f32.xlu1 %v2020_v36 }
 0x41d   : > { %v1918_v42 = vpop.permute.xlu0 %1917 }
 0x41e   : > { %v2023_v30 = vsel %vm1995_vm9, %v1918_v42, 0.0 }
 0x41f   : > { %2024 = vadd.xlane.f32.xlu1 %v2023_v30 }
 0x421   : > { %v1920_v14 = vpop.permute.xlu0 %1919 }
 0x422   : > { %v2026_v54 = vsel %vm1995_vm9, %v1920_v14, 0.0 }
 0x423   : > { %2027 = vadd.xlane.f32.xlu1 %v2026_v54 }
 0x425   : > { %v1922_v12 = vpop.permute.xlu0 %1921 }
 0x426   : > { %v2029_v41 = vsel %vm1995_vm9, %v1922_v12, 0.0 }
 0x427   : > { %2030 = vadd.xlane.f32.xlu1 %v2029_v41 }
 0x429   : > { %v1924_v7 = vpop.permute.xlu1 %1923 }
 0x42a   : > { %v2032_v6 = vsel %vm1995_vm9, %v1924_v7, 0.0 }
 0x42b   : > { %2033 = vadd.xlane.f32.xlu0 %v2032_v6 }
 0x42d   : > { %v1926_v20 = vpop.permute.xlu1 %1925 }
 0x42e   : > { %v2035_v45 = vsel %vm1995_vm9, %v1926_v20, 0.0 }
 0x42f   : > { %2036 = vadd.xlane.f32.xlu0 %v2035_v45 }
 0x431   : > { %v1928_v48 = vpop.permute.xlu1 %1927 }
 0x432   : > { %v2038_v50 = vsel %vm1995_vm9, %v1928_v48, 0.0 }
 0x433   : > { %2039 = vadd.xlane.f32.xlu0 %v2038_v50 }
 0x435   : > { %v1930_v52 = vpop.permute.xlu1 %1929 }
 0x436   : > { %v2041_v13 = vsel %vm1995_vm9, %v1930_v52, 0.0 }
 0x437   : > { %2042 = vadd.xlane.f32.xlu0 %v2041_v13 }
 0x488   : > { %v1998_v35 = vpop.xlane.xlu0 %1997 }
 0x489   : > { %v2093_v61 = vmul.f32 0.03125, %v1998_v35 }
 0x48b   : > { %v4766_v31 = vsub.f32 %v4672_v10, %v2093_v61 }
 0x48c   : > { %v2001_v55 = vpop.xlane.xlu1 %2000 }
 0x48d   : > { %v2157_v2 = vmul.f32 %v4766_v31, %v4766_v31  ;;  %v2094_v58 = vmul.f32 0.03125, %v2001_v55 }
 0x48f   : > { %v4771_v57 = vsub.f32 %v4677_v33, %v2094_v58  ;;  %2221 = vrot.lane.b32.xlu1 %v2157_v2, %s3785_s8 }
 0x490   : > { %v2004_v22 = vpop.xlane.xlu0 %2003 }
 0x491   : > { %v2158_v21 = vmul.f32 %v4771_v57, %v4771_v57  ;;  %v2095_v4 = vmul.f32 0.03125, %v2004_v22 }
 0x493   : > { %v4777_v24 = vsub.f32 %v4682_v17, %v2095_v4  ;;  %2223 = vrot.lane.b32.xlu0 %v2158_v21, %s3785_s8 }
 0x494   : > { %v2007_v10 = vpop.xlane.xlu0 %2006 }
 0x495   : > { %v2159_v32 = vmul.f32 %v4777_v24, %v4777_v24  ;;  %v2096_v29 = vmul.f32 0.03125, %v2007_v10 }
 0x497   : > { %v4783_v33 = vsub.f32 %v4687_v59, %v2096_v29  ;;  %2225 = vrot.lane.b32.xlu1 %v2159_v32, %s3785_s8 }
 0x498   : > { %v2010_v51 = vpop.xlane.xlu1 %2009 }
 0x499   : > { %v2160_v34 = vmul.f32 %v4783_v33, %v4783_v33  ;;  %v2097_v36 = vmul.f32 0.03125, %v2010_v51 }
 0x49b   : > { %v4789_v17 = vsub.f32 %v4692_v28, %v2097_v36  ;;  %2227 = vrot.lane.b32.xlu1 %v2160_v34, %s3785_s8 }
 0x49c   : > { %v2013_v42 = vpop.xlane.xlu0 %2012 }
 0x49d   : > { %v2161_v30 = vmul.f32 %v4789_v17, %v4789_v17  ;;  %v2098_v14 = vmul.f32 0.03125, %v2013_v42 }
 0x49f   : > { %v4795_v59 = vsub.f32 %v4697_v49, %v2098_v14  ;;  %2229 = vrot.lane.b32.xlu0 %v2161_v30, %s3785_s8 }
 0x4a0   : > { %v2016_v54 = vpop.xlane.xlu1 %2015 }
 0x4a1   : > { %v2162_v12 = vmul.f32 %v4795_v59, %v4795_v59  ;;  %v2099_v41 = vmul.f32 0.03125, %v2016_v54 }
 0x4a3   : > { %v4801_v28 = vsub.f32 %v4702_v60, %v2099_v41  ;;  %2231 = vrot.lane.b32.xlu1 %v2162_v12, %s3785_s8  ;;  %v2543_v41 = vsub.s32 1, %v3867_v40 }
 0x4a4   : > { %v2019_v7 = vpop.xlane.xlu0 %2018 }
 0x4a5   : > { %v2163_v6 = vmul.f32 %v4801_v28, %v4801_v28  ;;  %v2100_v20 = vmul.f32 0.03125, %v2019_v7 }
 0x4a7   : > { %v4807_v49 = vsub.f32 %v4707_v15, %v2100_v20  ;;  %2233 = vrot.lane.b32.xlu0 %v2163_v6, %s3785_s8 }
 0x4a8   : > { %v2022_v45 = vpop.xlane.xlu1 %2021 }
 0x4a9   : > { %v2164_v48 = vmul.f32 %v4807_v49, %v4807_v49  ;;  %v2101_v50 = vmul.f32 0.03125, %v2022_v45 }
 0x4ab   : > { %v4813_v60 = vsub.f32 %v4712_v5, %v2101_v50  ;;  %2235 = vrot.lane.b32.xlu1 %v2164_v48, %s3785_s8 }
 0x4ac   : > { %v2025_v52 = vpop.xlane.xlu1 %2024 }
 0x4ad   : > { %v2165_v13 = vmul.f32 %v4813_v60, %v4813_v60  ;;  %v2102_v35 = vmul.f32 0.03125, %v2025_v52 }
 0x4af   : > { %v4819_v15 = vsub.f32 %v4717_v25, %v2102_v35  ;;  %2237 = vrot.lane.b32.xlu0 %v2165_v13, %s3785_s8 }
 0x4b0   : > { %v2028_v61 = vpop.xlane.xlu1 %2027 }
 0x4b1   : > { %v2166_v55 = vmul.f32 %v4819_v15, %v4819_v15  ;;  %v2103_v2 = vmul.f32 0.03125, %v2028_v61 }
 0x4b3   : > { %v4825_v5 = vsub.f32 %v4722_v27, %v2103_v2  ;;  %2239 = vrot.lane.b32.xlu0 %v2166_v55, %s3785_s8 }
 0x4b4   : > { %v2031_v58 = vpop.xlane.xlu1 %2030 }
 0x4b5   : > { %v2167_v22 = vmul.f32 %v4825_v5, %v4825_v5  ;;  %v2104_v21 = vmul.f32 0.03125, %v2031_v58 }
 0x4b7   : > { %v4831_v25 = vsub.f32 %v4727_v11, %v2104_v21  ;;  %2241 = vrot.lane.b32.xlu0 %v2167_v22, %s3785_s8 }
 0x4b8   : > { %v2034_v4 = vpop.xlane.xlu0 %2033 }
 0x4b9   : > { %v2168_v10 = vmul.f32 %v4831_v25, %v4831_v25  ;;  %v2105_v32 = vmul.f32 0.03125, %v2034_v4 }
 0x4bb   : > { %v4837_v27 = vsub.f32 %v4732_v0, %v2105_v32  ;;  %2243 = vrot.lane.b32.xlu0 %v2168_v10, %s3785_s8 }
 0x4bc   : > { %v2037_v29 = vpop.xlane.xlu0 %2036 }
 0x4bd   : > { %v2169_v51 = vmul.f32 %v4837_v27, %v4837_v27  ;;  %v2106_v34 = vmul.f32 0.03125, %v2037_v29 }
 0x4bf   : > { %v4843_v11 = vsub.f32 %v4737_v37, %v2106_v34  ;;  %2245 = vrot.lane.b32.xlu1 %v2169_v51, %s3785_s8 }
 0x4c0   : > { %v2040_v36 = vpop.xlane.xlu0 %2039 }
 0x4c1   : > { %v2170_v42 = vmul.f32 %v4843_v11, %v4843_v11  ;;  %v2107_v30 = vmul.f32 0.03125, %v2040_v36 }
 0x4c3   : > { %v4849_v0 = vsub.f32 %v4741_v62, %v2107_v30  ;;  %2247 = vrot.lane.b32.xlu1 %v2170_v42, %s3785_s8  ;;  %v2544_v62 = vrot.slane %v4464_v18, %v2543_v41 }
 0x4c4   : > { %v2043_v14 = vpop.xlane.xlu0 %2042 }
 0x4c5   : > { %v2171_v54 = vmul.f32 %v4849_v0, %v4849_v0  ;;  %v2108_v12 = vmul.f32 0.03125, %v2043_v14 }
 0x4c7   : > { %v4855_v37 = vsub.f32 %v4745_v16, %v2108_v12  ;;  %2249 = vrot.lane.b32.xlu1 %v2171_v54, %s3785_s8 }
 0x4c9   : > { %v2172_v7 = vmul.f32 %v4855_v37, %v4855_v37 }
 0x4cb   : > { %2251 = vrot.lane.b32.xlu1 %v2172_v7, %s3785_s8 }
 0x4cf   : > { %2546 = vrot.lane.b32.xlu1 %v2544_v62, %s3784_s7 }
 0x501   : > { %v2222_v6 = vpop.permute.xlu1 %2221 }
 0x502   : > { %v2317_v20 = vsel %vm1995_vm9, %v2222_v6, 0.0 }
 0x503   : > { %2318 = vadd.xlane.f32.xlu0 %v2317_v20  ;;  %v2583_v20 = vsub.s32 2, %v3867_v40 }
 0x505   : > { %v2224_v45 = vpop.permute.xlu0 %2223 }
 0x506   : > { %v2320_v16 = vsel %vm1995_vm9, %v2224_v45, 0.0  ;;  %v4894_v45 = vld [vmem:[%s5462_s1 + $0x60] sm:$0xff] }
 0x507   : > { %2321 = vadd.xlane.f32.xlu1 %v2320_v16 }
 0x509   : > { %v2226_v48 = vpop.permute.xlu1 %2225 }
 0x50a   : > { %v2323_v50 = vsel %vm1995_vm9, %v2226_v48, 0.0 }
 0x50b   : > { %2324 = vadd.xlane.f32.xlu0 %v2323_v50 }
 0x50d   : > { %v2228_v52 = vpop.permute.xlu1 %2227 }
 0x50e   : > { %v2326_v13 = vsel %vm1995_vm9, %v2228_v52, 0.0 }
 0x50f   : > { %2327 = vadd.xlane.f32.xlu0 %v2326_v13 }
 0x511   : > { %v2230_v35 = vpop.permute.xlu0 %2229 }
 0x512   : > { %v2329_v18 = vsel %vm1995_vm9, %v2230_v35, 0.0 }
 0x513   : > { %2330 = vadd.xlane.f32.xlu1 %v2329_v18 }
 0x515   : > { %v2232_v61 = vpop.permute.xlu1 %2231 }
 0x516   : > { %v2332_v55 = vsel %vm1995_vm9, %v2232_v61, 0.0 }
 0x517   : > { %2333 = vadd.xlane.f32.xlu0 %v2332_v55 }
 0x519   : > { %v2234_v2 = vpop.permute.xlu0 %2233 }
 0x51a   : > { %v2335_v58 = vsel %vm1995_vm9, %v2234_v2, 0.0 }
 0x51b   : > { %2336 = vadd.xlane.f32.xlu1 %v2335_v58 }
 0x51d   : > { %v2236_v22 = vpop.permute.xlu1 %2235 }
 0x51e   : > { %v2338_v21 = vsel %vm1995_vm9, %v2236_v22, 0.0 }
 0x51f   : > { %2339 = vadd.xlane.f32.xlu0 %v2338_v21 }
 0x521   : > { %v2238_v4 = vpop.permute.xlu0 %2237 }
 0x522   : > { %v2341_v10 = vsel %vm1995_vm9, %v2238_v4, 0.0 }
 0x523   : > { %2342 = vadd.xlane.f32.xlu1 %v2341_v10 }
 0x525   : > { %v2240_v32 = vpop.permute.xlu0 %2239 }
 0x526   : > { %v2344_v29 = vsel %vm1995_vm9, %v2240_v32, 0.0 }
 0x527   : > { %2345 = vadd.xlane.f32.xlu1 %v2344_v29 }
 0x529   : > { %v2242_v51 = vpop.permute.xlu0 %2241 }
 0x52a   : > { %v2347_v34 = vsel %vm1995_vm9, %v2242_v51, 0.0 }
 0x52b   : > { %2348 = vadd.xlane.f32.xlu1 %v2347_v34  ;;  %v157_v34 = vld [vmem:[%s5462_s1 + $0x50] sm:$0xff] }
 0x52d   : > { %v2244_v36 = vpop.permute.xlu0 %2243 }
 0x52e   : > { %v2350_v42 = vsel %vm1995_vm9, %v2244_v36, 0.0  ;;  %v158_v36 = vld [vmem:[%s5462_s1 + $0x58] sm:$0xff] }
 0x52f   : > { %2351 = vadd.xlane.f32.xlu1 %v2350_v42 }
 0x531   : > { %v2246_v30 = vpop.permute.xlu1 %2245 }
 0x532   : > { %v2353_v14 = vsel %vm1995_vm9, %v2246_v30, 0.0 }
 0x533   : > { %2354 = vadd.xlane.f32.xlu0 %v2353_v14  ;;  %v3557_v14 = vpack.c.bf16 %v158_v36, %v157_v34 }
 0x535   : > { %v2248_v54 = vpop.permute.xlu1 %2247 }
 0x536   : > { %v2356_v12 = vsel %vm1995_vm9, %v2248_v54, 0.0 }
 0x537   : > { %2357 = vadd.xlane.f32.xlu0 %v2356_v12 }
 0x539   : > { %v2250_v41 = vpop.permute.xlu1 %2249 }
 0x53a   : > { %v2359_v7 = vsel %vm1995_vm9, %v2250_v41, 0.0 }
 0x53b   : > { %2360 = vadd.xlane.f32.xlu0 %v2359_v7 }
 0x53d   : > { %v2252_v62 = vpop.permute.xlu1 %2251 }
 0x53e   : > { %v2362_v6 = vsel %vm1995_vm9, %v2252_v62, 0.0 }
 0x53f   : > { %2363 = vadd.xlane.f32.xlu0 %v2362_v6 }
 0x540   : > { %1837 = vrot.lane.b32.xlu1 %v4568_v47, %s3784_s7  ;;  %v2584_v47 = vrot.slane %v4894_v45, %v2583_v20 }
 0x544   : > { %1841 = vrot.lane.b32.xlu1 %v4582_v3, %s3784_s7 }
 0x548   : > { %1845 = vrot.lane.b32.xlu1 %v4598_v56, %s3784_s7 }
 0x54c   : > { %1849 = vrot.lane.b32.xlu1 %v4614_v26, %s3784_s7 }
 0x550   : > { %1853 = vrot.lane.b32.xlu1 %v4628_v44, %s3784_s7 }
 0x554   : > { %1857 = vrot.lane.b32.xlu1 %v4642_v63, %s3784_s7 }
 0x555   : > { %2586 = vrot.lane.b32.xlu0 %v2584_v47, %s3784_s7 }
 0x558   : > { %1861 = vrot.lane.b32.xlu1 %v4656_v19, %s3784_s7 }
 0x559   : > { %1835 = vrot.lane.b32.xlu0 %v4561_v38, %s3784_s7  ;;  %v155_v38 = vld [vmem:[%s5462_s1 + $0x40] sm:$0xff] }
 0x55c   : > { %1865 = vrot.lane.b32.xlu1 %v4664_v9, %s3784_s7 }
 0x55d   : > { %1839 = vrot.lane.b32.xlu0 %v4575_v39, %s3784_s7  ;;  %v156_v39 = vld [vmem:[%s5462_s1 + $0x48] sm:$0xff] }
 0x55e   : > { %v3553_v3 = vpack.c.bf16 %v156_v39, %v155_v38 }
 0x560   : > { %3554 = vmatprep.subr.bf16.mxu0 %v3553_v3  ;;  %3561 = vmatprep.subr.bf16.mxu1 %v3553_v3 }
 0x561   : > { %1843 = vrot.lane.b32.xlu0 %v4590_v1, %s3784_s7  ;;  %3556 = vmatpush3.bf16.msra.mxu0 %v3553_v3  ;;  %v4926_v1 = vpop.permute.xlu1 %2546 }
 0x562   : > { %3563 = vmatpush3.bf16.msra.mxu1 %v3553_v3  ;;  %3558 = vmatprep.subr.bf16.mxu0 %v3557_v14 }
 0x563   : > { %3562 = vmatprep.subr.bf16.mxu1 %v3557_v14 }
 0x565   : > { %1847 = vrot.lane.b32.xlu0 %v4606_v23, %s3784_s7  ;;  %3560 = vmatpush3.bf16.msra.mxu0 %v3557_v14 }
 0x566   : > { %3564 = vmatpush3.bf16.msra.mxu1 %v3557_v14 }
 0x569   : > { %1851 = vrot.lane.b32.xlu0 %v4621_v8, %s3784_s7 }
 0x56d   : > { %1855 = vrot.lane.b32.xlu0 %v4635_v46, %s3784_s7 }
 0x571   : > { %1859 = vrot.lane.b32.xlu0 %v4649_v43, %s3784_s7 }
 0x575   : > { %1863 = vrot.lane.b32.xlu0 %v4660_v53, %s3784_s7 }
 0x590   : > { %v2319_v56 = vpop.xlane.xlu0 %2318 }
 0x591   : > { %v2413_v63 = vmul.f32 0.03125, %v2319_v56 }
 0x593   : > { %v2445_v9 = vadd.f32 1e-05, %v2413_v63 }
 0x594   : > { %v2322_v23 = vpop.xlane.xlu1 %2321 }
 0x595   : > { %v2414_v16 = vmul.f32 0.03125, %v2322_v23  ;;  %3708 = vrsqrt.f32 %v2445_v9 }
 0x597   : > { %v2446_v35 = vadd.f32 1e-05, %v2414_v16 }
 0x598   : > { %v2325_v26 = vpop.xlane.xlu0 %2324 }
 0x599   : > { %v2415_v43 = vmul.f32 0.03125, %v2325_v26 }
 0x59b   : > { %v2447_v48 = vadd.f32 1e-05, %v2415_v43 }
 0x59c   : > { %v2328_v46 = vpop.xlane.xlu0 %2327 }
 0x59d   : > { %v2416_v18 = vmul.f32 0.03125, %v2328_v46  ;;  %3710 = vrsqrt.f32 %v2447_v48 }
 0x59e   : > { %3712 = vrsqrt.f32 %v2446_v35 }
 0x59f   : > { %v2448_v58 = vadd.f32 1e-05, %v2416_v18  ;;  %v3709_v54 = vpop.eup %3708 }
 0x5a0   : > { %v2331_v8 = vpop.xlane.xlu1 %2330  ;;  %v2509_v56 = vmul.f32 %v3709_v54, %v4766_v31 }
 0x5a1   : > { %v2417_v50 = vmul.f32 0.03125, %v2331_v8 }
 0x5a2   : > { %v2549_v9 = vmul.f32 %v4926_v1, %v2509_v56 }
 0x5a3   : > { %v2449_v61 = vadd.f32 1e-05, %v2417_v50 }
 0x5a4   : > { %v2334_v53 = vpop.xlane.xlu0 %2333 }
 0x5a5   : > { %v2418_v22 = vmul.f32 0.03125, %v2334_v53  ;;  %3714 = vrsqrt.f32 %v2449_v61 }
 0x5a6   : > { %3716 = vrsqrt.f32 %v2448_v58 }
 0x5a7   : > { %v2450_v29 = vadd.f32 1e-05, %v2418_v22  ;;  %v3711_v12 = vpop.eup %3710 }
 0x5a8   : > { %v2337_v44 = vpop.xlane.xlu1 %2336  ;;  %v3713_v38 = vpop.eup %3712  ;;  %v2511_v3 = vmul.f32 %v3711_v12, %v4777_v24 }
 0x5a9   : > { %v2419_v55 = vmul.f32 0.03125, %v2337_v44  ;;  %v2510_v63 = vmul.f32 %v3713_v38, %v4771_v57 }
 0x5aa   : > { %v2551_v53 = vmul.f32 %v4926_v1, %v2511_v3 }
 0x5ab   : > { %v2451_v21 = vadd.f32 1e-05, %v2419_v55  ;;  %v2550_v57 = vmul.f32 %v4926_v1, %v2510_v63 }
 0x5ac   : > { %v2340_v52 = vpop.xlane.xlu0 %2339 }
 0x5ad   : > { %v2420_v51 = vmul.f32 0.03125, %v2340_v52  ;;  %3718 = vrsqrt.f32 %v2451_v21 }
 0x5ae   : > { %3720 = vrsqrt.f32 %v2450_v29 }
 0x5af   : > { %v2452_v6 = vadd.f32 1e-05, %v2420_v51  ;;  %v3715_v23 = vpop.eup %3714 }
 0x5b0   : > { %v2343_v19 = vpop.xlane.xlu1 %2342  ;;  %v3717_v43 = vpop.eup %3716  ;;  %v2513_v16 = vmul.f32 %v3715_v23, %v4789_v17 }
 0x5b1   : > { %v2421_v4 = vmul.f32 0.03125, %v2343_v19  ;;  %v2512_v61 = vmul.f32 %v3717_v43, %v4783_v33 }
 0x5b2   : > { %v2553_v17 = vmul.f32 %v4926_v1, %v2513_v16 }
 0x5b3   : > { %v2453_v42 = vadd.f32 1e-05, %v2421_v4 }
 0x5b4   : > { %v2346_v13 = vpop.xlane.xlu1 %2345 }
 0x5b5   : > { %v2422_v30 = vmul.f32 0.03125, %v2346_v13  ;;  %3722 = vrsqrt.f32 %v2453_v42 }
 0x5b6   : > { %3724 = vrsqrt.f32 %v2452_v6 }
 0x5b7   : > { %v2454_v20 = vadd.f32 1e-05, %v2422_v30  ;;  %v3719_v24 = vpop.eup %3718 }
 0x5b8   : > { %v2349_v10 = vpop.xlane.xlu1 %2348  ;;  %v3721_v35 = vpop.eup %3720  ;;  %v2515_v18 = vmul.f32 %v3719_v24, %v4801_v28  ;;  %v2552_v28 = vmul.f32 %v4926_v1, %v2512_v61 }
 0x5b9   : > { %v2423_v47 = vmul.f32 0.03125, %v2349_v10  ;;  %3726 = vrsqrt.f32 %v2454_v20  ;;  %v2514_v4 = vmul.f32 %v3721_v35, %v4795_v59 }
 0x5bb   : > { %v2455_v46 = vadd.f32 1e-05, %v2423_v47  ;;  %v2554_v59 = vmul.f32 %v4926_v1, %v2514_v4 }
 0x5bc   : > { %v2352_v41 = vpop.xlane.xlu1 %2351 }
 0x5bd   : > { %v2424_v39 = vmul.f32 0.03125, %v2352_v41 }
 0x5bf   : > { %v2456_v19 = vadd.f32 1e-05, %v2424_v39  ;;  %v3723_v55 = vpop.eup %3722 }
 0x5c0   : > { %v2355_v2 = vpop.xlane.xlu0 %2354  ;;  %v3725_v10 = vpop.eup %3724  ;;  %v2517_v33 = vmul.f32 %v3723_v55, %v4813_v60 }
 0x5c1   : > { %v2425_v7 = vmul.f32 0.03125, %v2355_v2  ;;  %v2516_v60 = vmul.f32 %v3725_v10, %v4807_v49 }
 0x5c2   : > { %v2557_v30 = vmul.f32 %v4926_v1, %v2517_v33 }
 0x5c3   : > { %v2457_v26 = vadd.f32 1e-05, %v2425_v7  ;;  %v3727_v29 = vpop.eup %3726 }
 0x5c4   : > { %v2358_v32 = vpop.xlane.xlu0 %2357  ;;  %v2518_v14 = vmul.f32 %v3727_v29, %v4819_v15  ;;  %v2556_v15 = vmul.f32 %v4926_v1, %v2516_v60 }
 0x5c5   : > { %v2426_v8 = vmul.f32 0.03125, %v2358_v32  ;;  %3728 = vrsqrt.f32 %v2457_v26  ;;  %v2555_v32 = vmul.f32 %v4926_v1, %v2515_v18 }
 0x5c6   : > { %3730 = vrsqrt.f32 %v2455_v46  ;;  %v2558_v20 = vmul.f32 %v4926_v1, %v2518_v14 }
 0x5c7   : > { %v2458_v31 = vadd.f32 1e-05, %v2426_v8  ;;  %3732 = vrsqrt.f32 %v2456_v19 }
 0x5c8   : > { %v2361_v62 = vpop.xlane.xlu0 %2360 }
 0x5c9   : > { %v2427_v48 = vmul.f32 0.03125, %v2361_v62  ;;  %3734 = vrsqrt.f32 %v2458_v31 }
 0x5cb   : > { %v2459_v2 = vadd.f32 1e-05, %v2427_v48 }
 0x5cc   : > { %v2364_v44 = vpop.xlane.xlu0 %2363 }
 0x5cd   : > { %v2428_v58 = vmul.f32 0.03125, %v2364_v44  ;;  %3736 = vrsqrt.f32 %v2459_v2 }
 0x5cf   : > { %v2460_v51 = vadd.f32 1e-05, %v2428_v58  ;;  %v3729_v42 = vpop.eup %3728 }
 0x5d0   : > { %v4940_v50 = vpop.permute.xlu0 %2586  ;;  %v3731_v54 = vpop.eup %3730  ;;  %v2521_v62 = vmul.f32 %v3729_v42, %v4837_v27 }
 0x5d1   : > { %v2591_v52 = vadd.f32 %v4940_v50, %v2551_v53  ;;  %v2589_v13 = vadd.f32 %v4940_v50, %v2549_v9  ;;  %v2593_v22 = vadd.f32 %v4940_v50, %v2553_v17  ;;  %v2590_v21 = vadd.f32 %v4940_v50, %v2550_v57  ;;  %v3733_v12 = vpop.eup %3732 }
 0x5d2   : > { %v2595_v34 = vadd.f32 %v4940_v50, %v2555_v32  ;;  %v2592_v36 = vadd.f32 %v4940_v50, %v2552_v28  ;;  %3738 = vrsqrt.f32 %v2460_v51  ;;  %v2597_v41 = vadd.f32 %v4940_v50, %v2557_v30 }
 0x5d3   : > { %2641 = vrot.lane.b32.xlu0 %v2591_v52, %s3785_s8  ;;  %2637 = vrot.lane.b32.xlu1 %v2589_v13, %s3785_s8  ;;  %v2594_v7 = vadd.f32 %v4940_v50, %v2554_v59  ;;  %v3735_v6 = vpop.eup %3734  ;;  %v2519_v49 = vmul.f32 %v3731_v54, %v4825_v5  ;;  %v2520_v38 = vmul.f32 %v3733_v12, %v4831_v25 }
 0x5d4   : > { %v4974_v47 = vpop.permute.xlu0 %1835  ;;  %v2598_v39 = vadd.f32 %v4940_v50, %v2558_v20  ;;  %v2596_v3 = vadd.f32 %v4940_v50, %v2556_v15  ;;  %v2561_v27 = vmul.f32 %v4926_v1, %v2521_v62  ;;  %v2522_v56 = vmul.f32 %v3735_v6, %v4843_v11  ;;  %v4993_v11 = vpop.permute.xlu1 %1837 }
 0x5d5   : > { %v2559_v26 = vmul.f32 %v4926_v1, %v2519_v49  ;;  %v2560_v5 = vmul.f32 %v4926_v1, %v2520_v38 }
 0x5d6   : > { %v2601_v25 = vadd.f32 %v4940_v50, %v2561_v27  ;;  %v2562_v44 = vmul.f32 %v4926_v1, %v2522_v56 }
 0x5d7   : > { %2645 = vrot.lane.b32.xlu0 %v2593_v22, %s3785_s8  ;;  %2639 = vrot.lane.b32.xlu1 %v2590_v21, %s3785_s8  ;;  %v3737_v23 = vpop.eup %3736  ;;  %v2599_v8 = vadd.f32 %v4940_v50, %v2559_v26  ;;  %v2600_v19 = vadd.f32 %v4940_v50, %v2560_v5 }
 0x5d8   : > { %v2523_v46 = vmul.f32 %v3737_v23, %v4849_v0  ;;  %v4989_v43 = vpop.permute.xlu0 %1839  ;;  %v2602_v53 = vadd.f32 %v4940_v50, %v2562_v44  ;;  %v5005_v48 = vpop.permute.xlu1 %1841 }
 0x5da   : > { %v2563_v9 = vmul.f32 %v4926_v1, %v2523_v46 }
 0x5db   : > { %2649 = vrot.lane.b32.xlu0 %v2595_v34, %s3785_s8  ;;  %2643 = vrot.lane.b32.xlu1 %v2592_v36, %s3785_s8 }
 0x5dc   : > { %v3739_v63 = vpop.eup %3738  ;;  %v5001_v0 = vpop.permute.xlu0 %1843  ;;  %v2603_v24 = vadd.f32 %v4940_v50, %v2563_v9 }
 0x5dd   : > { %v2524_v16 = vmul.f32 %v3739_v63, %v4855_v37  ;;  %v5016_v13 = vpop.permute.xlu1 %1845 }
 0x5df   : > { %2653 = vrot.lane.b32.xlu0 %v2597_v41, %s3785_s8  ;;  %2647 = vrot.lane.b32.xlu1 %v2594_v7, %s3785_s8  ;;  %v2564_v31 = vmul.f32 %v4926_v1, %v2524_v16 }
 0x5e0   : > { %v5011_v37 = vpop.permute.xlu0 %1847 }
 0x5e1   : > { %v2604_v52 = vadd.f32 %v4940_v50, %v2564_v31  ;;  %v5024_v35 = vpop.permute.xlu1 %1849 }
 0x5e3   : > { %2655 = vrot.lane.b32.xlu0 %v2598_v39, %s3785_s8  ;;  %2651 = vrot.lane.b32.xlu1 %v2596_v3, %s3785_s8 }
 0x5e4   : > { %v5022_v57 = vpop.permute.xlu0 %1851 }
 0x5e5   : > { %v5036_v18 = vpop.permute.xlu1 %1853 }
 0x5e7   : > { %2657 = vrot.lane.b32.xlu0 %v2599_v8, %s3785_s8  ;;  %2661 = vrot.lane.b32.xlu1 %v2601_v25, %s3785_s8 }
 0x5e8   : > { %v5030_v17 = vpop.permute.xlu0 %1855 }
 0x5e9   : > { %v5044_v55 = vpop.permute.xlu1 %1857 }
 0x5eb   : > { %2659 = vrot.lane.b32.xlu0 %v2600_v19, %s3785_s8  ;;  %2663 = vrot.lane.b32.xlu1 %v2602_v53, %s3785_s8 }
 0x5ec   : > { %v5042_v61 = vpop.permute.xlu0 %1859 }
 0x5ed   : > { %v5056_v58 = vpop.permute.xlu1 %1861 }
 0x5ef   : > { %2665 = vrot.lane.b32.xlu1 %v2603_v24, %s3785_s8  ;;  %1931 = vrot.lane.b32.xlu0 %v4974_v47, %s3785_s8 }
 0x5f0   : > { %v5050_v2 = vpop.permute.xlu0 %1863 }
 0x5f1   : > { %v5060_v22 = vpop.permute.xlu1 %1865 }
 0x5f3   : > { %2667 = vrot.lane.b32.xlu1 %v2604_v52, %s3785_s8  ;;  %1935 = vrot.lane.b32.xlu0 %v4989_v43, %s3785_s8 }
 0x5f7   : > { %1933 = vrot.lane.b32.xlu1 %v4993_v11, %s3785_s8  ;;  %1939 = vrot.lane.b32.xlu0 %v5001_v0, %s3785_s8 }
 0x5fb   : > { %1937 = vrot.lane.b32.xlu1 %v5005_v48, %s3785_s8  ;;  %1943 = vrot.lane.b32.xlu0 %v5011_v37, %s3785_s8 }
 0x5ff   : > { %1941 = vrot.lane.b32.xlu1 %v5016_v13, %s3785_s8  ;;  %1947 = vrot.lane.b32.xlu0 %v5022_v57, %s3785_s8 }
 0x603   : > { %1945 = vrot.lane.b32.xlu1 %v5024_v35, %s3785_s8  ;;  %1951 = vrot.lane.b32.xlu0 %v5030_v17, %s3785_s8 }
 0x607   : > { %1949 = vrot.lane.b32.xlu1 %v5036_v18, %s3785_s8  ;;  %1955 = vrot.lane.b32.xlu0 %v5042_v61, %s3785_s8 }
 0x60b   : > { %1953 = vrot.lane.b32.xlu1 %v5044_v55, %s3785_s8  ;;  %1959 = vrot.lane.b32.xlu0 %v5050_v2, %s3785_s8 }
 0x60f   : > { %1957 = vrot.lane.b32.xlu1 %v5056_v58, %s3785_s8 }
 0x613   : > { %1961 = vrot.lane.b32.xlu1 %v5060_v22, %s3785_s8 }
 0x645   : > { %v5064_v21 = vpop.permute.xlu1 %2637  ;;  %v5066_v4 = vpop.permute.xlu0 %2641 }
 0x646   : > { %3481 = vmatprep.mubr.msk.f32.mxu0 %vm1995_vm9, %v5064_v21 }
 0x649   : > { %v5070_v10 = vpop.permute.xlu1 %2639  ;;  %v5072_v32 = vpop.permute.xlu0 %2645 }
 0x64a   : > { %3482 = vmatmul.mubr.msk.f32.vlgmr.msra.gmra.mrb[32].mxu0 %vm1995_vm9, %v5070_v10 }
 0x64b   : > { %3484 = vmatprep.mubr.msk.f32.mxu0 %vm1995_vm9, %v5066_v4 }
 0x64d   : > { %v5078_v28 = vpop.permute.xlu1 %2643  ;;  %v5080_v33 = vpop.permute.xlu0 %2649 }
 0x64e   : > { %3485 = vmatmul.mubr.msk.f32.gmra.mrb[34].mxu0 %vm1995_vm9, %v5078_v28 }
 0x64f   : > { %3487 = vmatprep.mubr.msk.f32.mxu0 %vm1995_vm9, %v5072_v32 }
 0x651   : > { %v5086_v29 = vpop.permute.xlu1 %2647  ;;  %v5088_v51 = vpop.permute.xlu0 %2653 }
 0x652   : > { %3488 = vmatmul.mubr.msk.f32.gmra.mrb[36].mxu0 %vm1995_vm9, %v5086_v29 }
 0x653   : > { %3490 = vmatprep.mubr.msk.f32.mxu0 %vm1995_vm9, %v5080_v33 }
 0x655   : > { %v5094_v34 = vpop.permute.xlu1 %2651  ;;  %v5096_v36 = vpop.permute.xlu0 %2655 }
 0x656   : > { %3491 = vmatmul.mubr.msk.f32.gmra.mrb[38].mxu0 %vm1995_vm9, %v5094_v34 }
 0x657   : > { %3493 = vmatprep.mubr.msk.f32.mxu0 %vm1995_vm9, %v5088_v51 }
 0x659   : > { %v5102_v42 = vpop.permute.xlu1 %2661  ;;  %v5104_v59 = vpop.permute.xlu0 %2657 }
 0x65a   : > { %3494 = vmatmul.mubr.msk.f32.gmra.mrb[40].mxu0 %vm1995_vm9, %v5096_v36  ;;  %3499 = vmatprep.mubr.msk.f32.mxu1 %vm1995_vm9, %v5102_v42 }
 0x65b   : > { %3496 = vmatprep.mubr.msk.f32.mxu0 %vm1995_vm9, %v5104_v59 }
 0x65d   : > { %v5112_v30 = vpop.permute.xlu1 %2663  ;;  %v5114_v14 = vpop.permute.xlu0 %2659 }
 0x65e   : > { %3497 = vmatmul.mubr.msk.f32.gmra.mrb[42].mxu0 %vm1995_vm9, %v5114_v14  ;;  %3500 = vmatmul.mubr.msk.f32.vlgmr.msra.gmra.mrb[32].mxu1 %vm1995_vm9, %v5112_v30 }
 0x661   : > { %v5120_v60 = vpop.permute.xlu1 %2665  ;;  %v1932_v54 = vpop.permute.xlu0 %1931 }
 0x662   : > { %v2044_v12 = vsel %vm1995_vm9, %v1932_v54, 0.0  ;;  %3502 = vmatprep.mubr.msk.f32.mxu1 %vm1995_vm9, %v5120_v60 }
 0x663   : > { %2045 = vadd.xlane.f32.xlu0 %v2044_v12 }
 0x665   : > { %v5125_v41 = vpop.permute.xlu1 %2667  ;;  %v1936_v7 = vpop.permute.xlu0 %1935 }
 0x666   : > { %v2050_v62 = vsel %vm1995_vm9, %v1936_v7, 0.0  ;;  %3503 = vmatmul.mubr.msk.f32.gmra.mrb[34].mxu1 %vm1995_vm9, %v5125_v41 }
 0x667   : > { %2051 = vadd.xlane.f32.xlu0 %v2050_v62 }
 0x669   : > { %v1934_v6 = vpop.permute.xlu1 %1933  ;;  %v1940_v20 = vpop.permute.xlu0 %1939 }
 0x66a   : > { %v2047_v15 = vsel %vm1995_vm9, %v1934_v6, 0.0  ;;  %v2056_v39 = vsel %vm1995_vm9, %v1940_v20, 0.0 }
 0x66b   : > { %2048 = vadd.xlane.f32.xlu1 %v2047_v15 }
 0x66d   : > { %v1938_v49 = vpop.permute.xlu1 %1937  ;;  %v1944_v38 = vpop.permute.xlu0 %1943 }
 0x66e   : > { %v2053_v3 = vsel %vm1995_vm9, %v1938_v49, 0.0  ;;  %v2062_v23 = vsel %vm1995_vm9, %v1944_v38, 0.0 }
 0x66f   : > { %2054 = vadd.xlane.f32.xlu0 %v2053_v3  ;;  %2057 = vadd.xlane.f32.xlu1 %v2056_v39 }
 0x671   : > { %v1942_v27 = vpop.permute.xlu1 %1941  ;;  %v1948_v56 = vpop.permute.xlu0 %1947 }
 0x672   : > { %v2059_v26 = vsel %vm1995_vm9, %v1942_v27, 0.0  ;;  %v2068_v25 = vsel %vm1995_vm9, %v1948_v56, 0.0 }
 0x673   : > { %2060 = vadd.xlane.f32.xlu0 %v2059_v26  ;;  %2063 = vadd.xlane.f32.xlu1 %v2062_v23 }
 0x675   : > { %v1946_v5 = vpop.permute.xlu1 %1945  ;;  %v1952_v8 = vpop.permute.xlu0 %1951 }
 0x676   : > { %v2065_v44 = vsel %vm1995_vm9, %v1946_v5, 0.0  ;;  %v2074_v19 = vsel %vm1995_vm9, %v1952_v8, 0.0 }
 0x677   : > { %2066 = vadd.xlane.f32.xlu0 %v2065_v44  ;;  %2069 = vadd.xlane.f32.xlu1 %v2068_v25 }
 0x679   : > { %v1950_v46 = vpop.permute.xlu1 %1949  ;;  %v1956_v63 = vpop.permute.xlu0 %1955 }
 0x67a   : > { %v2071_v53 = vsel %vm1995_vm9, %v1950_v46, 0.0  ;;  %v2080_v16 = vsel %vm1995_vm9, %v1956_v63, 0.0 }
 0x67b   : > { %2072 = vadd.xlane.f32.xlu0 %v2071_v53  ;;  %2075 = vadd.xlane.f32.xlu1 %v2074_v19 }
 0x67d   : > { %v1954_v9 = vpop.permute.xlu1 %1953  ;;  %v1960_v31 = vpop.permute.xlu0 %1959 }
 0x67e   : > { %v2077_v24 = vsel %vm1995_vm9, %v1954_v9, 0.0  ;;  %v2086_v54 = vsel %vm1995_vm9, %v1960_v31, 0.0 }
 0x67f   : > { %2078 = vadd.xlane.f32.xlu0 %v2077_v24  ;;  %2081 = vadd.xlane.f32.xlu1 %v2080_v16 }
 0x681   : > { %v1958_v52 = vpop.permute.xlu1 %1957 }
 0x682   : > { %v2083_v12 = vsel %vm1995_vm9, %v1958_v52, 0.0 }
 0x683   : > { %2084 = vadd.xlane.f32.xlu0 %v2083_v12  ;;  %2087 = vadd.xlane.f32.xlu1 %v2086_v54 }
 0x685   : > { %v1962_v7 = vpop.permute.xlu1 %1961 }
 0x686   : > { %v2089_v62 = vsel %vm1995_vm9, %v1962_v7, 0.0 }
 0x687   : > { %2090 = vadd.xlane.f32.xlu0 %v2089_v62 }
 0x6f0   : > { %v2046_v6 = vpop.xlane.xlu0 %2045 }
 0x6f1   : > { %v2109_v20 = vmul.f32 0.03125, %v2046_v6 }
 0x6f3   : > { %v5145_v15 = vsub.f32 %v4974_v47, %v2109_v20 }
 0x6f4   : > { %v2052_v49 = vpop.xlane.xlu0 %2051 }
 0x6f5   : > { %v2173_v38 = vmul.f32 %v5145_v15, %v5145_v15  ;;  %v2111_v39 = vmul.f32 0.03125, %v2052_v49 }
 0x6f7   : > { %v5150_v3 = vsub.f32 %v4989_v43, %v2111_v39  ;;  %2253 = vrot.lane.b32.xlu1 %v2173_v38, %s3785_s8 }
 0x6f8   : > { %v2049_v27 = vpop.xlane.xlu1 %2048 }
 0x6f9   : > { %v2175_v56 = vmul.f32 %v5150_v3, %v5150_v3  ;;  %v2110_v23 = vmul.f32 0.03125, %v2049_v27 }
 0x6fb   : > { %v5156_v26 = vsub.f32 %v4993_v11, %v2110_v23  ;;  %2257 = vrot.lane.b32.xlu1 %v2175_v56, %s3785_s8 }
 0x6fc   : > { %v2058_v47 = vpop.xlane.xlu1 %2057  ;;  %v2055_v5 = vpop.xlane.xlu0 %2054 }
 0x6fd   : > { %v2174_v8 = vmul.f32 %v5156_v26, %v5156_v26  ;;  %v2113_v25 = vmul.f32 0.03125, %v2058_v47  ;;  %v2112_v43 = vmul.f32 0.03125, %v2055_v5 }
 0x6ff   : > { %v5162_v44 = vsub.f32 %v5001_v0, %v2113_v25  ;;  %v5165_v46 = vsub.f32 %v5005_v48, %v2112_v43  ;;  %2255 = vrot.lane.b32.xlu0 %v2174_v8, %s3785_s8 }
 0x700   : > { %v2064_v63 = vpop.xlane.xlu1 %2063  ;;  %v2061_v11 = vpop.xlane.xlu0 %2060 }
 0x701   : > { %v2177_v19 = vmul.f32 %v5162_v44, %v5162_v44  ;;  %v2176_v53 = vmul.f32 %v5165_v46, %v5165_v46  ;;  %v2115_v9 = vmul.f32 0.03125, %v2064_v63  ;;  %v2114_v16 = vmul.f32 0.03125, %v2061_v11 }
 0x703   : > { %v5173_v24 = vsub.f32 %v5011_v37, %v2115_v9  ;;  %v5176_v0 = vsub.f32 %v5016_v13, %v2114_v16  ;;  %2261 = vrot.lane.b32.xlu0 %v2177_v19, %s3785_s8  ;;  %2259 = vrot.lane.b32.xlu1 %v2176_v53, %s3785_s8 }
 0x704   : > { %v2070_v48 = vpop.xlane.xlu1 %2069  ;;  %v2067_v31 = vpop.xlane.xlu0 %2066 }
 0x705   : > { %v2179_v52 = vmul.f32 %v5173_v24, %v5173_v24  ;;  %v2178_v54 = vmul.f32 %v5176_v0, %v5176_v0  ;;  %v2117_v12 = vmul.f32 0.03125, %v2070_v48  ;;  %v2116_v7 = vmul.f32 0.03125, %v2067_v31 }
 0x707   : > { %v5185_v37 = vsub.f32 %v5022_v57, %v2117_v12  ;;  %v5188_v13 = vsub.f32 %v5024_v35, %v2116_v7  ;;  %2265 = vrot.lane.b32.xlu0 %v2179_v52, %s3785_s8  ;;  %2263 = vrot.lane.b32.xlu1 %v2178_v54, %s3785_s8 }
 0x708   : > { %v2076_v62 = vpop.xlane.xlu1 %2075  ;;  %v2073_v6 = vpop.xlane.xlu0 %2072 }
 0x709   : > { %v2181_v20 = vmul.f32 %v5185_v37, %v5185_v37  ;;  %v2180_v49 = vmul.f32 %v5188_v13, %v5188_v13  ;;  %v2119_v38 = vmul.f32 0.03125, %v2076_v62  ;;  %v2118_v39 = vmul.f32 0.03125, %v2073_v6 }
 0x70b   : > { %v5197_v57 = vsub.f32 %v5030_v17, %v2119_v38  ;;  %v5200_v35 = vsub.f32 %v5036_v18, %v2118_v39  ;;  %2269 = vrot.lane.b32.xlu0 %v2181_v20, %s3785_s8  ;;  %2267 = vrot.lane.b32.xlu1 %v2180_v49, %s3785_s8 }
 0x70c   : > { %v2082_v27 = vpop.xlane.xlu1 %2081  ;;  %v2079_v56 = vpop.xlane.xlu0 %2078 }
 0x70d   : > { %v2183_v23 = vmul.f32 %v5197_v57, %v5197_v57  ;;  %v2182_v47 = vmul.f32 %v5200_v35, %v5200_v35  ;;  %v2121_v5 = vmul.f32 0.03125, %v2082_v27  ;;  %v2120_v8 = vmul.f32 0.03125, %v2079_v56 }
 0x70f   : > { %v5209_v17 = vsub.f32 %v5042_v61, %v2121_v5  ;;  %v5212_v18 = vsub.f32 %v5044_v55, %v2120_v8  ;;  %2273 = vrot.lane.b32.xlu0 %v2183_v23, %s3785_s8  ;;  %2271 = vrot.lane.b32.xlu1 %v2182_v47, %s3785_s8 }
 0x710   : > { %v2088_v25 = vpop.xlane.xlu1 %2087  ;;  %v2085_v43 = vpop.xlane.xlu0 %2084 }
 0x711   : > { %v2185_v63 = vmul.f32 %v5209_v17, %v5209_v17  ;;  %v2184_v11 = vmul.f32 %v5212_v18, %v5212_v18  ;;  %v2123_v19 = vmul.f32 0.03125, %v2088_v25  ;;  %v2122_v53 = vmul.f32 0.03125, %v2085_v43 }
 0x713   : > { %v5221_v61 = vsub.f32 %v5050_v2, %v2123_v19  ;;  %v5224_v55 = vsub.f32 %v5056_v58, %v2122_v53  ;;  %2277 = vrot.lane.b32.xlu0 %v2185_v63, %s3785_s8  ;;  %2275 = vrot.lane.b32.xlu1 %v2184_v11, %s3785_s8 }
 0x714   : > { %v2091_v9 = vpop.xlane.xlu0 %2090 }
 0x715   : > { %v2187_v16 = vmul.f32 %v5221_v61, %v5221_v61  ;;  %v2186_v48 = vmul.f32 %v5224_v55, %v5224_v55  ;;  %v2124_v31 = vmul.f32 0.03125, %v2091_v9 }
 0x717   : > { %v5233_v52 = vsub.f32 %v5060_v22, %v2124_v31  ;;  %2281 = vrot.lane.b32.xlu0 %v2187_v16, %s3785_s8  ;;  %2279 = vrot.lane.b32.xlu1 %v2186_v48, %s3785_s8 }
 0x719   : > { %v2188_v2 = vmul.f32 %v5233_v52, %v5233_v52 }
 0x71b   : > { %2283 = vrot.lane.b32.xlu1 %v2188_v2, %s3785_s8 }
 0x71d   : > { %v5240_v58 = vpop.f32.mrb[32].mxu0 }
 0x71e   : > { %v5242_v54 = vpop.f32.mrb[33].mxu0 }
 0x721   : > { %v5244_v12 = vpop.f32.mrb[34].mxu0 }
 0x722   : > { %v5246_v7 = vpop.f32.mrb[35].mxu0 }
 0x725   : > { %v5248_v62 = vpop.f32.mrb[36].mxu0 }
 0x726   : > { %v5250_v22 = vpop.f32.mrb[37].mxu0 }
 0x729   : > { %v5252_v6 = vpop.f32.mrb[38].mxu0 }
 0x72a   : > { %v5254_v20 = vpop.f32.mrb[39].mxu0 }
 0x72d   : > { %v5256_v49 = vpop.f32.mrb[40].mxu0 }
 0x72e   : > { %v5258_v38 = vpop.f32.mrb[41].mxu0 }
 0x731   : > { %v5260_v39 = vpop.f32.mrb[42].mxu0  ;;  %v5262_v27 = vpop.f32.mrb[32].mxu1 }
 0x732   : > { %v5264_v56 = vpop.f32.mrb[43].mxu0  ;;  %v5266_v23 = vpop.f32.mrb[33].mxu1 }
 0x739   : > { %v5268_v47 = vpop.f32.mrb[34].mxu1 }
 0x73a   : > { %v5270_v5 = vpop.f32.mrb[35].mxu1 }
 0x769   : > { %v2254_v8 = vpop.permute.xlu1 %2253 }
 0x76a   : > { %v2365_v25 = vsel %vm1995_vm9, %v2254_v8, 0.0 }
 0x76b   : > { %2366 = vadd.xlane.f32.xlu0 %v2365_v25 }
 0x76d   : > { %v2258_v43 = vpop.permute.xlu1 %2257 }
 0x76e   : > { %v2371_v63 = vsel %vm1995_vm9, %v2258_v43, 0.0 }
 0x76f   : > { %2372 = vadd.xlane.f32.xlu0 %v2371_v63 }
 0x771   : > { %v2256_v11 = vpop.permute.xlu0 %2255 }
 0x772   : > { %v2368_v19 = vsel %vm1995_vm9, %v2256_v11, 0.0 }
 0x773   : > { %2369 = vadd.xlane.f32.xlu1 %v2368_v19 }
 0x775   : > { %v2260_v53 = vpop.permute.xlu1 %2259  ;;  %v2262_v9 = vpop.permute.xlu0 %2261 }
 0x776   : > { %v2374_v16 = vsel %vm1995_vm9, %v2260_v53, 0.0  ;;  %v2377_v48 = vsel %vm1995_vm9, %v2262_v9, 0.0 }
 0x777   : > { %2375 = vadd.xlane.f32.xlu0 %v2374_v16  ;;  %2378 = vadd.xlane.f32.xlu1 %v2377_v48 }
 0x779   : > { %v2264_v31 = vpop.permute.xlu1 %2263  ;;  %v2266_v2 = vpop.permute.xlu0 %2265 }
 0x77a   : > { %v2380_v8 = vsel %vm1995_vm9, %v2264_v31, 0.0  ;;  %v2383_v25 = vsel %vm1995_vm9, %v2266_v2, 0.0 }
 0x77b   : > { %2381 = vadd.xlane.f32.xlu0 %v2380_v8  ;;  %2384 = vadd.xlane.f32.xlu1 %v2383_v25 }
 0x77d   : > { %v2268_v43 = vpop.permute.xlu1 %2267  ;;  %v2270_v63 = vpop.permute.xlu0 %2269 }
 0x77e   : > { %v2386_v11 = vsel %vm1995_vm9, %v2268_v43, 0.0  ;;  %v2389_v19 = vsel %vm1995_vm9, %v2270_v63, 0.0 }
 0x77f   : > { %2387 = vadd.xlane.f32.xlu0 %v2386_v11  ;;  %2390 = vadd.xlane.f32.xlu1 %v2389_v19 }
 0x781   : > { %v2272_v53 = vpop.permute.xlu1 %2271  ;;  %v2274_v9 = vpop.permute.xlu0 %2273 }
 0x782   : > { %v2392_v16 = vsel %vm1995_vm9, %v2272_v53, 0.0  ;;  %v2395_v48 = vsel %vm1995_vm9, %v2274_v9, 0.0 }
 0x783   : > { %2393 = vadd.xlane.f32.xlu0 %v2392_v16  ;;  %2396 = vadd.xlane.f32.xlu1 %v2395_v48  ;;  %v2848_v16 = vsub.s32 3, %v3867_v40 }
 0x785   : > { %v2276_v31 = vpop.permute.xlu1 %2275  ;;  %v2278_v2 = vpop.permute.xlu0 %2277  ;;  %v2849_v48 = vrot.slane %v4894_v45, %v2848_v16 }
 0x786   : > { %v2398_v8 = vsel %vm1995_vm9, %v2276_v31, 0.0  ;;  %v2401_v25 = vsel %vm1995_vm9, %v2278_v2, 0.0 }
 0x787   : > { %2399 = vadd.xlane.f32.xlu0 %v2398_v8  ;;  %2402 = vadd.xlane.f32.xlu1 %v2401_v25  ;;  %v2850_v31 = vadd.f32 %v2849_v48, %v5242_v54  ;;  %v2853_v2 = vadd.f32 %v5244_v12, %v2849_v48  ;;  %v2852_v8 = vadd.f32 %v2849_v48, %v5246_v7 }
 0x788   : > { %v2851_v25 = vadd.f32 %v5240_v58, %v2849_v48  ;;  %v2855_v40 = vadd.f32 %v5248_v62, %v2849_v48  ;;  %v2854_v45 = vadd.f32 %v2849_v48, %v5250_v22  ;;  %v2857_v54 = vadd.f32 %v5252_v6, %v2849_v48 }
 0x789   : > { %v2280_v43 = vpop.permute.xlu1 %2279  ;;  %v2282_v63 = vpop.permute.xlu0 %2281  ;;  %v2856_v12 = vadd.f32 %v2849_v48, %v5254_v20  ;;  %v2859_v58 = vadd.f32 %v5256_v49, %v2849_v48  ;;  %v2858_v7 = vadd.f32 %v2849_v48, %v5258_v38  ;;  %v2861_v62 = vadd.f32 %v5260_v39, %v2849_v48 }
 0x78a   : > { %v2404_v11 = vsel %vm1995_vm9, %v2280_v43, 0.0  ;;  %v2407_v19 = vsel %vm1995_vm9, %v2282_v63, 0.0  ;;  %v2860_v22 = vadd.f32 %v2849_v48, %v5264_v56  ;;  %v2863_v6 = vadd.f32 %v5262_v27, %v2849_v48 }
 0x78b   : > { %2405 = vadd.xlane.f32.xlu0 %v2404_v11  ;;  %2408 = vadd.xlane.f32.xlu1 %v2407_v19  ;;  %v2862_v20 = vadd.f32 %v2849_v48, %v5266_v23  ;;  %v2865_v49 = vadd.f32 %v5268_v47, %v2849_v48  ;;  %v2864_v38 = vadd.f32 %v2849_v48, %v5270_v5 }
 0x78d   : > { %v2284_v53 = vpop.permute.xlu1 %2283 }
 0x78e   : > { %v2410_v9 = vsel %vm1995_vm9, %v2284_v53, 0.0 }
 0x78f   : > { %2411 = vadd.xlane.f32.xlu0 %v2410_v9 }
 0x79c   : > { %2898 = vrot.lane.b32.xlu1 %v2850_v31, %s3783_s6 }
 0x7a0   : > { %2904 = vrot.lane.b32.xlu1 %v2853_v2, %s3783_s6 }
 0x7a4   : > { %2902 = vrot.lane.b32.xlu1 %v2852_v8, %s3783_s6 }
 0x7a5   : > { %2900 = vrot.lane.b32.xlu0 %v2851_v25, %s3783_s6 }
 0x7a8   : > { %2908 = vrot.lane.b32.xlu1 %v2855_v40, %s3783_s6 }
 0x7a9   : > { %2906 = vrot.lane.b32.xlu0 %v2854_v45, %s3783_s6 }
 0x7ac   : > { %2912 = vrot.lane.b32.xlu1 %v2857_v54, %s3783_s6 }
 0x7ad   : > { %2910 = vrot.lane.b32.xlu0 %v2856_v12, %s3783_s6 }
 0x7b0   : > { %2916 = vrot.lane.b32.xlu1 %v2859_v58, %s3783_s6 }
 0x7b1   : > { %2914 = vrot.lane.b32.xlu0 %v2858_v7, %s3783_s6 }
 0x7b4   : > { %2920 = vrot.lane.b32.xlu1 %v2861_v62, %s3783_s6 }
 0x7b5   : > { %2918 = vrot.lane.b32.xlu0 %v2860_v22, %s3783_s6 }
 0x7b8   : > { %2924 = vrot.lane.b32.xlu1 %v2863_v6, %s3783_s6 }
 0x7b9   : > { %2922 = vrot.lane.b32.xlu0 %v2862_v20, %s3783_s6 }
 0x7bc   : > { %2928 = vrot.lane.b32.xlu1 %v2865_v49, %s3783_s6 }
 0x7bd   : > { %2926 = vrot.lane.b32.xlu0 %v2864_v38, %s3783_s6 }
 0x7f8   : > { %v2367_v39 = vpop.xlane.xlu0 %2366 }
 0x7f9   : > { %v2429_v56 = vmul.f32 0.03125, %v2367_v39 }
 0x7fb   : > { %v2461_v63 = vadd.f32 1e-05, %v2429_v56 }
 0x7fc   : > { %v2373_v43 = vpop.xlane.xlu0 %2372 }
 0x7fd   : > { %v2431_v11 = vmul.f32 0.03125, %v2373_v43  ;;  %3740 = vrsqrt.f32 %v2461_v63 }
 0x7ff   : > { %v2463_v53 = vadd.f32 1e-05, %v2431_v11 }
 0x800   : > { %v2370_v27 = vpop.xlane.xlu1 %2369 }
 0x801   : > { %v2430_v19 = vmul.f32 0.03125, %v2370_v27 }
 0x803   : > { %v2462_v23 = vadd.f32 1e-05, %v2430_v19 }
 0x804   : > { %v2379_v9 = vpop.xlane.xlu1 %2378  ;;  %v2376_v16 = vpop.xlane.xlu0 %2375 }
 0x805   : > { %3742 = vrsqrt.f32 %v2462_v23  ;;  %v2433_v47 = vmul.f32 0.03125, %v2379_v9  ;;  %v2432_v31 = vmul.f32 0.03125, %v2376_v16 }
 0x806   : > { %3744 = vrsqrt.f32 %v2463_v53 }
 0x807   : > { %v2465_v5 = vadd.f32 1e-05, %v2433_v47  ;;  %v2464_v48 = vadd.f32 1e-05, %v2432_v31  ;;  %v3741_v7 = vpop.eup %3740 }
 0x808   : > { %v2385_v2 = vpop.xlane.xlu1 %2384  ;;  %v2382_v8 = vpop.xlane.xlu0 %2381  ;;  %v2525_v56 = vmul.f32 %v3741_v7, %v5145_v15 }
 0x809   : > { %3746 = vrsqrt.f32 %v2465_v5  ;;  %v2435_v25 = vmul.f32 0.03125, %v2385_v2  ;;  %v2434_v40 = vmul.f32 0.03125, %v2382_v8 }
 0x80a   : > { %3748 = vrsqrt.f32 %v2464_v48  ;;  %v2565_v31 = vmul.f32 %v4926_v1, %v2525_v56 }
 0x80b   : > { %v2467_v45 = vadd.f32 1e-05, %v2435_v25  ;;  %v2466_v54 = vadd.f32 1e-05, %v2434_v40 }
 0x80c   : > { %v2391_v12 = vpop.xlane.xlu1 %2390  ;;  %v2388_v58 = vpop.xlane.xlu0 %2387 }
 0x80d   : > { %v2437_v62 = vmul.f32 0.03125, %v2391_v12  ;;  %v2436_v22 = vmul.f32 0.03125, %v2388_v58  ;;  %3750 = vrsqrt.f32 %v2467_v45  ;;  %v2605_v58 = vadd.f32 %v4940_v50, %v2565_v31 }
 0x80e   : > { %3752 = vrsqrt.f32 %v2466_v54 }
 0x80f   : > { %v3743_v6 = vpop.eup %3742  ;;  %v2469_v20 = vadd.f32 1e-05, %v2437_v62  ;;  %v2468_v49 = vadd.f32 1e-05, %v2436_v22  ;;  %v2946_v56 = vsel %vm1995_vm9, %v5064_v21, %v2605_v58 }
 0x810   : > { %v2397_v38 = vpop.xlane.xlu1 %2396  ;;  %v2394_v39 = vpop.xlane.xlu0 %2393  ;;  %v2526_v27 = vmul.f32 %v3743_v6, %v5156_v26 }
 0x811   : > { %v2439_v43 = vmul.f32 0.03125, %v2397_v38  ;;  %v2438_v63 = vmul.f32 0.03125, %v2394_v39  ;;  %v3745_v11 = vpop.eup %3744  ;;  %3754 = vrsqrt.f32 %v2468_v49 }
 0x812   : > { %3756 = vrsqrt.f32 %v2469_v20  ;;  %v2566_v2 = vmul.f32 %v4926_v1, %v2526_v27  ;;  %v2527_v26 = vmul.f32 %v3745_v11, %v5150_v3 }
 0x813   : > { %v3747_v19 = vpop.eup %3746  ;;  %v2471_v23 = vadd.f32 1e-05, %v2439_v43  ;;  %v2470_v53 = vadd.f32 1e-05, %v2438_v63 }
 0x814   : > { %v3749_v9 = vpop.eup %3748  ;;  %v2403_v16 = vpop.xlane.xlu1 %2402  ;;  %v2529_v40 = vmul.f32 %v3747_v19, %v5162_v44  ;;  %v2567_v3 = vmul.f32 %v4926_v1, %v2527_v26 }
 0x815   : > { %v2400_v47 = vpop.xlane.xlu0 %2399  ;;  %3758 = vrsqrt.f32 %v2471_v23  ;;  %v2441_v5 = vmul.f32 0.03125, %v2403_v16  ;;  %v2528_v15 = vmul.f32 %v3749_v9, %v5165_v46  ;;  %v2606_v46 = vadd.f32 %v4940_v50, %v2566_v2 }
 0x816   : > { %v2440_v48 = vmul.f32 0.03125, %v2400_v47  ;;  %3760 = vrsqrt.f32 %v2470_v53  ;;  %v2569_v49 = vmul.f32 %v4926_v1, %v2529_v40  ;;  %v2607_v47 = vadd.f32 %v4940_v50, %v2567_v3 }
 0x817   : > { %v2473_v8 = vadd.f32 1e-05, %v2441_v5  ;;  %v3751_v45 = vpop.eup %3750  ;;  %v2568_v7 = vmul.f32 %v4926_v1, %v2528_v15  ;;  %v2947_v16 = vsel %vm1995_vm9, %v5070_v10, %v2606_v46 }
 0x818   : > { %v2472_v25 = vadd.f32 1e-05, %v2440_v48  ;;  %v2409_v54 = vpop.xlane.xlu1 %2408  ;;  %v3753_v62 = vpop.eup %3752  ;;  %v2531_v27 = vmul.f32 %v3751_v45, %v5173_v24 }
 0x819   : > { %v2406_v12 = vpop.xlane.xlu0 %2405  ;;  %v2443_v22 = vmul.f32 0.03125, %v2409_v54  ;;  %3762 = vrsqrt.f32 %v2473_v8  ;;  %v2608_v63 = vadd.f32 %v4940_v50, %v2568_v7  ;;  %v2530_v11 = vmul.f32 %v3753_v62, %v5176_v0 }
 0x81a   : > { %v2442_v6 = vmul.f32 0.03125, %v2406_v12  ;;  %3764 = vrsqrt.f32 %v2472_v25  ;;  %v2609_v0 = vadd.f32 %v4940_v50, %v2569_v49  ;;  %v2571_v26 = vmul.f32 %v4926_v1, %v2531_v27 }
 0x81b   : > { %v2475_v20 = vadd.f32 1e-05, %v2443_v22  ;;  %v3755_v38 = vpop.eup %3754  ;;  %v2949_v15 = vsel %vm1995_vm9, %v5078_v28, %v2608_v63  ;;  %v2570_v10 = vmul.f32 %v4926_v1, %v2530_v11  ;;  %v2948_v54 = vsel %vm1995_vm9, %v5066_v4, %v2607_v47 }
 0x81c   : > { %v2474_v44 = vadd.f32 1e-05, %v2442_v6  ;;  %v2899_v39 = vpop.permute.xlu1 %2898  ;;  %v3757_v19 = vpop.eup %3756  ;;  %v2532_v24 = vmul.f32 %v3755_v38, %v5188_v13  ;;  %v2950_v62 = vsel %vm1995_vm9, %v5072_v32, %v2609_v0  ;;  %v2611_v4 = vadd.f32 %v4940_v50, %v2571_v26 }
 0x81d   : > { %v2412_v43 = vpop.xlane.xlu0 %2411  ;;  %v2962_v23 = vsel %vm386_vm0, %v2946_v56, %v2899_v39  ;;  %3766 = vrsqrt.f32 %v2475_v20  ;;  %v2533_v8 = vmul.f32 %v3757_v19, %v5185_v37  ;;  %v2610_v6 = vadd.f32 %v4940_v50, %v2570_v10 }
 0x81e   : > { %v2444_v53 = vmul.f32 0.03125, %v2412_v43  ;;  %v2979_v9 = vsel %vm2978_vm10, %v2962_v23, 0.0  ;;  %3768 = vrsqrt.f32 %v2474_v44  ;;  %v2572_v28 = vmul.f32 %v4926_v1, %v2532_v24 }
 0x81f   : > { %v3759_v21 = vpop.eup %3758  ;;  %2995 = vst [vmem:[%s5340_s24] sm:$0xff] %v2979_v9  ;;  %v2573_v46 = vmul.f32 %v4926_v1, %v2533_v8  ;;  %v2951_v63 = vsel %vm1995_vm9, %v5086_v29, %v2610_v6  ;;  %v2952_v11 = vsel %vm1995_vm9, %v5080_v33, %v2611_v4 }
 0x820   : > { %v2476_v31 = vadd.f32 1e-05, %v2444_v53  ;;  %v3761_v5 = vpop.eup %3760  ;;  %v2905_v48 = vpop.permute.xlu1 %2904  ;;  %v2535_v12 = vmul.f32 %v3759_v21, %v5197_v57  ;;  %v2612_v32 = vadd.f32 %v4940_v50, %v2572_v28 }
 0x821   : > { %v2901_v2 = vpop.permute.xlu0 %2900  ;;  %v2965_v25 = vsel %vm386_vm0, %v2949_v15, %v2905_v48  ;;  %v2534_v37 = vmul.f32 %v3761_v5, %v5200_v35  ;;  %v2613_v19 = vadd.f32 %v4940_v50, %v2573_v46 }
 0x822   : > { %v2963_v40 = vsel %vm386_vm0, %v2947_v16, %v2901_v2  ;;  %v2982_v45 = vsel %vm2978_vm10, %v2965_v25, 0.0  ;;  %3770 = vrsqrt.f32 %v2476_v31  ;;  %v2575_v38 = vmul.f32 %v4926_v1, %v2535_v12 }
 0x823   : > { %v2980_v13 = vsel %vm2978_vm10, %v2963_v40, 0.0  ;;  %2998 = vst [vmem:[%s5340_s24 + $0x18] sm:$0xff] %v2982_v45  ;;  %v3763_v58 = vpop.eup %3762  ;;  %v2574_v49 = vmul.f32 %v4926_v1, %v2534_v37  ;;  %v2953_v33 = vsel %vm1995_vm9, %v5094_v34, %v2612_v32  ;;  %v2954_v0 = vsel %vm1995_vm9, %v5088_v51, %v2613_v19 }
 0x824   : > { %2996 = vst [vmem:[%s5340_s24 + $0x8] sm:$0xff] %v2980_v13  ;;  %v2903_v7 = vpop.permute.xlu1 %2902  ;;  %v3765_v3 = vpop.eup %3764  ;;  %v2537_v39 = vmul.f32 %v3763_v58, %v5209_v17 }
 0x825   : > { %v2907_v22 = vpop.permute.xlu0 %2906  ;;  %v2964_v20 = vsel %vm386_vm0, %v2948_v54, %v2903_v7  ;;  %v2536_v23 = vmul.f32 %v3765_v3, %v5212_v18  ;;  %v2614_v29 = vadd.f32 %v4940_v50, %v2574_v49  ;;  %v2615_v18 = vadd.f32 %v4940_v50, %v2575_v38 }
 0x826   : > { %v2966_v44 = vsel %vm386_vm0, %v2950_v62, %v2907_v22  ;;  %v2981_v35 = vsel %vm2978_vm10, %v2964_v20, 0.0  ;;  %v2577_v21 = vmul.f32 %v4926_v1, %v2537_v39 }
 0x827   : > { %v2983_v57 = vsel %vm2978_vm10, %v2966_v44, 0.0  ;;  %2997 = vst [vmem:[%s5340_s24 + $0x10] sm:$0xff] %v2981_v35  ;;  %v3767_v56 = vpop.eup %3766  ;;  %v2576_v5 = vmul.f32 %v4926_v1, %v2536_v23  ;;  %v2955_v51 = vsel %vm1995_vm9, %v5096_v36, %v2614_v29 }
 0x828   : > { %2999 = vst [vmem:[%s5340_s24 + $0x20] sm:$0xff] %v2983_v57  ;;  %v2909_v43 = vpop.permute.xlu1 %2908  ;;  %v3769_v53 = vpop.eup %3768  ;;  %v2539_v15 = vmul.f32 %v3767_v56, %v5221_v61  ;;  %v2617_v61 = vadd.f32 %v4940_v50, %v2577_v21 }
 0x829   : > { %v2911_v27 = vpop.permute.xlu0 %2910  ;;  %v2967_v9 = vsel %vm386_vm0, %v2951_v63, %v2909_v43  ;;  %v2538_v48 = vmul.f32 %v3769_v53, %v5224_v55  ;;  %v2956_v55 = vsel %vm1995_vm9, %v5104_v59, %v2615_v18  ;;  %v2616_v45 = vadd.f32 %v4940_v50, %v2576_v5 }
 0x82a   : > { %v2968_v16 = vsel %vm386_vm0, %v2952_v11, %v2911_v27  ;;  %v2984_v17 = vsel %vm2978_vm10, %v2967_v9, 0.0  ;;  %v2579_v54 = vmul.f32 %v4926_v1, %v2539_v15  ;;  %v2958_v58 = vsel %vm1995_vm9, %v5102_v42, %v2617_v61 }
 0x82b   : > { %v2985_v47 = vsel %vm2978_vm10, %v2968_v16, 0.0  ;;  %3000 = vst [vmem:[%s5340_s24 + $0x28] sm:$0xff] %v2984_v17  ;;  %v2578_v13 = vmul.f32 %v4926_v1, %v2538_v48  ;;  %v2957_v62 = vsel %vm1995_vm9, %v5114_v14, %v2616_v45 }
 0x82c   : > { %3001 = vst [vmem:[%s5340_s24 + $0x30] sm:$0xff] %v2985_v47  ;;  %v2913_v31 = vpop.permute.xlu1 %2912  ;;  %v3771_v2 = vpop.eup %3770  ;;  %v2619_v6 = vadd.f32 %v4940_v50, %v2579_v54 }
 0x82d   : > { %v2915_v24 = vpop.permute.xlu0 %2914  ;;  %v2969_v34 = vsel %vm386_vm0, %v2953_v33, %v2913_v31  ;;  %v2540_v28 = vmul.f32 %v3771_v2, %v5233_v52  ;;  %v2618_v22 = vadd.f32 %v4940_v50, %v2578_v13 }
 0x82e   : > { %v2970_v10 = vsel %vm386_vm0, %v2954_v0, %v2915_v24  ;;  %v2986_v26 = vsel %vm2978_vm10, %v2969_v34, 0.0 }
 0x82f   : > { %v2987_v8 = vsel %vm2978_vm10, %v2970_v10, 0.0  ;;  %3002 = vst [vmem:[%s5340_s24 + $0x38] sm:$0xff] %v2986_v26  ;;  %v2580_v4 = vmul.f32 %v4926_v1, %v2540_v28  ;;  %v2959_v44 = vsel %vm1995_vm9, %v5112_v30, %v2618_v22  ;;  %v2960_v1 = vsel %vm1995_vm9, %v5120_v60, %v2619_v6 }
 0x830   : > { %3003 = vst [vmem:[%s5340_s24 + $0x40] sm:$0xff] %v2987_v8  ;;  %v2917_v25 = vpop.permute.xlu1 %2916 }
 0x831   : > { %v2919_v40 = vpop.permute.xlu0 %2918  ;;  %v2971_v37 = vsel %vm386_vm0, %v2955_v51, %v2917_v25  ;;  %v2620_v57 = vadd.f32 %v4940_v50, %v2580_v4 }
 0x832   : > { %v2972_v12 = vsel %vm386_vm0, %v2956_v55, %v2919_v40  ;;  %v2988_v36 = vsel %vm2978_vm10, %v2971_v37, 0.0 }
 0x833   : > { %v2989_v59 = vsel %vm2978_vm10, %v2972_v12, 0.0  ;;  %3004 = vst [vmem:[%s5340_s24 + $0x48] sm:$0xff] %v2988_v36  ;;  %v2961_v30 = vsel %vm1995_vm9, %v5125_v41, %v2620_v57 }
 0x834   : > { %3005 = vst [vmem:[%s5340_s24 + $0x50] sm:$0xff] %v2989_v59  ;;  %v2921_v7 = vpop.permute.xlu1 %2920 }
 0x835   : > { %v2923_v52 = vpop.permute.xlu0 %2922  ;;  %v2973_v46 = vsel %vm386_vm0, %v2957_v62, %v2921_v7 }
 0x836   : > { %v2974_v3 = vsel %vm386_vm0, %v2958_v58, %v2923_v52  ;;  %v2990_v20 = vsel %vm2978_vm10, %v2973_v46, 0.0 }
 0x837   : > { %v2991_v42 = vsel %vm2978_vm10, %v2974_v3, 0.0  ;;  %3006 = vst [vmem:[%s5340_s24 + $0x58] sm:$0xff] %v2990_v20 }
 0x838   : > { %3007 = vst [vmem:[%s5340_s24 + $0x60] sm:$0xff] %v2991_v42  ;;  %v2925_v14 = vpop.permute.xlu1 %2924 }
 0x839   : > { %v2927_v35 = vpop.permute.xlu0 %2926  ;;  %v2975_v32 = vsel %vm386_vm0, %v2959_v44, %v2925_v14 }
 0x83a   : > { %v2976_v49 = vsel %vm386_vm0, %v2960_v1, %v2927_v35  ;;  %v2992_v38 = vsel %vm2978_vm10, %v2975_v32, 0.0 }
 0x83b   : > { %v2993_v39 = vsel %vm2978_vm10, %v2976_v49, 0.0  ;;  %3008 = vst [vmem:[%s5340_s24 + $0x68] sm:$0xff] %v2992_v38 }
 0x83c   : > { %3009 = vst [vmem:[%s5340_s24 + $0x70] sm:$0xff] %v2993_v39  ;;  %v2929_v56 = vpop.permute.xlu1 %2928 }
 0x83d   : > { %v2977_v43 = vsel %vm386_vm0, %v2961_v30, %v2929_v56 }
 0x83e   : > { %v2994_v60 = vsel %vm2978_vm10, %v2977_v43, 0.0 }
 0x83f   : > { %3010 = vst [vmem:[%s5340_s24 + $0x78] sm:$0xff] %v2994_v60 }
 0x840 PF: > { %s12_s9 = sadd.s32 1, %s3779_s9  }
 0x841   : > { %p9_p5 = scmp.ge.s32.totalorder %s12_s9, 4  }
 0x843   :  { %11 = sbr.rel (!%p9_p5) target bundleno = 1 (0x1), region = 58 }

</bundles_post_ra>
